<compile_context>
chip_gen: v6e
topology: v6e:2x2x1
jax: 0.10.0
libtpu: 0.0.40
codegen_flags: <defaults>
</compile_context>

<pallas_src>
import functools
import math

import jax
import jax.numpy as jnp
from jax.experimental import pallas as pl
from jax.experimental.pallas import tpu as pltpu


_ON_TPU = jax.default_backend() == "tpu"


# ----------------------------------------------------------------------------
# small helpers (shared by kernels and the pure-JAX reference)
# ----------------------------------------------------------------------------
def _sigmoid(x):
    e = jnp.exp(-jnp.abs(x))
    return jnp.where(x >= 0.0, 1.0 / (1.0 + e), e / (1.0 + e))


def _silu(x):
    return x * _sigmoid(x)


def _softplus(x):
    xm = jnp.minimum(x, 20.0)
    return jnp.where(x > 20.0, x, jnp.log(1.0 + jnp.exp(xm)))


def _mxu(x):
    # GEMM operand cast: bf16 on a real TPU (MXU-native); bf16-rounded f32
    # elsewhere (XLA:CPU's DotThunk rejects bf16 x bf16 = f32).
    x = x.astype(jnp.bfloat16)
    return x if _ON_TPU else x.astype(jnp.float32)


def _round_bf16(x):
    return x.astype(jnp.bfloat16).astype(jnp.float32)


def _bf16_dot(a, b):
    # reference-side GEMM with MXU-equivalent operand rounding, f32 compute
    return jnp.dot(_round_bf16(a), _round_bf16(b),
                   preferred_element_type=jnp.float32)


def _bf16_einsum(eq, a, b):
    return jnp.einsum(eq, _round_bf16(a), _round_bf16(b),
                      preferred_element_type=jnp.float32)


def _pick_tile(n, candidates=(1024, 512, 256, 128, 64, 32, 16, 8)):
    for c in candidates:
        if n % c == 0:
            return c
    return n


def _vmem_limit(need_bytes):
    # per-stage scoped-VMEM budget with headroom, capped for v7x (64 MiB VMEM)
    return int(min(max(need_bytes + (16 << 20), 32 << 20), 64 << 20))


# ----------------------------------------------------------------------------
# Kernel 1: ln_1 LayerNorm (eps=1e-6) + in_proj as ONE fused (C, 2*Di) GEMM;
#           x / z halves written directly as bf16 streams.
# ----------------------------------------------------------------------------
def _ln_inproj_kernel(x_ref, lnw_ref, lnb_ref, w_ref, xo_ref, zo_ref):
    Di = xo_ref.shape[-1]
    x = x_ref[...]                                           # (TT, C) f32
    mu = jnp.mean(x, axis=-1, keepdims=True)
    var = jnp.mean((x - mu) ** 2, axis=-1, keepdims=True)
    xn = (x - mu) * jax.lax.rsqrt(var + 1e-6)
    xn = xn * lnw_ref[...] + lnb_ref[...]
    xz = jnp.dot(_mxu(xn), _mxu(w_ref[...]),
                 preferred_element_type=jnp.float32)         # (TT, 2*Di)
    xo_ref[...] = xz[:, :Di].astype(xo_ref.dtype)
    zo_ref[...] = xz[:, Di:].astype(zo_ref.dtype)


# ----------------------------------------------------------------------------
# Kernel 2: depthwise 3x3 conv (pad=1 via VMEM halo scratch) + SiLU.
#   Only the 1-pixel border is zeroed each step (interior is fully rewritten);
#   the kw (sublane) shift is hoisted: 3 shifted planes, 9 cheap row slices.
# ----------------------------------------------------------------------------
def _dwconv_silu_kernel(x_ref, w_ref, b_ref, o_ref, pad_s):
    H, W, Di = o_ref.shape
    pad_s[0:1, :, :] = jnp.zeros((1, W + 2, Di), jnp.float32)
    pad_s[H + 1:H + 2, :, :] = jnp.zeros((1, W + 2, Di), jnp.float32)
    pad_s[:, 0:1, :] = jnp.zeros((H + 2, 1, Di), jnp.float32)
    pad_s[:, W + 1:W + 2, :] = jnp.zeros((H + 2, 1, Di), jnp.float32)
    pad_s[1:H + 1, 1:W + 1, :] = x_ref[...].astype(jnp.float32)
    planes = [pad_s[:, kw:kw + W, :] for kw in range(3)]     # 3 shifted planes
    acc = jnp.zeros((H, W, Di), jnp.float32)
    for kh in range(3):
        for kw in range(3):
            acc = acc + planes[kw][kh:kh + H] * w_ref[kh * 3 + kw]
    o_ref[...] = _silu(acc + b_ref[...]).astype(o_ref.dtype)
    # TODO(synk): for very large H*W*Di (v7x, 64 MiB VMEM) tile over row bands
    # with a 2-row halo instead of whole images.


# ----------------------------------------------------------------------------
# Kernel 3: per-(direction-pair, batch) SSM core.
#   One invocation computes BOTH the forward (dir = pair) and backward
#   (dir = pair + 2) selective scans over the same token stream and writes
#   their sum.  x_proj for both directions is ONE fused GEMM.  The time
#   recurrence carries the full (N, Di) state, TL(=8) steps per tile; the
#   C-reduction is folded into each step (no stacked states -> no spills).
# ----------------------------------------------------------------------------
def _ssm_pair_kernel(xs_ref, xw_ref, dtw_ref, dtb_ref, alog_ref, dd_ref,
                     y_ref, u_s, xdbl_s, delta_s, bc_s, yacc_s, *, R, N, TL):
    L, Di = xs_ref.shape                       # L is the (padded) token count
    ntiles = L // TL
    W2 = R + 2 * N

    u_s[...] = xs_ref[...].astype(jnp.float32)
    # fused x_proj GEMM for forward + backward direction (2x MXU lane fill)
    xdbl_s[...] = jnp.dot(_mxu(xs_ref[...]), _mxu(xw_ref[...]),
                          preferred_element_type=jnp.float32)   # (L, 2*W2)

    for fb in range(2):                                      # 0: fwd, 1: bwd
        x_dbl = xdbl_s[:, fb * W2:(fb + 1) * W2]             # (L, W2)
        delta = jnp.dot(_mxu(x_dbl[:, :R]), _mxu(dtw_ref[fb]),
                        preferred_element_type=jnp.float32)  # (L, Di)
        delta_s[...] = _softplus(delta + dtb_ref[fb])
        bc_s[...] = x_dbl[:, R:]                             # (L, 2N) = [B | C]
        neg_a = -jnp.exp(alog_ref[fb])                       # (N, Di)
        ddv = dd_ref[fb]                                     # (1, Di)
        reverse = fb == 1

        def tile_body(t, state, neg_a=neg_a, ddv=ddv, reverse=reverse):
            tile = (ntiles - 1 - t) if reverse else t
            base = pl.multiple_of(tile * TL, TL)
            rows = pl.ds(base, TL)
            d_t = delta_s[rows, :]                           # (TL, Di)
            u_t = u_s[rows, :]                               # (TL, Di)
            bc_t = bc_s[rows, :]                             # (TL, 2N)
            a_e = jnp.exp(d_t[:, None, :] * neg_a[None, :, :])   # (TL, N, Di)
            b_e = (d_t * u_t)[:, None, :] * bc_t[:, :N, None]    # (TL, N, Di)
            c_b = bc_t[:, N:, None]                              # (TL, N, 1)
            order = range(TL - 1, -1, -1) if reverse else range(TL)
            y_rows = [None] * TL
            for i in order:                  # serial recurrence within the tile
                state = a_e[i] * state + b_e[i]                  # (N, Di)
                # fold the C-reduction into the step (no stacked states)
                y_rows[i] = jnp.sum(state * c_b[i], axis=0, keepdims=True)
            y_t = jnp.concatenate(y_rows, axis=0) + ddv * u_t    # (TL, Di)
            if reverse:
                yacc_s[rows, :] += y_t
            else:
                yacc_s[rows, :] = y_t
            return state

        jax.lax.fori_loop(0, ntiles, tile_body,
                          jnp.zeros((N, Di), jnp.float32))

    y_ref[...] = yacc_s[...].astype(y_ref.dtype)


# ----------------------------------------------------------------------------
# Kernel 4: out_norm LayerNorm (eps=1e-5) + merge of the two traversal orders
#           + SiLU(z) gate + out_proj + residual
# ----------------------------------------------------------------------------
def _out_kernel(y0_ref, y1_ref, z_ref, res_ref, onw_ref, onb_ref, w_ref, o_ref):
    y = y0_ref[...].astype(jnp.float32) + y1_ref[...].astype(jnp.float32)
    mu = jnp.mean(y, axis=-1, keepdims=True)
    var = jnp.mean((y - mu) ** 2, axis=-1, keepdims=True)
    yn = (y - mu) * jax.lax.rsqrt(var + 1e-5)
    yn = yn * onw_ref[...] + onb_ref[...]
    yg = yn * _silu(z_ref[...].astype(jnp.float32))
    out = jnp.dot(_mxu(yg), _mxu(w_ref[...]),
                  preferred_element_type=jnp.float32)
    o_ref[...] = res_ref[...] + out


# ----------------------------------------------------------------------------
# Wrapper
# ----------------------------------------------------------------------------
@jax.jit
def vss_block_forward(x, p):
    B, H, W, C = x.shape
    L = H * W
    T = B * L
    Di = p["win_t"].shape[1] // 2
    N = p["alog_t"].shape[1]
    R = p["dtw_t"].shape[1]
    W2 = R + 2 * N

    TT = _pick_tile(T)                   # token tile for kernels 1 and 4
    TL = 8                               # time tile for the scan
    Lp = ((L + TL - 1) // TL) * TL       # pad stream to a multiple of 8

    x_flat = x.reshape(T, C)
    w_in = p["win_t"].astype(jnp.bfloat16)        # (C, 2*Di)
    w_out = p["wout_t"].astype(jnp.bfloat16)      # (Di, C)

    # 1) ln_1 + in_proj (single fused GEMM; bf16 x / z streams)
    xk, zk = pl.pallas_call(
        _ln_inproj_kernel,
        grid=(T // TT,),
        in_specs=[
            pl.BlockSpec((TT, C), lambda i: (i, 0)),
            pl.BlockSpec((1, C), lambda i: (0, 0)),
            pl.BlockSpec((1, C), lambda i: (0, 0)),
            pl.BlockSpec((C, 2 * Di), lambda i: (0, 0)),
        ],
        out_specs=(pl.BlockSpec((TT, Di), lambda i: (i, 0)),
                   pl.BlockSpec((TT, Di), lambda i: (i, 0))),
        out_shape=(jax.ShapeDtypeStruct((T, Di), jnp.bfloat16),
                   jax.ShapeDtypeStruct((T, Di), jnp.bfloat16)),
        compiler_params=pltpu.CompilerParams(
            dimension_semantics=("parallel",),
            vmem_limit_bytes=_vmem_limit(8 * TT * (C + Di) + 4 * C * Di)),
    )(x_flat, p["ln1_w"], p["ln1_b"], w_in)

    # 2) depthwise 3x3 conv + SiLU (halo handled in VMEM, no HBM pad)
    x_sp = xk.reshape(B, H, W, Di)
    conv_need = (H + 2) * (W + 2) * Di * 4 + 8 * H * W * Di
    x_conv = pl.pallas_call(
        _dwconv_silu_kernel,
        grid=(B,),
        in_specs=[
            pl.BlockSpec((None, H, W, Di), lambda b: (b, 0, 0, 0)),
            pl.BlockSpec((9, Di), lambda b: (0, 0)),
            pl.BlockSpec((1, Di), lambda b: (0, 0)),
        ],
        out_specs=pl.BlockSpec((None, H, W, Di), lambda b: (b, 0, 0, 0)),
        out_shape=jax.ShapeDtypeStruct((B, H, W, Di), jnp.bfloat16),
        scratch_shapes=[pltpu.VMEM((H + 2, W + 2, Di), jnp.float32)],
        compiler_params=pltpu.CompilerParams(
            dimension_semantics=("parallel",),
            vmem_limit_bytes=_vmem_limit(conv_need)),
    )(x_sp, p["conv_w"], p["conv_b"])

    # 3) SS2D selective scan:
    #    pair 0 = row-major stream (dirs 0 fwd + 2 bwd)
    #    pair 1 = column-major stream (dirs 1 fwd + 3 bwd)
    x0 = x_conv.reshape(B, L, Di)
    x1 = jnp.transpose(x_conv, (0, 2, 1, 3)).reshape(B, L, Di)
    if Lp != L:
        pad = ((0, 0), (0, Lp - L), (0, 0))
        x0 = jnp.pad(x0, pad)     # zero tokens are a no-op for the recurrence
        x1 = jnp.pad(x1, pad)
    xs_pair = jnp.stack([x0, x1], axis=1)                    # (B, 2, Lp, Di) bf16
    # TODO(synk): fold the (H,W)<->(W,H) stream transposes into kernels 2 / 3
    # (in-VMEM relayout) to drop the remaining XLA transpose/stack HBM passes.

    def _pairw(w):                               # (K=4, ...) -> (pair, fb, ...)
        return jnp.swapaxes(w.reshape(2, 2, *w.shape[1:]), 0, 1)

    xw_fused = jnp.concatenate([p["xw_t"][:2], p["xw_t"][2:]],
                               axis=-1).astype(jnp.bfloat16)  # (2, Di, 2*W2)
    dtw_p = _pairw(p["dtw_t"]).astype(jnp.bfloat16)           # (2, 2, R, Di)
    dtb_p = _pairw(p["dtb"])                                  # (2, 2, 1, Di)
    al_p = _pairw(p["alog_t"])                                # (2, 2, N, Di)
    dd_p = _pairw(p["dd"])                                    # (2, 2, 1, Di)

    ssm_need = 8 * Lp * Di + 4 * Lp * (3 * Di + 2 * W2 + 2 * N)
    y_pair = pl.pallas_call(
        functools.partial(_ssm_pair_kernel, R=R, N=N, TL=TL),
        grid=(2, B),                             # weights resident across batch
        in_specs=[
            pl.BlockSpec((None, None, Lp, Di), lambda pr, b: (b, pr, 0, 0)),
            pl.BlockSpec((None, Di, 2 * W2), lambda pr, b: (pr, 0, 0)),
            pl.BlockSpec((None, 2, R, Di), lambda pr, b: (pr, 0, 0, 0)),
            pl.BlockSpec((None, 2, 1, Di), lambda pr, b: (pr, 0, 0, 0)),
            pl.BlockSpec((None, 2, N, Di), lambda pr, b: (pr, 0, 0, 0)),
            pl.BlockSpec((None, 2, 1, Di), lambda pr, b: (pr, 0, 0, 0)),
        ],
        out_specs=pl.BlockSpec((None, None, Lp, Di), lambda pr, b: (b, pr, 0, 0)),
        out_shape=jax.ShapeDtypeStruct((B, 2, Lp, Di), jnp.bfloat16),
        scratch_shapes=[pltpu.VMEM((Lp, Di), jnp.float32),        # u (f32 tokens)
                        pltpu.VMEM((Lp, 2 * W2), jnp.float32),    # fused x_proj
                        pltpu.VMEM((Lp, Di), jnp.float32),        # delta
                        pltpu.VMEM((Lp, 2 * N), jnp.float32),     # [B | C]
                        pltpu.VMEM((Lp, Di), jnp.float32)],       # y accumulator
        compiler_params=pltpu.CompilerParams(
            dimension_semantics=("parallel", "parallel"),
            vmem_limit_bytes=_vmem_limit(ssm_need)),
    )(xs_pair, xw_fused, dtw_p, dtb_p, al_p, dd_p)

    # merge traversal orders: one transpose for the column-major pair; the add
    # happens inside the output kernel (no y_sum HBM round trip).
    y_rm = y_pair[:, 0, :L].reshape(T, Di)
    y_cm = jnp.transpose(y_pair[:, 1, :L].reshape(B, W, H, Di),
                         (0, 2, 1, 3)).reshape(T, Di)

    # 4) out_norm + gate + out_proj + residual
    out = pl.pallas_call(
        _out_kernel,
        grid=(T // TT,),
        in_specs=[
            pl.BlockSpec((TT, Di), lambda i: (i, 0)),
            pl.BlockSpec((TT, Di), lambda i: (i, 0)),
            pl.BlockSpec((TT, Di), lambda i: (i, 0)),
            pl.BlockSpec((TT, C), lambda i: (i, 0)),
            pl.BlockSpec((1, Di), lambda i: (0, 0)),
            pl.BlockSpec((1, Di), lambda i: (0, 0)),
            pl.BlockSpec((Di, C), lambda i: (0, 0)),
        ],
        out_specs=pl.BlockSpec((TT, C), lambda i: (i, 0)),
        out_shape=jax.ShapeDtypeStruct((T, C), jnp.float32),
        compiler_params=pltpu.CompilerParams(
            dimension_semantics=("parallel",),
            vmem_limit_bytes=_vmem_limit(12 * TT * Di + 16 * TT * C + 2 * Di * C)),
    )(y_rm, y_cm, zk, x_flat, p["onorm_w"], p["onorm_b"], w_out)

    return out.reshape(B, H, W, C)


# ----------------------------------------------------------------------------
# Deterministic parameter construction (SS2D defaults: expand=2, d_conv=3,
# dt_rank="auto", bias=False, conv_bias=True)
# ----------------------------------------------------------------------------
def init_params(key, C, d_state=16, expand=2, d_conv=3):
    Di = expand * C
    R = max(1, math.ceil(C / 16))            # dt_rank "auto"
    N = d_state
    K = 4
    ks = jax.random.split(key, 8)

    def rnd(k, shape, scale):
        return scale * jax.random.normal(k, shape, jnp.float32)

    # dt bias such that softplus(bias) ~ U[1e-3, 1e-1] (mimics VMamba dt init)
    u = jax.random.uniform(ks[5], (K, 1, Di), jnp.float32)
    dt = jnp.exp(u * (math.log(0.1) - math.log(1e-3)) + math.log(1e-3))
    dtb = dt + jnp.log(-jnp.expm1(-dt))      # inverse softplus

    alog_t = (jnp.log(jnp.arange(1, N + 1, dtype=jnp.float32))[None, :, None]
              * jnp.ones((K, 1, Di), jnp.float32))           # (K, N, Di) = A_log^T

    return dict(
        ln1_w=jnp.ones((1, C), jnp.float32),
        ln1_b=jnp.zeros((1, C), jnp.float32),
        win_t=rnd(ks[0], (C, 2 * Di), 1.0 / math.sqrt(C)),    # in_proj.weight^T
        conv_w=rnd(ks[1], (d_conv * d_conv, Di), 1.0 / 3.0),  # depthwise taps
        conv_b=rnd(ks[2], (1, Di), 0.1),
        xw_t=rnd(ks[3], (K, Di, R + 2 * N), 1.0 / math.sqrt(Di)),  # x_proj_weight^T
        dtw_t=rnd(ks[4], (K, R, Di), 1.0 / math.sqrt(R)),          # dt_projs_weight^T
        dtb=dtb,                                                   # (K, 1, Di)
        alog_t=alog_t,                                             # (K, N, Di)
        dd=jnp.ones((K, 1, Di), jnp.float32),                      # Ds
        onorm_w=jnp.ones((1, Di), jnp.float32),
        onorm_b=jnp.zeros((1, Di), jnp.float32),
        wout_t=rnd(ks[6], (Di, C), 1.0 / math.sqrt(Di)),           # out_proj.weight^T
    )


# ----------------------------------------------------------------------------
# Pure-JAX reference of the same forward pass.  GEMM operands are rounded
# through bf16 (mirroring the kernel's MXU numerics) but the dot itself runs
# in f32 so it works on every backend (no bf16 x bf16 = f32 dot_generals).
# ----------------------------------------------------------------------------
def vss_block_ref(x, p):
    B, H, W, C = x.shape
    L = H * W
    Di = p["win_t"].shape[1] // 2
    N = p["alog_t"].shape[1]
    R = p["dtw_t"].shape[1]

    x_flat = x.reshape(-1, C)
    mu = jnp.mean(x_flat, -1, keepdims=True)
    var = jnp.mean((x_flat - mu) ** 2, -1, keepdims=True)
    xn = (x_flat - mu) * jax.lax.rsqrt(var + 1e-6)
    xn = xn * p["ln1_w"] + p["ln1_b"]
    xz = _bf16_dot(xn, p["win_t"])
    xk = _round_bf16(xz[:, :Di])              # kernels store x / z in bf16
    zk = _round_bf16(xz[:, Di:])

    x_sp = xk.reshape(B, H, W, Di)
    xp = jnp.pad(x_sp, ((0, 0), (1, 1), (1, 1), (0, 0)))
    acc = jnp.zeros((B, H, W, Di), jnp.float32)
    for kh in range(3):
        for kw in range(3):
            acc = acc + xp[:, kh:kh + H, kw:kw + W, :] * p["conv_w"][kh * 3 + kw]
    x_conv = _round_bf16(_silu(acc + p["conv_b"]))   # conv output stored in bf16

    xs0 = x_conv.reshape(B, L, Di)
    xs1 = jnp.transpose(x_conv, (0, 2, 1, 3)).reshape(B, L, Di)
    xs = jnp.stack([xs0, xs1, jnp.flip(xs0, 1), jnp.flip(xs1, 1)], axis=1)

    x_dbl = _bf16_einsum("bkld,kdc->bklc", xs, p["xw_t"])
    dtr, Bs, Cs = x_dbl[..., :R], x_dbl[..., R:R + N], x_dbl[..., R + N:]
    delta = _bf16_einsum("bklr,krd->bkld", dtr, p["dtw_t"])
    delta = _softplus(delta + p["dtb"][:, 0][None, :, None, :])
    A = -jnp.exp(jnp.transpose(p["alog_t"], (0, 2, 1)))     # (K, Di, N)
    Dp = p["dd"][:, 0]                                      # (K, Di)
    du = delta * xs

    def step(state, inp):
        d_l, du_l, u_l, B_l, C_l = inp
        state = jnp.exp(d_l[..., None] * A[None]) * state + du_l[..., None] * B_l[..., None, :]
        y_l = jnp.sum(state * C_l[..., None, :], axis=-1) + Dp[None] * u_l
        return state, y_l

    ins = tuple(jnp.moveaxis(a, 2, 0) for a in (delta, du, xs, Bs, Cs))
    state0 = jnp.zeros((B, 4, Di, N), jnp.float32)
    _, ys = jax.lax.scan(step, state0, ins)
    y_dirs = jnp.moveaxis(ys, 0, 2)                         # (B, 4, L, Di)

    y1 = y_dirs[:, 0]
    y2 = jnp.flip(y_dirs[:, 2], axis=1)
    y3 = jnp.transpose(y_dirs[:, 1].reshape(B, W, H, Di), (0, 2, 1, 3)).reshape(B, L, Di)
    y4 = jnp.transpose(jnp.flip(y_dirs[:, 3], axis=1).reshape(B, W, H, Di),
                       (0, 2, 1, 3)).reshape(B, L, Di)
    y_rm = _round_bf16(y1 + y2)               # kernel stores pair sums in bf16
    y_cm = _round_bf16(y3 + y4)
    y = (y_rm + y_cm).reshape(-1, Di)

    mu = jnp.mean(y, -1, keepdims=True)
    var = jnp.mean((y - mu) ** 2, -1, keepdims=True)
    yn = (y - mu) * jax.lax.rsqrt(var + 1e-5)
    yn = yn * p["onorm_w"] + p["onorm_b"]
    out = _bf16_dot(yn * _silu(zk), p["wout_t"])
    return (x_flat + out).reshape(B, H, W, C)


if __name__ == "__main__":
    B, H, W, C = 2, 8, 8, 32          # hidden_dim = 32, d_state = 16, d_inner = 64
    key = jax.random.PRNGKey(0)
    kx, kp = jax.random.split(key)
    x = jax.random.normal(kx, (B, H, W, C), jnp.float32)
    params = init_params(kp, C, d_state=16)

    out = jax.block_until_ready(vss_block_forward(x, params))
    ref = jax.block_until_ready(vss_block_ref(x, params))

    assert out.shape == x.shape and out.dtype == jnp.float32
    max_err = float(jnp.max(jnp.abs(out - ref)))
    assert max_err < 1e-2, f"mismatch vs pure-JAX reference: {max_err}"
    print("KERNEL_OK")
</pallas_src>

<mosaic_0001>
module attributes {stable_mosaic.version = 11 : i64} {
  func.func @_ln_inproj_kernel(%arg0: i32, %arg1: memref<128x32xf32, #tpu.memory_space<vmem>>, %arg2: memref<1x32xf32, #tpu.memory_space<vmem>>, %arg3: memref<1x32xf32, #tpu.memory_space<vmem>>, %arg4: memref<32x128xbf16, #tpu.memory_space<vmem>>, %arg5: memref<128x64xbf16, #tpu.memory_space<vmem>>, %arg6: memref<128x64xbf16, #tpu.memory_space<vmem>>) attributes {dimension_semantics = [#tpu.dimension_semantics<parallel>], iteration_bounds = array<i64: 1>, scalar_prefetch = 0 : i64, scratch_operands = 0 : i64, tpu.core_type = #tpu.core_type<tc>, window_params = [{transform_indices = @transform_0, window_bounds = array<i64: 128, 32>}, {pipeline_mode = #tpu.pipeline_mode<synchronous>, transform_indices = @transform_1, window_bounds = array<i64: 1, 32>}, {pipeline_mode = #tpu.pipeline_mode<synchronous>, transform_indices = @transform_2, window_bounds = array<i64: 1, 32>}, {pipeline_mode = #tpu.pipeline_mode<synchronous>, transform_indices = @transform_3, window_bounds = array<i64: 32, 128>}, {transform_indices = @transform_4, window_bounds = array<i64: 128, 64>}, {transform_indices = @transform_5, window_bounds = array<i64: 128, 64>}]} {
    %c0 = arith.constant 0 : index
    %c0_0 = arith.constant 0 : index
    %0 = vector.load %arg1[%c0, %c0_0] : memref<128x32xf32, #tpu.memory_space<vmem>>, vector<128x32xf32>
    %cst = arith.constant dense<0.000000e+00> : vector<128xf32>
    %1 = vector.multi_reduction <add>, %0, %cst [1] : vector<128x32xf32> to vector<128xf32>
    %2 = vector.shape_cast %1 : vector<128xf32> to vector<128x1xf32>
    %cst_1 = arith.constant 3.200000e+01 : f32
    %3 = vector.broadcast %cst_1 : f32 to vector<128x1xf32>
    %4 = arith.divf %2, %3 : vector<128x1xf32>
    %5 = vector.broadcast %4 : vector<128x1xf32> to vector<128x32xf32>
    %6 = arith.subf %0, %5 : vector<128x32xf32>
    %7 = arith.mulf %6, %6 : vector<128x32xf32>
    %cst_2 = arith.constant dense<0.000000e+00> : vector<128xf32>
    %8 = vector.multi_reduction <add>, %7, %cst_2 [1] : vector<128x32xf32> to vector<128xf32>
    %9 = vector.shape_cast %8 : vector<128xf32> to vector<128x1xf32>
    %cst_3 = arith.constant 3.200000e+01 : f32
    %10 = vector.broadcast %cst_3 : f32 to vector<128x1xf32>
    %11 = arith.divf %9, %10 : vector<128x1xf32>
    %12 = vector.broadcast %4 : vector<128x1xf32> to vector<128x32xf32>
    %13 = arith.subf %0, %12 : vector<128x32xf32>
    %cst_4 = arith.constant 9.99999997E-7 : f32
    %14 = vector.broadcast %cst_4 : f32 to vector<128x1xf32>
    %15 = arith.addf %11, %14 : vector<128x1xf32>
    %16 = math.rsqrt %15 : vector<128x1xf32>
    %17 = vector.broadcast %16 : vector<128x1xf32> to vector<128x32xf32>
    %18 = arith.mulf %13, %17 : vector<128x32xf32>
    %c0_5 = arith.constant 0 : index
    %c0_6 = arith.constant 0 : index
    %19 = vector.load %arg2[%c0_5, %c0_6] : memref<1x32xf32, #tpu.memory_space<vmem>>, vector<1x32xf32>
    %20 = vector.broadcast %19 : vector<1x32xf32> to vector<128x32xf32>
    %21 = arith.mulf %18, %20 : vector<128x32xf32>
    %c0_7 = arith.constant 0 : index
    %c0_8 = arith.constant 0 : index
    %22 = vector.load %arg3[%c0_7, %c0_8] : memref<1x32xf32, #tpu.memory_space<vmem>>, vector<1x32xf32>
    %23 = vector.broadcast %22 : vector<1x32xf32> to vector<128x32xf32>
    %24 = arith.addf %21, %23 : vector<128x32xf32>
    %25 = arith.truncf %24 : vector<128x32xf32> to vector<128x32xbf16>
    %26 = arith.extf %25 : vector<128x32xbf16> to vector<128x32xf32>
    %c0_9 = arith.constant 0 : index
    %c0_10 = arith.constant 0 : index
    %27 = vector.load %arg4[%c0_9, %c0_10] : memref<32x128xbf16, #tpu.memory_space<vmem>>, vector<32x128xbf16>
    %28 = arith.extf %27 : vector<32x128xbf16> to vector<32x128xf32>
    %cst_11 = arith.constant dense<0.000000e+00> : vector<128x128xf32>
    %29 = tpu.matmul %26, %28, %cst_11 {dimension_numbers = #tpu.dot_dimension_numbers<[1], [0], [0], [1], [0, 0, 1, 1], [], []>} : vector<128x32xf32>, vector<32x128xf32>, vector<128x128xf32> -> vector<128x128xf32>
    %30 = vector.extract_strided_slice %29 {offsets = [0, 0], sizes = [128, 64], strides = [1, 1]} : vector<128x128xf32> to vector<128x64xf32>
    %31 = arith.truncf %30 : vector<128x64xf32> to vector<128x64xbf16>
    %c0_12 = arith.constant 0 : index
    %c0_13 = arith.constant 0 : index
    %32 = vector.load %arg5[%c0_12, %c0_13] : memref<128x64xbf16, #tpu.memory_space<vmem>>, vector<128x64xbf16>
    tpu.vector_store %arg5[%c0_12, %c0_13], %31 {strides = array<i32>} : memref<128x64xbf16, #tpu.memory_space<vmem>>, vector<128x64xbf16>,
    %33 = vector.extract_strided_slice %29 {offsets = [0, 64], sizes = [128, 64], strides = [1, 1]} : vector<128x128xf32> to vector<128x64xf32>
    %34 = arith.truncf %33 : vector<128x64xf32> to vector<128x64xbf16>
    %c0_14 = arith.constant 0 : index
    %c0_15 = arith.constant 0 : index
    %35 = vector.load %arg6[%c0_14, %c0_15] : memref<128x64xbf16, #tpu.memory_space<vmem>>, vector<128x64xbf16>
    tpu.vector_store %arg6[%c0_14, %c0_15], %34 {strides = array<i32>} : memref<128x64xbf16, #tpu.memory_space<vmem>>, vector<128x64xbf16>,
    return
  }
  func.func @transform_0(%arg0: i32) -> (i32, i32) {
    %c0_i32 = arith.constant 0 : i32
    %c0_i32_0 = arith.constant 0 : i32
    return %arg0, %c0_i32 : i32, i32
  }
  func.func @transform_1(%arg0: i32) -> (i32, i32) {
    %c0_i32 = arith.constant 0 : i32
    %c0_i32_0 = arith.constant 0 : i32
    %c0_i32_1 = arith.constant 0 : i32
    return %c0_i32, %c0_i32_0 : i32, i32
  }
  func.func @transform_2(%arg0: i32) -> (i32, i32) {
    %c0_i32 = arith.constant 0 : i32
    %c0_i32_0 = arith.constant 0 : i32
    %c0_i32_1 = arith.constant 0 : i32
    return %c0_i32, %c0_i32_0 : i32, i32
  }
  func.func @transform_3(%arg0: i32) -> (i32, i32) {
    %c0_i32 = arith.constant 0 : i32
    %c0_i32_0 = arith.constant 0 : i32
    %c0_i32_1 = arith.constant 0 : i32
    return %c0_i32, %c0_i32_0 : i32, i32
  }
  func.func @transform_4(%arg0: i32) -> (i32, i32) {
    %c0_i32 = arith.constant 0 : i32
    %c0_i32_0 = arith.constant 0 : i32
    return %arg0, %c0_i32 : i32, i32
  }
  func.func @transform_5(%arg0: i32) -> (i32, i32) {
    %c0_i32 = arith.constant 0 : i32
    %c0_i32_0 = arith.constant 0 : i32
    return %arg0, %c0_i32 : i32, i32
  }
}

module attributes {stable_mosaic.version = 11 : i64} {
  func.func @_dwconv_silu_kernel(%arg0: i32, %arg1: memref<1x8x8x64xbf16, #tpu.memory_space<vmem>>, %arg2: memref<9x64xf32, #tpu.memory_space<vmem>>, %arg3: memref<1x64xf32, #tpu.memory_space<vmem>>, %arg4: memref<1x8x8x64xbf16, #tpu.memory_space<vmem>>, %arg5: memref<10x10x64xf32, #tpu.memory_space<vmem>>) attributes {dimension_semantics = [#tpu.dimension_semantics<parallel>], iteration_bounds = array<i64: 2>, scalar_prefetch = 0 : i64, scratch_operands = 1 : i64, tpu.core_type = #tpu.core_type<tc>, window_params = [{transform_indices = @transform_0, window_bounds = array<i64: 1, 8, 8, 64>}, {pipeline_mode = #tpu.pipeline_mode<synchronous>, transform_indices = @transform_1, window_bounds = array<i64: 9, 64>}, {pipeline_mode = #tpu.pipeline_mode<synchronous>, transform_indices = @transform_2, window_bounds = array<i64: 1, 64>}, {transform_indices = @transform_3, window_bounds = array<i64: 1, 8, 8, 64>}]} {
    %cst = arith.constant 0.000000e+00 : f32
    %0 = vector.broadcast %cst : f32 to vector<1x10x64xf32>
    %c0 = arith.constant 0 : index
    %c0_0 = arith.constant 0 : index
    %c0_1 = arith.constant 0 : index
    %1 = vector.load %arg5[%c0, %c0_0, %c0_1] : memref<10x10x64xf32, #tpu.memory_space<vmem>>, vector<1x10x64xf32>
    tpu.vector_store %arg5[%c0, %c0_0, %c0_1], %0 {strides = array<i32>} : memref<10x10x64xf32, #tpu.memory_space<vmem>>, vector<1x10x64xf32>,
    %cst_2 = arith.constant 0.000000e+00 : f32
    %2 = vector.broadcast %cst_2 : f32 to vector<1x10x64xf32>
    %c9 = arith.constant 9 : index
    %c0_3 = arith.constant 0 : index
    %c0_4 = arith.constant 0 : index
    %3 = vector.load %arg5[%c9, %c0_3, %c0_4] : memref<10x10x64xf32, #tpu.memory_space<vmem>>, vector<1x10x64xf32>
    tpu.vector_store %arg5[%c9, %c0_3, %c0_4], %2 {strides = array<i32>} : memref<10x10x64xf32, #tpu.memory_space<vmem>>, vector<1x10x64xf32>,
    %cst_5 = arith.constant 0.000000e+00 : f32
    %4 = vector.broadcast %cst_5 : f32 to vector<10x1x64xf32>
    %c0_6 = arith.constant 0 : index
    %c0_7 = arith.constant 0 : index
    %c0_8 = arith.constant 0 : index
    %5 = vector.load %arg5[%c0_6, %c0_7, %c0_8] : memref<10x10x64xf32, #tpu.memory_space<vmem>>, vector<10x1x64xf32>
    tpu.vector_store %arg5[%c0_6, %c0_7, %c0_8], %4 {strides = array<i32>} : memref<10x10x64xf32, #tpu.memory_space<vmem>>, vector<10x1x64xf32>,
    %cst_9 = arith.constant 0.000000e+00 : f32
    %6 = vector.broadcast %cst_9 : f32 to vector<10x1x64xf32>
    %c0_10 = arith.constant 0 : index
    %c9_11 = arith.constant 9 : index
    %c0_12 = arith.constant 0 : index
    %7 = vector.load %arg5[%c0_10, %c9_11, %c0_12] : memref<10x10x64xf32, #tpu.memory_space<vmem>>, vector<10x1x64xf32>
    tpu.vector_store %arg5[%c0_10, %c9_11, %c0_12], %6 {strides = array<i32>} : memref<10x10x64xf32, #tpu.memory_space<vmem>>, vector<10x1x64xf32>,
    %c0_13 = arith.constant 0 : index
    %c0_14 = arith.constant 0 : index
    %c0_15 = arith.constant 0 : index
    %c0_16 = arith.constant 0 : index
    %8 = vector.load %arg1[%c0_13, %c0_14, %c0_15, %c0_16] : memref<1x8x8x64xbf16, #tpu.memory_space<vmem>>, vector<1x8x8x64xbf16>
    %9 = vector.shape_cast %8 : vector<1x8x8x64xbf16> to vector<8x8x64xbf16>
    %10 = arith.extf %9 : vector<8x8x64xbf16> to vector<8x8x64xf32>
    %c1 = arith.constant 1 : index
    %c1_17 = arith.constant 1 : index
    %c0_18 = arith.constant 0 : index
    %11 = vector.load %arg5[%c1, %c1_17, %c0_18] : memref<10x10x64xf32, #tpu.memory_space<vmem>>, vector<8x8x64xf32>
    tpu.vector_store %arg5[%c1, %c1_17, %c0_18], %10 {strides = array<i32>} : memref<10x10x64xf32, #tpu.memory_space<vmem>>, vector<8x8x64xf32>,
    %c0_19 = arith.constant 0 : index
    %c0_20 = arith.constant 0 : index
    %c0_21 = arith.constant 0 : index
    %12 = vector.load %arg5[%c0_19, %c0_20, %c0_21] : memref<10x10x64xf32, #tpu.memory_space<vmem>>, vector<10x8x64xf32>
    %c0_22 = arith.constant 0 : index
    %c1_23 = arith.constant 1 : index
    %c0_24 = arith.constant 0 : index
    %13 = vector.load %arg5[%c0_22, %c1_23, %c0_24] : memref<10x10x64xf32, #tpu.memory_space<vmem>>, vector<10x8x64xf32>
    %c0_25 = arith.constant 0 : index
    %c2 = arith.constant 2 : index
    %c0_26 = arith.constant 0 : index
    %14 = vector.load %arg5[%c0_25, %c2, %c0_26] : memref<10x10x64xf32, #tpu.memory_space<vmem>>, vector<10x8x64xf32>
    %cst_27 = arith.constant 0.000000e+00 : f32
    %15 = vector.broadcast %cst_27 : f32 to vector<8x8x64xf32>
    %16 = vector.extract_strided_slice %12 {offsets = [0, 0, 0], sizes = [8, 8, 64], strides = [1, 1, 1]} : vector<10x8x64xf32> to vector<8x8x64xf32>
    %c0_28 = arith.constant 0 : index
    %c0_29 = arith.constant 0 : index
    %17 = vector.load %arg2[%c0_28, %c0_29] : memref<9x64xf32, #tpu.memory_space<vmem>>, vector<1x64xf32>
    %18 = vector.shape_cast %17 : vector<1x64xf32> to vector<64xf32>
    %19 = vector.shape_cast %18 : vector<64xf32> to vector<1x1x64xf32>
    %20 = vector.broadcast %19 : vector<1x1x64xf32> to vector<8x8x64xf32>
    %21 = arith.mulf %16, %20 : vector<8x8x64xf32>
    %22 = arith.addf %15, %21 : vector<8x8x64xf32>
    %23 = vector.extract_strided_slice %13 {offsets = [0, 0, 0], sizes = [8, 8, 64], strides = [1, 1, 1]} : vector<10x8x64xf32> to vector<8x8x64xf32>
    %c1_30 = arith.constant 1 : index
    %c0_31 = arith.constant 0 : index
    %24 = vector.load %arg2[%c1_30, %c0_31] : memref<9x64xf32, #tpu.memory_space<vmem>>, vector<1x64xf32>
    %25 = vector.shape_cast %24 : vector<1x64xf32> to vector<64xf32>
    %26 = vector.shape_cast %25 : vector<64xf32> to vector<1x1x64xf32>
    %27 = vector.broadcast %26 : vector<1x1x64xf32> to vector<8x8x64xf32>
    %28 = arith.mulf %23, %27 : vector<8x8x64xf32>
    %29 = arith.addf %22, %28 : vector<8x8x64xf32>
    %30 = vector.extract_strided_slice %14 {offsets = [0, 0, 0], sizes = [8, 8, 64], strides = [1, 1, 1]} : vector<10x8x64xf32> to vector<8x8x64xf32>
    %c2_32 = arith.constant 2 : index
    %c0_33 = arith.constant 0 : index
    %31 = vector.load %arg2[%c2_32, %c0_33] : memref<9x64xf32, #tpu.memory_space<vmem>>, vector<1x64xf32>
    %32 = vector.shape_cast %31 : vector<1x64xf32> to vector<64xf32>
    %33 = vector.shape_cast %32 : vector<64xf32> to vector<1x1x64xf32>
    %34 = vector.broadcast %33 : vector<1x1x64xf32> to vector<8x8x64xf32>
    %35 = arith.mulf %30, %34 : vector<8x8x64xf32>
    %36 = arith.addf %29, %35 : vector<8x8x64xf32>
    %37 = vector.extract_strided_slice %12 {offsets = [1, 0, 0], sizes = [8, 8, 64], strides = [1, 1, 1]} : vector<10x8x64xf32> to vector<8x8x64xf32>
    %c3 = arith.constant 3 : index
    %c0_34 = arith.constant 0 : index
    %38 = vector.load %arg2[%c3, %c0_34] : memref<9x64xf32, #tpu.memory_space<vmem>>, vector<1x64xf32>
    %39 = vector.shape_cast %38 : vector<1x64xf32> to vector<64xf32>
    %40 = vector.shape_cast %39 : vector<64xf32> to vector<1x1x64xf32>
    %41 = vector.broadcast %40 : vector<1x1x64xf32> to vector<8x8x64xf32>
    %42 = arith.mulf %37, %41 : vector<8x8x64xf32>
    %43 = arith.addf %36, %42 : vector<8x8x64xf32>
    %44 = vector.extract_strided_slice %13 {offsets = [1, 0, 0], sizes = [8, 8, 64], strides = [1, 1, 1]} : vector<10x8x64xf32> to vector<8x8x64xf32>
    %c4 = arith.constant 4 : index
    %c0_35 = arith.constant 0 : index
    %45 = vector.load %arg2[%c4, %c0_35] : memref<9x64xf32, #tpu.memory_space<vmem>>, vector<1x64xf32>
    %46 = vector.shape_cast %45 : vector<1x64xf32> to vector<64xf32>
    %47 = vector.shape_cast %46 : vector<64xf32> to vector<1x1x64xf32>
    %48 = vector.broadcast %47 : vector<1x1x64xf32> to vector<8x8x64xf32>
    %49 = arith.mulf %44, %48 : vector<8x8x64xf32>
    %50 = arith.addf %43, %49 : vector<8x8x64xf32>
    %51 = vector.extract_strided_slice %14 {offsets = [1, 0, 0], sizes = [8, 8, 64], strides = [1, 1, 1]} : vector<10x8x64xf32> to vector<8x8x64xf32>
    %c5 = arith.constant 5 : index
    %c0_36 = arith.constant 0 : index
    %52 = vector.load %arg2[%c5, %c0_36] : memref<9x64xf32, #tpu.memory_space<vmem>>, vector<1x64xf32>
    %53 = vector.shape_cast %52 : vector<1x64xf32> to vector<64xf32>
    %54 = vector.shape_cast %53 : vector<64xf32> to vector<1x1x64xf32>
    %55 = vector.broadcast %54 : vector<1x1x64xf32> to vector<8x8x64xf32>
    %56 = arith.mulf %51, %55 : vector<8x8x64xf32>
    %57 = arith.addf %50, %56 : vector<8x8x64xf32>
    %58 = vector.extract_strided_slice %12 {offsets = [2, 0, 0], sizes = [8, 8, 64], strides = [1, 1, 1]} : vector<10x8x64xf32> to vector<8x8x64xf32>
    %c6 = arith.constant 6 : index
    %c0_37 = arith.constant 0 : index
    %59 = vector.load %arg2[%c6, %c0_37] : memref<9x64xf32, #tpu.memory_space<vmem>>, vector<1x64xf32>
    %60 = vector.shape_cast %59 : vector<1x64xf32> to vector<64xf32>
    %61 = vector.shape_cast %60 : vector<64xf32> to vector<1x1x64xf32>
    %62 = vector.broadcast %61 : vector<1x1x64xf32> to vector<8x8x64xf32>
    %63 = arith.mulf %58, %62 : vector<8x8x64xf32>
    %64 = arith.addf %57, %63 : vector<8x8x64xf32>
    %65 = vector.extract_strided_slice %13 {offsets = [2, 0, 0], sizes = [8, 8, 64], strides = [1, 1, 1]} : vector<10x8x64xf32> to vector<8x8x64xf32>
    %c7 = arith.constant 7 : index
    %c0_38 = arith.constant 0 : index
    %66 = vector.load %arg2[%c7, %c0_38] : memref<9x64xf32, #tpu.memory_space<vmem>>, vector<1x64xf32>
    %67 = vector.shape_cast %66 : vector<1x64xf32> to vector<64xf32>
    %68 = vector.shape_cast %67 : vector<64xf32> to vector<1x1x64xf32>
    %69 = vector.broadcast %68 : vector<1x1x64xf32> to vector<8x8x64xf32>
    %70 = arith.mulf %65, %69 : vector<8x8x64xf32>
    %71 = arith.addf %64, %70 : vector<8x8x64xf32>
    %72 = vector.extract_strided_slice %14 {offsets = [2, 0, 0], sizes = [8, 8, 64], strides = [1, 1, 1]} : vector<10x8x64xf32> to vector<8x8x64xf32>
    %c8 = arith.constant 8 : index
    %c0_39 = arith.constant 0 : index
    %73 = vector.load %arg2[%c8, %c0_39] : memref<9x64xf32, #tpu.memory_space<vmem>>, vector<1x64xf32>
    %74 = vector.shape_cast %73 : vector<1x64xf32> to vector<64xf32>
    %75 = vector.shape_cast %74 : vector<64xf32> to vector<1x1x64xf32>
    %76 = vector.broadcast %75 : vector<1x1x64xf32> to vector<8x8x64xf32>
    %77 = arith.mulf %72, %76 : vector<8x8x64xf32>
    %78 = arith.addf %71, %77 : vector<8x8x64xf32>
    %c0_40 = arith.constant 0 : index
    %c0_41 = arith.constant 0 : index
    %79 = vector.load %arg3[%c0_40, %c0_41] : memref<1x64xf32, #tpu.memory_space<vmem>>, vector<1x64xf32>
    %80 = vector.shape_cast %79 : vector<1x64xf32> to vector<1x1x64xf32>
    %81 = vector.broadcast %80 : vector<1x1x64xf32> to vector<8x8x64xf32>
    %82 = arith.addf %78, %81 : vector<8x8x64xf32>
    %83 = math.absf %82 : vector<8x8x64xf32>
    %cst_42 = arith.constant 0.000000e+00 : f32
    %84 = vector.broadcast %cst_42 : f32 to vector<8x8x64xf32>
    %85 = arith.subf %84, %83 : vector<8x8x64xf32>
    %86 = math.exp %85 : vector<8x8x64xf32>
    %cst_43 = arith.constant 0.000000e+00 : f32
    %87 = vector.broadcast %cst_43 : f32 to vector<8x8x64xf32>
    %88 = arith.cmpf oge, %82, %87 : vector<8x8x64xf32>
    %cst_44 = arith.constant 1.000000e+00 : f32
    %89 = vector.broadcast %cst_44 : f32 to vector<8x8x64xf32>
    %90 = arith.addf %89, %86 : vector<8x8x64xf32>
    %cst_45 = arith.constant 1.000000e+00 : f32
    %91 = vector.broadcast %cst_45 : f32 to vector<8x8x64xf32>
    %92 = arith.divf %91, %90 : vector<8x8x64xf32>
    %cst_46 = arith.constant 1.000000e+00 : f32
    %93 = vector.broadcast %cst_46 : f32 to vector<8x8x64xf32>
    %94 = arith.addf %93, %86 : vector<8x8x64xf32>
    %95 = arith.divf %86, %94 : vector<8x8x64xf32>
    %96 = arith.select %88, %92, %95 : vector<8x8x64xi1>, vector<8x8x64xf32>
    %97 = arith.mulf %82, %96 : vector<8x8x64xf32>
    %98 = arith.truncf %97 : vector<8x8x64xf32> to vector<8x8x64xbf16>
    %c0_47 = arith.constant 0 : index
    %c0_48 = arith.constant 0 : index
    %c0_49 = arith.constant 0 : index
    %c0_50 = arith.constant 0 : index
    %99 = vector.load %arg4[%c0_47, %c0_48, %c0_49, %c0_50] : memref<1x8x8x64xbf16, #tpu.memory_space<vmem>>, vector<1x8x8x64xbf16>
    %100 = vector.shape_cast %99 : vector<1x8x8x64xbf16> to vector<8x8x64xbf16>
    %101 = vector.shape_cast %98 : vector<8x8x64xbf16> to vector<1x8x8x64xbf16>
    tpu.vector_store %arg4[%c0_47, %c0_48, %c0_49, %c0_50], %101 {strides = array<i32>} : memref<1x8x8x64xbf16, #tpu.memory_space<vmem>>, vector<1x8x8x64xbf16>,
    return
  }
  func.func @transform_0(%arg0: i32) -> (i32, i32, i32, i32) {
    %c0_i32 = arith.constant 0 : i32
    %c0_i32_0 = arith.constant 0 : i32
    %c0_i32_1 = arith.constant 0 : i32
    %c0_i32_2 = arith.constant 0 : i32
    return %arg0, %c0_i32, %c0_i32_0, %c0_i32_1 : i32, i32, i32, i32
  }
  func.func @transform_1(%arg0: i32) -> (i32, i32) {
    %c0_i32 = arith.constant 0 : i32
    %c0_i32_0 = arith.constant 0 : i32
    %c0_i32_1 = arith.constant 0 : i32
    return %c0_i32, %c0_i32_0 : i32, i32
  }
  func.func @transform_2(%arg0: i32) -> (i32, i32) {
    %c0_i32 = arith.constant 0 : i32
    %c0_i32_0 = arith.constant 0 : i32
    %c0_i32_1 = arith.constant 0 : i32
    return %c0_i32, %c0_i32_0 : i32, i32
  }
  func.func @transform_3(%arg0: i32) -> (i32, i32, i32, i32) {
    %c0_i32 = arith.constant 0 : i32
    %c0_i32_0 = arith.constant 0 : i32
    %c0_i32_1 = arith.constant 0 : i32
    %c0_i32_2 = arith.constant 0 : i32
    return %arg0, %c0_i32, %c0_i32_0, %c0_i32_1 : i32, i32, i32, i32
  }
}

module attributes {stable_mosaic.version = 11 : i64} {
  func.func @_ssm_pair_kernel(%arg0: i32, %arg1: i32, %arg2: memref<1x1x64x64xbf16, #tpu.memory_space<vmem>>, %arg3: memref<1x64x68xbf16, #tpu.memory_space<vmem>>, %arg4: memref<1x2x2x64xbf16, #tpu.memory_space<vmem>>, %arg5: memref<1x2x1x64xf32, #tpu.memory_space<vmem>>, %arg6: memref<1x2x16x64xf32, #tpu.memory_space<vmem>>, %arg7: memref<1x2x1x64xf32, #tpu.memory_space<vmem>>, %arg8: memref<1x1x64x64xbf16, #tpu.memory_space<vmem>>, %arg9: memref<64x64xf32, #tpu.memory_space<vmem>>, %arg10: memref<64x68xf32, #tpu.memory_space<vmem>>, %arg11: memref<64x64xf32, #tpu.memory_space<vmem>>, %arg12: memref<64x32xf32, #tpu.memory_space<vmem>>, %arg13: memref<64x64xf32, #tpu.memory_space<vmem>>) attributes {dimension_semantics = [#tpu.dimension_semantics<parallel>, #tpu.dimension_semantics<parallel>], iteration_bounds = array<i64: 2, 2>, scalar_prefetch = 0 : i64, scratch_operands = 5 : i64, tpu.core_type = #tpu.core_type<tc>, window_params = [{transform_indices = @transform_0, window_bounds = array<i64: 1, 1, 64, 64>}, {transform_indices = @transform_1, window_bounds = array<i64: 1, 64, 68>}, {transform_indices = @transform_2, window_bounds = array<i64: 1, 2, 2, 64>}, {transform_indices = @transform_3, window_bounds = array<i64: 1, 2, 1, 64>}, {transform_indices = @transform_4, window_bounds = array<i64: 1, 2, 16, 64>}, {transform_indices = @transform_5, window_bounds = array<i64: 1, 2, 1, 64>}, {transform_indices = @transform_6, window_bounds = array<i64: 1, 1, 64, 64>}]} {
    %c0 = arith.constant 0 : index
    %c0_0 = arith.constant 0 : index
    %c0_1 = arith.constant 0 : index
    %c0_2 = arith.constant 0 : index
    %0 = vector.load %arg2[%c0, %c0_0, %c0_1, %c0_2] : memref<1x1x64x64xbf16, #tpu.memory_space<vmem>>, vector<1x1x64x64xbf16>
    %1 = vector.shape_cast %0 : vector<1x1x64x64xbf16> to vector<64x64xbf16>
    %2 = arith.extf %1 : vector<64x64xbf16> to vector<64x64xf32>
    %c0_3 = arith.constant 0 : index
    %c0_4 = arith.constant 0 : index
    %3 = vector.load %arg9[%c0_3, %c0_4] : memref<64x64xf32, #tpu.memory_space<vmem>>, vector<64x64xf32>
    tpu.vector_store %arg9[%c0_3, %c0_4], %2 {strides = array<i32>} : memref<64x64xf32, #tpu.memory_space<vmem>>, vector<64x64xf32>,
    %c0_5 = arith.constant 0 : index
    %c0_6 = arith.constant 0 : index
    %c0_7 = arith.constant 0 : index
    %c0_8 = arith.constant 0 : index
    %4 = vector.load %arg2[%c0_5, %c0_6, %c0_7, %c0_8] : memref<1x1x64x64xbf16, #tpu.memory_space<vmem>>, vector<1x1x64x64xbf16>
    %5 = vector.shape_cast %4 : vector<1x1x64x64xbf16> to vector<64x64xbf16>
    %6 = arith.extf %5 : vector<64x64xbf16> to vector<64x64xf32>
    %c0_9 = arith.constant 0 : index
    %c0_10 = arith.constant 0 : index
    %c0_11 = arith.constant 0 : index
    %7 = vector.load %arg3[%c0_9, %c0_10, %c0_11] : memref<1x64x68xbf16, #tpu.memory_space<vmem>>, vector<1x64x68xbf16>
    %8 = vector.shape_cast %7 : vector<1x64x68xbf16> to vector<64x68xbf16>
    %9 = arith.extf %8 : vector<64x68xbf16> to vector<64x68xf32>
    %cst = arith.constant dense<0.000000e+00> : vector<64x68xf32>
    %10 = tpu.matmul %6, %9, %cst {dimension_numbers = #tpu.dot_dimension_numbers<[1], [0], [0], [1], [0, 0, 1, 1], [], []>} : vector<64x64xf32>, vector<64x68xf32>, vector<64x68xf32> -> vector<64x68xf32>
    %c0_12 = arith.constant 0 : index
    %c0_13 = arith.constant 0 : index
    %11 = vector.load %arg10[%c0_12, %c0_13] : memref<64x68xf32, #tpu.memory_space<vmem>>, vector<64x68xf32>
    tpu.vector_store %arg10[%c0_12, %c0_13], %10 {strides = array<i32>} : memref<64x68xf32, #tpu.memory_space<vmem>>, vector<64x68xf32>,
    %c0_14 = arith.constant 0 : index
    %c0_15 = arith.constant 0 : index
    %12 = vector.load %arg10[%c0_14, %c0_15] : memref<64x68xf32, #tpu.memory_space<vmem>>, vector<64x34xf32>
    %13 = vector.extract_strided_slice %12 {offsets = [0, 0], sizes = [64, 2], strides = [1, 1]} : vector<64x34xf32> to vector<64x2xf32>
    %14 = arith.truncf %13 : vector<64x2xf32> to vector<64x2xbf16>
    %15 = arith.extf %14 : vector<64x2xbf16> to vector<64x2xf32>
    %c0_16 = arith.constant 0 : index
    %c0_17 = arith.constant 0 : index
    %c0_18 = arith.constant 0 : index
    %c0_19 = arith.constant 0 : index
    %16 = vector.load %arg4[%c0_16, %c0_17, %c0_18, %c0_19] : memref<1x2x2x64xbf16, #tpu.memory_space<vmem>>, vector<1x1x2x64xbf16>
    %17 = vector.shape_cast %16 : vector<1x1x2x64xbf16> to vector<2x64xbf16>
    %18 = arith.extf %17 : vector<2x64xbf16> to vector<2x64xf32>
    %cst_20 = arith.constant dense<0.000000e+00> : vector<64x64xf32>
    %19 = tpu.matmul %15, %18, %cst_20 {dimension_numbers = #tpu.dot_dimension_numbers<[1], [0], [0], [1], [0, 0, 1, 1], [], []>} : vector<64x2xf32>, vector<2x64xf32>, vector<64x64xf32> -> vector<64x64xf32>
    %c0_21 = arith.constant 0 : index
    %c0_22 = arith.constant 0 : index
    %c0_23 = arith.constant 0 : index
    %c0_24 = arith.constant 0 : index
    %20 = vector.load %arg5[%c0_21, %c0_22, %c0_23, %c0_24] : memref<1x2x1x64xf32, #tpu.memory_space<vmem>>, vector<1x1x1x64xf32>
    %21 = vector.shape_cast %20 : vector<1x1x1x64xf32> to vector<1x64xf32>
    %22 = vector.broadcast %21 : vector<1x64xf32> to vector<64x64xf32>
    %23 = arith.addf %19, %22 : vector<64x64xf32>
    %cst_25 = arith.constant 2.000000e+01 : f32
    %24 = vector.broadcast %cst_25 : f32 to vector<64x64xf32>
    %25 = arith.minimumf %23, %24 : vector<64x64xf32>
    %cst_26 = arith.constant 2.000000e+01 : f32
    %26 = vector.broadcast %cst_26 : f32 to vector<64x64xf32>
    %27 = arith.cmpf ogt, %23, %26 : vector<64x64xf32>
    %28 = math.exp %25 : vector<64x64xf32>
    %cst_27 = arith.constant 1.000000e+00 : f32
    %29 = vector.broadcast %cst_27 : f32 to vector<64x64xf32>
    %30 = arith.addf %29, %28 : vector<64x64xf32>
    %31 = math.log %30 : vector<64x64xf32>
    %32 = arith.select %27, %23, %31 : vector<64x64xi1>, vector<64x64xf32>
    %c0_28 = arith.constant 0 : index
    %c0_29 = arith.constant 0 : index
    %33 = vector.load %arg11[%c0_28, %c0_29] : memref<64x64xf32, #tpu.memory_space<vmem>>, vector<64x64xf32>
    tpu.vector_store %arg11[%c0_28, %c0_29], %32 {strides = array<i32>} : memref<64x64xf32, #tpu.memory_space<vmem>>, vector<64x64xf32>,
    %34 = vector.extract_strided_slice %12 {offsets = [0, 2], sizes = [64, 32], strides = [1, 1]} : vector<64x34xf32> to vector<64x32xf32>
    %c0_30 = arith.constant 0 : index
    %c0_31 = arith.constant 0 : index
    %35 = vector.load %arg12[%c0_30, %c0_31] : memref<64x32xf32, #tpu.memory_space<vmem>>, vector<64x32xf32>
    tpu.vector_store %arg12[%c0_30, %c0_31], %34 {strides = array<i32>} : memref<64x32xf32, #tpu.memory_space<vmem>>, vector<64x32xf32>,
    %c0_32 = arith.constant 0 : index
    %c0_33 = arith.constant 0 : index
    %c0_34 = arith.constant 0 : index
    %c0_35 = arith.constant 0 : index
    %36 = vector.load %arg6[%c0_32, %c0_33, %c0_34, %c0_35] : memref<1x2x16x64xf32, #tpu.memory_space<vmem>>, vector<1x1x16x64xf32>
    %37 = vector.shape_cast %36 : vector<1x1x16x64xf32> to vector<16x64xf32>
    %38 = math.exp %37 : vector<16x64xf32>
    %cst_36 = arith.constant 0.000000e+00 : f32
    %39 = vector.broadcast %cst_36 : f32 to vector<16x64xf32>
    %40 = arith.subf %39, %38 : vector<16x64xf32>
    %c0_37 = arith.constant 0 : index
    %c0_38 = arith.constant 0 : index
    %c0_39 = arith.constant 0 : index
    %c0_40 = arith.constant 0 : index
    %41 = vector.load %arg7[%c0_37, %c0_38, %c0_39, %c0_40] : memref<1x2x1x64xf32, #tpu.memory_space<vmem>>, vector<1x1x1x64xf32>
    %42 = vector.shape_cast %41 : vector<1x1x1x64xf32> to vector<1x64xf32>
    %cst_41 = arith.constant 0.000000e+00 : f32
    %43 = vector.broadcast %cst_41 : f32 to vector<16x64xf32>
    %c0_i32 = arith.constant 0 : i32
    %c8_i32 = arith.constant 8 : i32
    %44 = arith.addi %c0_i32, %c8_i32 : i32
    %c1_i32 = arith.constant 1 : i32
    %45 = scf.for %arg14 = %c0_i32 to %44 step %c1_i32 iter_args(%arg15 = %43) -> (vector<16x64xf32>)  : i32 {
      %c8_i32_79 = arith.constant 8 : i32
      %85 = arith.muli %arg14, %c8_i32_79 : i32
      %86 = tpu.assume_multiple %85, 8 : i32
      %87 = arith.index_cast %86 : i32 to index
      %c0_80 = arith.constant 0 : index
      %88 = vector.load %arg11[%87, %c0_80] : memref<64x64xf32, #tpu.memory_space<vmem>>, vector<8x64xf32>
      %89 = arith.index_cast %86 : i32 to index
      %c0_81 = arith.constant 0 : index
      %90 = vector.load %arg9[%89, %c0_81] : memref<64x64xf32, #tpu.memory_space<vmem>>, vector<8x64xf32>
      %91 = arith.index_cast %86 : i32 to index
      %c0_82 = arith.constant 0 : index
      %92 = vector.load %arg12[%91, %c0_82] : memref<64x32xf32, #tpu.memory_space<vmem>>, vector<8x32xf32>
      %93 = vector.shape_cast %88 : vector<8x64xf32> to vector<8x1x64xf32>
      %94 = vector.shape_cast %40 : vector<16x64xf32> to vector<1x16x64xf32>
      %95 = vector.broadcast %93 : vector<8x1x64xf32> to vector<8x16x64xf32>
      %96 = vector.broadcast %94 : vector<1x16x64xf32> to vector<8x16x64xf32>
      %97 = arith.mulf %95, %96 : vector<8x16x64xf32>
      %98 = math.exp %97 : vector<8x16x64xf32>
      %99 = arith.mulf %88, %90 : vector<8x64xf32>
      %100 = vector.shape_cast %99 : vector<8x64xf32> to vector<8x1x64xf32>
      %101 = vector.extract_strided_slice %92 {offsets = [0, 0], sizes = [8, 16], strides = [1, 1]} : vector<8x32xf32> to vector<8x16xf32>
      %102 = vector.shape_cast %101 : vector<8x16xf32> to vector<8x16x1xf32>
      %103 = vector.broadcast %100 : vector<8x1x64xf32> to vector<8x16x64xf32>
      %104 = vector.broadcast %102 : vector<8x16x1xf32> to vector<8x16x64xf32>
      %105 = arith.mulf %103, %104 : vector<8x16x64xf32>
      %106 = vector.extract_strided_slice %92 {offsets = [0, 16], sizes = [8, 16], strides = [1, 1]} : vector<8x32xf32> to vector<8x16xf32>
      %107 = vector.shape_cast %106 : vector<8x16xf32> to vector<8x16x1xf32>
      %108 = vector.extract_strided_slice %98 {offsets = [0, 0, 0], sizes = [1, 16, 64], strides = [1, 1, 1]} : vector<8x16x64xf32> to vector<1x16x64xf32>
      %109 = vector.shape_cast %108 : vector<1x16x64xf32> to vector<16x64xf32>
      %110 = arith.mulf %109, %arg15 : vector<16x64xf32>
      %111 = vector.extract_strided_slice %105 {offsets = [0, 0, 0], sizes = [1, 16, 64], strides = [1, 1, 1]} : vector<8x16x64xf32> to vector<1x16x64xf32>
      %112 = vector.shape_cast %111 : vector<1x16x64xf32> to vector<16x64xf32>
      %113 = arith.addf %110, %112 : vector<16x64xf32>
      %114 = vector.extract_strided_slice %107 {offsets = [0, 0, 0], sizes = [1, 16, 1], strides = [1, 1, 1]} : vector<8x16x1xf32> to vector<1x16x1xf32>
      %115 = vector.shape_cast %114 : vector<1x16x1xf32> to vector<16x1xf32>
      %116 = vector.broadcast %115 : vector<16x1xf32> to vector<16x64xf32>
      %117 = arith.mulf %113, %116 : vector<16x64xf32>
      %cst_83 = arith.constant dense<0.000000e+00> : vector<64xf32>
      %118 = vector.multi_reduction <add>, %117, %cst_83 [0] : vector<16x64xf32> to vector<64xf32>
      %119 = vector.shape_cast %118 : vector<64xf32> to vector<1x64xf32>
      %120 = vector.extract_strided_slice %98 {offsets = [1, 0, 0], sizes = [1, 16, 64], strides = [1, 1, 1]} : vector<8x16x64xf32> to vector<1x16x64xf32>
      %121 = vector.shape_cast %120 : vector<1x16x64xf32> to vector<16x64xf32>
      %122 = arith.mulf %121, %113 : vector<16x64xf32>
      %123 = vector.extract_strided_slice %105 {offsets = [1, 0, 0], sizes = [1, 16, 64], strides = [1, 1, 1]} : vector<8x16x64xf32> to vector<1x16x64xf32>
      %124 = vector.shape_cast %123 : vector<1x16x64xf32> to vector<16x64xf32>
      %125 = arith.addf %122, %124 : vector<16x64xf32>
      %126 = vector.extract_strided_slice %107 {offsets = [1, 0, 0], sizes = [1, 16, 1], strides = [1, 1, 1]} : vector<8x16x1xf32> to vector<1x16x1xf32>
      %127 = vector.shape_cast %126 : vector<1x16x1xf32> to vector<16x1xf32>
      %128 = vector.broadcast %127 : vector<16x1xf32> to vector<16x64xf32>
      %129 = arith.mulf %125, %128 : vector<16x64xf32>
      %cst_84 = arith.constant dense<0.000000e+00> : vector<64xf32>
      %130 = vector.multi_reduction <add>, %129, %cst_84 [0] : vector<16x64xf32> to vector<64xf32>
      %131 = vector.shape_cast %130 : vector<64xf32> to vector<1x64xf32>
      %132 = vector.extract_strided_slice %98 {offsets = [2, 0, 0], sizes = [1, 16, 64], strides = [1, 1, 1]} : vector<8x16x64xf32> to vector<1x16x64xf32>
      %133 = vector.shape_cast %132 : vector<1x16x64xf32> to vector<16x64xf32>
      %134 = arith.mulf %133, %125 : vector<16x64xf32>
      %135 = vector.extract_strided_slice %105 {offsets = [2, 0, 0], sizes = [1, 16, 64], strides = [1, 1, 1]} : vector<8x16x64xf32> to vector<1x16x64xf32>
      %136 = vector.shape_cast %135 : vector<1x16x64xf32> to vector<16x64xf32>
      %137 = arith.addf %134, %136 : vector<16x64xf32>
      %138 = vector.extract_strided_slice %107 {offsets = [2, 0, 0], sizes = [1, 16, 1], strides = [1, 1, 1]} : vector<8x16x1xf32> to vector<1x16x1xf32>
      %139 = vector.shape_cast %138 : vector<1x16x1xf32> to vector<16x1xf32>
      %140 = vector.broadcast %139 : vector<16x1xf32> to vector<16x64xf32>
      %141 = arith.mulf %137, %140 : vector<16x64xf32>
      %cst_85 = arith.constant dense<0.000000e+00> : vector<64xf32>
      %142 = vector.multi_reduction <add>, %141, %cst_85 [0] : vector<16x64xf32> to vector<64xf32>
      %143 = vector.shape_cast %142 : vector<64xf32> to vector<1x64xf32>
      %144 = vector.extract_strided_slice %98 {offsets = [3, 0, 0], sizes = [1, 16, 64], strides = [1, 1, 1]} : vector<8x16x64xf32> to vector<1x16x64xf32>
      %145 = vector.shape_cast %144 : vector<1x16x64xf32> to vector<16x64xf32>
      %146 = arith.mulf %145, %137 : vector<16x64xf32>
      %147 = vector.extract_strided_slice %105 {offsets = [3, 0, 0], sizes = [1, 16, 64], strides = [1, 1, 1]} : vector<8x16x64xf32> to vector<1x16x64xf32>
      %148 = vector.shape_cast %147 : vector<1x16x64xf32> to vector<16x64xf32>
      %149 = arith.addf %146, %148 : vector<16x64xf32>
      %150 = vector.extract_strided_slice %107 {offsets = [3, 0, 0], sizes = [1, 16, 1], strides = [1, 1, 1]} : vector<8x16x1xf32> to vector<1x16x1xf32>
      %151 = vector.shape_cast %150 : vector<1x16x1xf32> to vector<16x1xf32>
      %152 = vector.broadcast %151 : vector<16x1xf32> to vector<16x64xf32>
      %153 = arith.mulf %149, %152 : vector<16x64xf32>
      %cst_86 = arith.constant dense<0.000000e+00> : vector<64xf32>
      %154 = vector.multi_reduction <add>, %153, %cst_86 [0] : vector<16x64xf32> to vector<64xf32>
      %155 = vector.shape_cast %154 : vector<64xf32> to vector<1x64xf32>
      %156 = vector.extract_strided_slice %98 {offsets = [4, 0, 0], sizes = [1, 16, 64], strides = [1, 1, 1]} : vector<8x16x64xf32> to vector<1x16x64xf32>
      %157 = vector.shape_cast %156 : vector<1x16x64xf32> to vector<16x64xf32>
      %158 = arith.mulf %157, %149 : vector<16x64xf32>
      %159 = vector.extract_strided_slice %105 {offsets = [4, 0, 0], sizes = [1, 16, 64], strides = [1, 1, 1]} : vector<8x16x64xf32> to vector<1x16x64xf32>
      %160 = vector.shape_cast %159 : vector<1x16x64xf32> to vector<16x64xf32>
      %161 = arith.addf %158, %160 : vector<16x64xf32>
      %162 = vector.extract_strided_slice %107 {offsets = [4, 0, 0], sizes = [1, 16, 1], strides = [1, 1, 1]} : vector<8x16x1xf32> to vector<1x16x1xf32>
      %163 = vector.shape_cast %162 : vector<1x16x1xf32> to vector<16x1xf32>
      %164 = vector.broadcast %163 : vector<16x1xf32> to vector<16x64xf32>
      %165 = arith.mulf %161, %164 : vector<16x64xf32>
      %cst_87 = arith.constant dense<0.000000e+00> : vector<64xf32>
      %166 = vector.multi_reduction <add>, %165, %cst_87 [0] : vector<16x64xf32> to vector<64xf32>
      %167 = vector.shape_cast %166 : vector<64xf32> to vector<1x64xf32>
      %168 = vector.extract_strided_slice %98 {offsets = [5, 0, 0], sizes = [1, 16, 64], strides = [1, 1, 1]} : vector<8x16x64xf32> to vector<1x16x64xf32>
      %169 = vector.shape_cast %168 : vector<1x16x64xf32> to vector<16x64xf32>
      %170 = arith.mulf %169, %161 : vector<16x64xf32>
      %171 = vector.extract_strided_slice %105 {offsets = [5, 0, 0], sizes = [1, 16, 64], strides = [1, 1, 1]} : vector<8x16x64xf32> to vector<1x16x64xf32>
      %172 = vector.shape_cast %171 : vector<1x16x64xf32> to vector<16x64xf32>
      %173 = arith.addf %170, %172 : vector<16x64xf32>
      %174 = vector.extract_strided_slice %107 {offsets = [5, 0, 0], sizes = [1, 16, 1], strides = [1, 1, 1]} : vector<8x16x1xf32> to vector<1x16x1xf32>
      %175 = vector.shape_cast %174 : vector<1x16x1xf32> to vector<16x1xf32>
      %176 = vector.broadcast %175 : vector<16x1xf32> to vector<16x64xf32>
      %177 = arith.mulf %173, %176 : vector<16x64xf32>
      %cst_88 = arith.constant dense<0.000000e+00> : vector<64xf32>
      %178 = vector.multi_reduction <add>, %177, %cst_88 [0] : vector<16x64xf32> to vector<64xf32>
      %179 = vector.shape_cast %178 : vector<64xf32> to vector<1x64xf32>
      %180 = vector.extract_strided_slice %98 {offsets = [6, 0, 0], sizes = [1, 16, 64], strides = [1, 1, 1]} : vector<8x16x64xf32> to vector<1x16x64xf32>
      %181 = vector.shape_cast %180 : vector<1x16x64xf32> to vector<16x64xf32>
      %182 = arith.mulf %181, %173 : vector<16x64xf32>
      %183 = vector.extract_strided_slice %105 {offsets = [6, 0, 0], sizes = [1, 16, 64], strides = [1, 1, 1]} : vector<8x16x64xf32> to vector<1x16x64xf32>
      %184 = vector.shape_cast %183 : vector<1x16x64xf32> to vector<16x64xf32>
      %185 = arith.addf %182, %184 : vector<16x64xf32>
      %186 = vector.extract_strided_slice %107 {offsets = [6, 0, 0], sizes = [1, 16, 1], strides = [1, 1, 1]} : vector<8x16x1xf32> to vector<1x16x1xf32>
      %187 = vector.shape_cast %186 : vector<1x16x1xf32> to vector<16x1xf32>
      %188 = vector.broadcast %187 : vector<16x1xf32> to vector<16x64xf32>
      %189 = arith.mulf %185, %188 : vector<16x64xf32>
      %cst_89 = arith.constant dense<0.000000e+00> : vector<64xf32>
      %190 = vector.multi_reduction <add>, %189, %cst_89 [0] : vector<16x64xf32> to vector<64xf32>
      %191 = vector.shape_cast %190 : vector<64xf32> to vector<1x64xf32>
      %192 = vector.extract_strided_slice %98 {offsets = [7, 0, 0], sizes = [1, 16, 64], strides = [1, 1, 1]} : vector<8x16x64xf32> to vector<1x16x64xf32>
      %193 = vector.shape_cast %192 : vector<1x16x64xf32> to vector<16x64xf32>
      %194 = arith.mulf %193, %185 : vector<16x64xf32>
      %195 = vector.extract_strided_slice %105 {offsets = [7, 0, 0], sizes = [1, 16, 64], strides = [1, 1, 1]} : vector<8x16x64xf32> to vector<1x16x64xf32>
      %196 = vector.shape_cast %195 : vector<1x16x64xf32> to vector<16x64xf32>
      %197 = arith.addf %194, %196 : vector<16x64xf32>
      %198 = vector.extract_strided_slice %107 {offsets = [7, 0, 0], sizes = [1, 16, 1], strides = [1, 1, 1]} : vector<8x16x1xf32> to vector<1x16x1xf32>
      %199 = vector.shape_cast %198 : vector<1x16x1xf32> to vector<16x1xf32>
      %200 = vector.broadcast %199 : vector<16x1xf32> to vector<16x64xf32>
      %201 = arith.mulf %197, %200 : vector<16x64xf32>
      %cst_90 = arith.constant dense<0.000000e+00> : vector<64xf32>
      %202 = vector.multi_reduction <add>, %201, %cst_90 [0] : vector<16x64xf32> to vector<64xf32>
      %203 = vector.shape_cast %202 : vector<64xf32> to vector<1x64xf32>
      %204 = tpu.concatenate %119, %131, %143, %155, %167, %179, %191, %203 in 0 : vector<1x64xf32>, vector<1x64xf32>, vector<1x64xf32>, vector<1x64xf32>, vector<1x64xf32>, vector<1x64xf32>, vector<1x64xf32>, vector<1x64xf32> -> vector<8x64xf32>
      %205 = vector.broadcast %42 : vector<1x64xf32> to vector<8x64xf32>
      %206 = arith.mulf %205, %90 : vector<8x64xf32>
      %207 = arith.addf %204, %206 : vector<8x64xf32>
      %208 = arith.index_cast %86 : i32 to index
      %c0_91 = arith.constant 0 : index
      %209 = vector.load %arg13[%208, %c0_91] : memref<64x64xf32, #tpu.memory_space<vmem>>, vector<8x64xf32>
      tpu.vector_store %arg13[%208, %c0_91], %207 {strides = array<i32>} : memref<64x64xf32, #tpu.memory_space<vmem>>, vector<8x64xf32>,
      scf.yield %197 : vector<16x64xf32>
    }
    %c8_i32_42 = arith.constant 8 : i32
    %c0_43 = arith.constant 0 : index
    %c34 = arith.constant 34 : index
    %46 = vector.load %arg10[%c0_43, %c34] : memref<64x68xf32, #tpu.memory_space<vmem>>, vector<64x34xf32>
    %47 = vector.extract_strided_slice %46 {offsets = [0, 0], sizes = [64, 2], strides = [1, 1]} : vector<64x34xf32> to vector<64x2xf32>
    %48 = arith.truncf %47 : vector<64x2xf32> to vector<64x2xbf16>
    %49 = arith.extf %48 : vector<64x2xbf16> to vector<64x2xf32>
    %c0_44 = arith.constant 0 : index
    %c1 = arith.constant 1 : index
    %c0_45 = arith.constant 0 : index
    %c0_46 = arith.constant 0 : index
    %50 = vector.load %arg4[%c0_44, %c1, %c0_45, %c0_46] : memref<1x2x2x64xbf16, #tpu.memory_space<vmem>>, vector<1x1x2x64xbf16>
    %51 = vector.shape_cast %50 : vector<1x1x2x64xbf16> to vector<2x64xbf16>
    %52 = arith.extf %51 : vector<2x64xbf16> to vector<2x64xf32>
    %cst_47 = arith.constant dense<0.000000e+00> : vector<64x64xf32>
    %53 = tpu.matmul %49, %52, %cst_47 {dimension_numbers = #tpu.dot_dimension_numbers<[1], [0], [0], [1], [0, 0, 1, 1], [], []>} : vector<64x2xf32>, vector<2x64xf32>, vector<64x64xf32> -> vector<64x64xf32>
    %c0_48 = arith.constant 0 : index
    %c1_49 = arith.constant 1 : index
    %c0_50 = arith.constant 0 : index
    %c0_51 = arith.constant 0 : index
    %54 = vector.load %arg5[%c0_48, %c1_49, %c0_50, %c0_51] : memref<1x2x1x64xf32, #tpu.memory_space<vmem>>, vector<1x1x1x64xf32>
    %55 = vector.shape_cast %54 : vector<1x1x1x64xf32> to vector<1x64xf32>
    %56 = vector.broadcast %55 : vector<1x64xf32> to vector<64x64xf32>
    %57 = arith.addf %53, %56 : vector<64x64xf32>
    %cst_52 = arith.constant 2.000000e+01 : f32
    %58 = vector.broadcast %cst_52 : f32 to vector<64x64xf32>
    %59 = arith.minimumf %57, %58 : vector<64x64xf32>
    %cst_53 = arith.constant 2.000000e+01 : f32
    %60 = vector.broadcast %cst_53 : f32 to vector<64x64xf32>
    %61 = arith.cmpf ogt, %57, %60 : vector<64x64xf32>
    %62 = math.exp %59 : vector<64x64xf32>
    %cst_54 = arith.constant 1.000000e+00 : f32
    %63 = vector.broadcast %cst_54 : f32 to vector<64x64xf32>
    %64 = arith.addf %63, %62 : vector<64x64xf32>
    %65 = math.log %64 : vector<64x64xf32>
    %66 = arith.select %61, %57, %65 : vector<64x64xi1>, vector<64x64xf32>
    %c0_55 = arith.constant 0 : index
    %c0_56 = arith.constant 0 : index
    %67 = vector.load %arg11[%c0_55, %c0_56] : memref<64x64xf32, #tpu.memory_space<vmem>>, vector<64x64xf32>
    tpu.vector_store %arg11[%c0_55, %c0_56], %66 {strides = array<i32>} : memref<64x64xf32, #tpu.memory_space<vmem>>, vector<64x64xf32>,
    %68 = vector.extract_strided_slice %46 {offsets = [0, 2], sizes = [64, 32], strides = [1, 1]} : vector<64x34xf32> to vector<64x32xf32>
    %c0_57 = arith.constant 0 : index
    %c0_58 = arith.constant 0 : index
    %69 = vector.load %arg12[%c0_57, %c0_58] : memref<64x32xf32, #tpu.memory_space<vmem>>, vector<64x32xf32>
    tpu.vector_store %arg12[%c0_57, %c0_58], %68 {strides = array<i32>} : memref<64x32xf32, #tpu.memory_space<vmem>>, vector<64x32xf32>,
    %c0_59 = arith.constant 0 : index
    %c1_60 = arith.constant 1 : index
    %c0_61 = arith.constant 0 : index
    %c0_62 = arith.constant 0 : index
    %70 = vector.load %arg6[%c0_59, %c1_60, %c0_61, %c0_62] : memref<1x2x16x64xf32, #tpu.memory_space<vmem>>, vector<1x1x16x64xf32>
    %71 = vector.shape_cast %70 : vector<1x1x16x64xf32> to vector<16x64xf32>
    %72 = math.exp %71 : vector<16x64xf32>
    %cst_63 = arith.constant 0.000000e+00 : f32
    %73 = vector.broadcast %cst_63 : f32 to vector<16x64xf32>
    %74 = arith.subf %73, %72 : vector<16x64xf32>
    %c0_64 = arith.constant 0 : index
    %c1_65 = arith.constant 1 : index
    %c0_66 = arith.constant 0 : index
    %c0_67 = arith.constant 0 : index
    %75 = vector.load %arg7[%c0_64, %c1_65, %c0_66, %c0_67] : memref<1x2x1x64xf32, #tpu.memory_space<vmem>>, vector<1x1x1x64xf32>
    %76 = vector.shape_cast %75 : vector<1x1x1x64xf32> to vector<1x64xf32>
    %cst_68 = arith.constant 0.000000e+00 : f32
    %77 = vector.broadcast %cst_68 : f32 to vector<16x64xf32>
    %c0_i32_69 = arith.constant 0 : i32
    %c8_i32_70 = arith.constant 8 : i32
    %78 = arith.addi %c0_i32_69, %c8_i32_70 : i32
    %c1_i32_71 = arith.constant 1 : i32
    %79 = scf.for %arg14 = %c0_i32_69 to %78 step %c1_i32_71 iter_args(%arg15 = %77) -> (vector<16x64xf32>)  : i32 {
      %c7_i32 = arith.constant 7 : i32
      %85 = arith.subi %c7_i32, %arg14 : i32
      %c8_i32_79 = arith.constant 8 : i32
      %86 = arith.muli %85, %c8_i32_79 : i32
      %87 = tpu.assume_multiple %86, 8 : i32
      %88 = arith.index_cast %87 : i32 to index
      %c0_80 = arith.constant 0 : index
      %89 = vector.load %arg11[%88, %c0_80] : memref<64x64xf32, #tpu.memory_space<vmem>>, vector<8x64xf32>
      %90 = arith.index_cast %87 : i32 to index
      %c0_81 = arith.constant 0 : index
      %91 = vector.load %arg9[%90, %c0_81] : memref<64x64xf32, #tpu.memory_space<vmem>>, vector<8x64xf32>
      %92 = arith.index_cast %87 : i32 to index
      %c0_82 = arith.constant 0 : index
      %93 = vector.load %arg12[%92, %c0_82] : memref<64x32xf32, #tpu.memory_space<vmem>>, vector<8x32xf32>
      %94 = vector.shape_cast %89 : vector<8x64xf32> to vector<8x1x64xf32>
      %95 = vector.shape_cast %74 : vector<16x64xf32> to vector<1x16x64xf32>
      %96 = vector.broadcast %94 : vector<8x1x64xf32> to vector<8x16x64xf32>
      %97 = vector.broadcast %95 : vector<1x16x64xf32> to vector<8x16x64xf32>
      %98 = arith.mulf %96, %97 : vector<8x16x64xf32>
      %99 = math.exp %98 : vector<8x16x64xf32>
      %100 = arith.mulf %89, %91 : vector<8x64xf32>
      %101 = vector.shape_cast %100 : vector<8x64xf32> to vector<8x1x64xf32>
      %102 = vector.extract_strided_slice %93 {offsets = [0, 0], sizes = [8, 16], strides = [1, 1]} : vector<8x32xf32> to vector<8x16xf32>
      %103 = vector.shape_cast %102 : vector<8x16xf32> to vector<8x16x1xf32>
      %104 = vector.broadcast %101 : vector<8x1x64xf32> to vector<8x16x64xf32>
      %105 = vector.broadcast %103 : vector<8x16x1xf32> to vector<8x16x64xf32>
      %106 = arith.mulf %104, %105 : vector<8x16x64xf32>
      %107 = vector.extract_strided_slice %93 {offsets = [0, 16], sizes = [8, 16], strides = [1, 1]} : vector<8x32xf32> to vector<8x16xf32>
      %108 = vector.shape_cast %107 : vector<8x16xf32> to vector<8x16x1xf32>
      %109 = vector.extract_strided_slice %99 {offsets = [7, 0, 0], sizes = [1, 16, 64], strides = [1, 1, 1]} : vector<8x16x64xf32> to vector<1x16x64xf32>
      %110 = vector.shape_cast %109 : vector<1x16x64xf32> to vector<16x64xf32>
      %111 = arith.mulf %110, %arg15 : vector<16x64xf32>
      %112 = vector.extract_strided_slice %106 {offsets = [7, 0, 0], sizes = [1, 16, 64], strides = [1, 1, 1]} : vector<8x16x64xf32> to vector<1x16x64xf32>
      %113 = vector.shape_cast %112 : vector<1x16x64xf32> to vector<16x64xf32>
      %114 = arith.addf %111, %113 : vector<16x64xf32>
      %115 = vector.extract_strided_slice %108 {offsets = [7, 0, 0], sizes = [1, 16, 1], strides = [1, 1, 1]} : vector<8x16x1xf32> to vector<1x16x1xf32>
      %116 = vector.shape_cast %115 : vector<1x16x1xf32> to vector<16x1xf32>
      %117 = vector.broadcast %116 : vector<16x1xf32> to vector<16x64xf32>
      %118 = arith.mulf %114, %117 : vector<16x64xf32>
      %cst_83 = arith.constant dense<0.000000e+00> : vector<64xf32>
      %119 = vector.multi_reduction <add>, %118, %cst_83 [0] : vector<16x64xf32> to vector<64xf32>
      %120 = vector.shape_cast %119 : vector<64xf32> to vector<1x64xf32>
      %121 = vector.extract_strided_slice %99 {offsets = [6, 0, 0], sizes = [1, 16, 64], strides = [1, 1, 1]} : vector<8x16x64xf32> to vector<1x16x64xf32>
      %122 = vector.shape_cast %121 : vector<1x16x64xf32> to vector<16x64xf32>
      %123 = arith.mulf %122, %114 : vector<16x64xf32>
      %124 = vector.extract_strided_slice %106 {offsets = [6, 0, 0], sizes = [1, 16, 64], strides = [1, 1, 1]} : vector<8x16x64xf32> to vector<1x16x64xf32>
      %125 = vector.shape_cast %124 : vector<1x16x64xf32> to vector<16x64xf32>
      %126 = arith.addf %123, %125 : vector<16x64xf32>
      %127 = vector.extract_strided_slice %108 {offsets = [6, 0, 0], sizes = [1, 16, 1], strides = [1, 1, 1]} : vector<8x16x1xf32> to vector<1x16x1xf32>
      %128 = vector.shape_cast %127 : vector<1x16x1xf32> to vector<16x1xf32>
      %129 = vector.broadcast %128 : vector<16x1xf32> to vector<16x64xf32>
      %130 = arith.mulf %126, %129 : vector<16x64xf32>
      %cst_84 = arith.constant dense<0.000000e+00> : vector<64xf32>
      %131 = vector.multi_reduction <add>, %130, %cst_84 [0] : vector<16x64xf32> to vector<64xf32>
      %132 = vector.shape_cast %131 : vector<64xf32> to vector<1x64xf32>
      %133 = vector.extract_strided_slice %99 {offsets = [5, 0, 0], sizes = [1, 16, 64], strides = [1, 1, 1]} : vector<8x16x64xf32> to vector<1x16x64xf32>
      %134 = vector.shape_cast %133 : vector<1x16x64xf32> to vector<16x64xf32>
      %135 = arith.mulf %134, %126 : vector<16x64xf32>
      %136 = vector.extract_strided_slice %106 {offsets = [5, 0, 0], sizes = [1, 16, 64], strides = [1, 1, 1]} : vector<8x16x64xf32> to vector<1x16x64xf32>
      %137 = vector.shape_cast %136 : vector<1x16x64xf32> to vector<16x64xf32>
      %138 = arith.addf %135, %137 : vector<16x64xf32>
      %139 = vector.extract_strided_slice %108 {offsets = [5, 0, 0], sizes = [1, 16, 1], strides = [1, 1, 1]} : vector<8x16x1xf32> to vector<1x16x1xf32>
      %140 = vector.shape_cast %139 : vector<1x16x1xf32> to vector<16x1xf32>
      %141 = vector.broadcast %140 : vector<16x1xf32> to vector<16x64xf32>
      %142 = arith.mulf %138, %141 : vector<16x64xf32>
      %cst_85 = arith.constant dense<0.000000e+00> : vector<64xf32>
      %143 = vector.multi_reduction <add>, %142, %cst_85 [0] : vector<16x64xf32> to vector<64xf32>
      %144 = vector.shape_cast %143 : vector<64xf32> to vector<1x64xf32>
      %145 = vector.extract_strided_slice %99 {offsets = [4, 0, 0], sizes = [1, 16, 64], strides = [1, 1, 1]} : vector<8x16x64xf32> to vector<1x16x64xf32>
      %146 = vector.shape_cast %145 : vector<1x16x64xf32> to vector<16x64xf32>
      %147 = arith.mulf %146, %138 : vector<16x64xf32>
      %148 = vector.extract_strided_slice %106 {offsets = [4, 0, 0], sizes = [1, 16, 64], strides = [1, 1, 1]} : vector<8x16x64xf32> to vector<1x16x64xf32>
      %149 = vector.shape_cast %148 : vector<1x16x64xf32> to vector<16x64xf32>
      %150 = arith.addf %147, %149 : vector<16x64xf32>
      %151 = vector.extract_strided_slice %108 {offsets = [4, 0, 0], sizes = [1, 16, 1], strides = [1, 1, 1]} : vector<8x16x1xf32> to vector<1x16x1xf32>
      %152 = vector.shape_cast %151 : vector<1x16x1xf32> to vector<16x1xf32>
      %153 = vector.broadcast %152 : vector<16x1xf32> to vector<16x64xf32>
      %154 = arith.mulf %150, %153 : vector<16x64xf32>
      %cst_86 = arith.constant dense<0.000000e+00> : vector<64xf32>
      %155 = vector.multi_reduction <add>, %154, %cst_86 [0] : vector<16x64xf32> to vector<64xf32>
      %156 = vector.shape_cast %155 : vector<64xf32> to vector<1x64xf32>
      %157 = vector.extract_strided_slice %99 {offsets = [3, 0, 0], sizes = [1, 16, 64], strides = [1, 1, 1]} : vector<8x16x64xf32> to vector<1x16x64xf32>
      %158 = vector.shape_cast %157 : vector<1x16x64xf32> to vector<16x64xf32>
      %159 = arith.mulf %158, %150 : vector<16x64xf32>
      %160 = vector.extract_strided_slice %106 {offsets = [3, 0, 0], sizes = [1, 16, 64], strides = [1, 1, 1]} : vector<8x16x64xf32> to vector<1x16x64xf32>
      %161 = vector.shape_cast %160 : vector<1x16x64xf32> to vector<16x64xf32>
      %162 = arith.addf %159, %161 : vector<16x64xf32>
      %163 = vector.extract_strided_slice %108 {offsets = [3, 0, 0], sizes = [1, 16, 1], strides = [1, 1, 1]} : vector<8x16x1xf32> to vector<1x16x1xf32>
      %164 = vector.shape_cast %163 : vector<1x16x1xf32> to vector<16x1xf32>
      %165 = vector.broadcast %164 : vector<16x1xf32> to vector<16x64xf32>
      %166 = arith.mulf %162, %165 : vector<16x64xf32>
      %cst_87 = arith.constant dense<0.000000e+00> : vector<64xf32>
      %167 = vector.multi_reduction <add>, %166, %cst_87 [0] : vector<16x64xf32> to vector<64xf32>
      %168 = vector.shape_cast %167 : vector<64xf32> to vector<1x64xf32>
      %169 = vector.extract_strided_slice %99 {offsets = [2, 0, 0], sizes = [1, 16, 64], strides = [1, 1, 1]} : vector<8x16x64xf32> to vector<1x16x64xf32>
      %170 = vector.shape_cast %169 : vector<1x16x64xf32> to vector<16x64xf32>
      %171 = arith.mulf %170, %162 : vector<16x64xf32>
      %172 = vector.extract_strided_slice %106 {offsets = [2, 0, 0], sizes = [1, 16, 64], strides = [1, 1, 1]} : vector<8x16x64xf32> to vector<1x16x64xf32>
      %173 = vector.shape_cast %172 : vector<1x16x64xf32> to vector<16x64xf32>
      %174 = arith.addf %171, %173 : vector<16x64xf32>
      %175 = vector.extract_strided_slice %108 {offsets = [2, 0, 0], sizes = [1, 16, 1], strides = [1, 1, 1]} : vector<8x16x1xf32> to vector<1x16x1xf32>
      %176 = vector.shape_cast %175 : vector<1x16x1xf32> to vector<16x1xf32>
      %177 = vector.broadcast %176 : vector<16x1xf32> to vector<16x64xf32>
      %178 = arith.mulf %174, %177 : vector<16x64xf32>
      %cst_88 = arith.constant dense<0.000000e+00> : vector<64xf32>
      %179 = vector.multi_reduction <add>, %178, %cst_88 [0] : vector<16x64xf32> to vector<64xf32>
      %180 = vector.shape_cast %179 : vector<64xf32> to vector<1x64xf32>
      %181 = vector.extract_strided_slice %99 {offsets = [1, 0, 0], sizes = [1, 16, 64], strides = [1, 1, 1]} : vector<8x16x64xf32> to vector<1x16x64xf32>
      %182 = vector.shape_cast %181 : vector<1x16x64xf32> to vector<16x64xf32>
      %183 = arith.mulf %182, %174 : vector<16x64xf32>
      %184 = vector.extract_strided_slice %106 {offsets = [1, 0, 0], sizes = [1, 16, 64], strides = [1, 1, 1]} : vector<8x16x64xf32> to vector<1x16x64xf32>
      %185 = vector.shape_cast %184 : vector<1x16x64xf32> to vector<16x64xf32>
      %186 = arith.addf %183, %185 : vector<16x64xf32>
      %187 = vector.extract_strided_slice %108 {offsets = [1, 0, 0], sizes = [1, 16, 1], strides = [1, 1, 1]} : vector<8x16x1xf32> to vector<1x16x1xf32>
      %188 = vector.shape_cast %187 : vector<1x16x1xf32> to vector<16x1xf32>
      %189 = vector.broadcast %188 : vector<16x1xf32> to vector<16x64xf32>
      %190 = arith.mulf %186, %189 : vector<16x64xf32>
      %cst_89 = arith.constant dense<0.000000e+00> : vector<64xf32>
      %191 = vector.multi_reduction <add>, %190, %cst_89 [0] : vector<16x64xf32> to vector<64xf32>
      %192 = vector.shape_cast %191 : vector<64xf32> to vector<1x64xf32>
      %193 = vector.extract_strided_slice %99 {offsets = [0, 0, 0], sizes = [1, 16, 64], strides = [1, 1, 1]} : vector<8x16x64xf32> to vector<1x16x64xf32>
      %194 = vector.shape_cast %193 : vector<1x16x64xf32> to vector<16x64xf32>
      %195 = arith.mulf %194, %186 : vector<16x64xf32>
      %196 = vector.extract_strided_slice %106 {offsets = [0, 0, 0], sizes = [1, 16, 64], strides = [1, 1, 1]} : vector<8x16x64xf32> to vector<1x16x64xf32>
      %197 = vector.shape_cast %196 : vector<1x16x64xf32> to vector<16x64xf32>
      %198 = arith.addf %195, %197 : vector<16x64xf32>
      %199 = vector.extract_strided_slice %108 {offsets = [0, 0, 0], sizes = [1, 16, 1], strides = [1, 1, 1]} : vector<8x16x1xf32> to vector<1x16x1xf32>
      %200 = vector.shape_cast %199 : vector<1x16x1xf32> to vector<16x1xf32>
      %201 = vector.broadcast %200 : vector<16x1xf32> to vector<16x64xf32>
      %202 = arith.mulf %198, %201 : vector<16x64xf32>
      %cst_90 = arith.constant dense<0.000000e+00> : vector<64xf32>
      %203 = vector.multi_reduction <add>, %202, %cst_90 [0] : vector<16x64xf32> to vector<64xf32>
      %204 = vector.shape_cast %203 : vector<64xf32> to vector<1x64xf32>
      %205 = tpu.concatenate %204, %192, %180, %168, %156, %144, %132, %120 in 0 : vector<1x64xf32>, vector<1x64xf32>, vector<1x64xf32>, vector<1x64xf32>, vector<1x64xf32>, vector<1x64xf32>, vector<1x64xf32>, vector<1x64xf32> -> vector<8x64xf32>
      %206 = vector.broadcast %76 : vector<1x64xf32> to vector<8x64xf32>
      %207 = arith.mulf %206, %91 : vector<8x64xf32>
      %208 = arith.addf %205, %207 : vector<8x64xf32>
      %209 = arith.index_cast %87 : i32 to index
      %c0_91 = arith.constant 0 : index
      %210 = vector.load %arg13[%209, %c0_91] : memref<64x64xf32, #tpu.memory_space<vmem>>, vector<8x64xf32>
      %211 = arith.addf %210, %208 : vector<8x64xf32>
      %212 = arith.index_cast %87 : i32 to index
      %c0_92 = arith.constant 0 : index
      %213 = vector.load %arg13[%212, %c0_92] : memref<64x64xf32, #tpu.memory_space<vmem>>, vector<8x64xf32>
      tpu.vector_store %arg13[%212, %c0_92], %211 {strides = array<i32>} : memref<64x64xf32, #tpu.memory_space<vmem>>, vector<8x64xf32>,
      scf.yield %198 : vector<16x64xf32>
    }
    %c8_i32_72 = arith.constant 8 : i32
    %c0_73 = arith.constant 0 : index
    %c0_74 = arith.constant 0 : index
    %80 = vector.load %arg13[%c0_73, %c0_74] : memref<64x64xf32, #tpu.memory_space<vmem>>, vector<64x64xf32>
    %81 = arith.truncf %80 : vector<64x64xf32> to vector<64x64xbf16>
    %c0_75 = arith.constant 0 : index
    %c0_76 = arith.constant 0 : index
    %c0_77 = arith.constant 0 : index
    %c0_78 = arith.constant 0 : index
    %82 = vector.load %arg8[%c0_75, %c0_76, %c0_77, %c0_78] : memref<1x1x64x64xbf16, #tpu.memory_space<vmem>>, vector<1x1x64x64xbf16>
    %83 = vector.shape_cast %82 : vector<1x1x64x64xbf16> to vector<64x64xbf16>
    %84 = vector.shape_cast %81 : vector<64x64xbf16> to vector<1x1x64x64xbf16>
    tpu.vector_store %arg8[%c0_75, %c0_76, %c0_77, %c0_78], %84 {strides = array<i32>} : memref<1x1x64x64xbf16, #tpu.memory_space<vmem>>, vector<1x1x64x64xbf16>,
    return
  }
  func.func @transform_0(%arg0: i32, %arg1: i32) -> (i32, i32, i32, i32) {
    %c0_i32 = arith.constant 0 : i32
    %c0_i32_0 = arith.constant 0 : i32
    %c0_i32_1 = arith.constant 0 : i32
    return %arg1, %arg0, %c0_i32, %c0_i32_0 : i32, i32, i32, i32
  }
  func.func @transform_1(%arg0: i32, %arg1: i32) -> (i32, i32, i32) {
    %c0_i32 = arith.constant 0 : i32
    %c0_i32_0 = arith.constant 0 : i32
    %c0_i32_1 = arith.constant 0 : i32
    return %arg0, %c0_i32, %c0_i32_0 : i32, i32, i32
  }
  func.func @transform_2(%arg0: i32, %arg1: i32) -> (i32, i32, i32, i32) {
    %c0_i32 = arith.constant 0 : i32
    %c0_i32_0 = arith.constant 0 : i32
    %c0_i32_1 = arith.constant 0 : i32
    %c0_i32_2 = arith.constant 0 : i32
    return %arg0, %c0_i32, %c0_i32_0, %c0_i32_1 : i32, i32, i32, i32
  }
  func.func @transform_3(%arg0: i32, %arg1: i32) -> (i32, i32, i32, i32) {
    %c0_i32 = arith.constant 0 : i32
    %c0_i32_0 = arith.constant 0 : i32
    %c0_i32_1 = arith.constant 0 : i32
    %c0_i32_2 = arith.constant 0 : i32
    return %arg0, %c0_i32, %c0_i32_0, %c0_i32_1 : i32, i32, i32, i32
  }
  func.func @transform_4(%arg0: i32, %arg1: i32) -> (i32, i32, i32, i32) {
    %c0_i32 = arith.constant 0 : i32
    %c0_i32_0 = arith.constant 0 : i32
    %c0_i32_1 = arith.constant 0 : i32
    %c0_i32_2 = arith.constant 0 : i32
    return %arg0, %c0_i32, %c0_i32_0, %c0_i32_1 : i32, i32, i32, i32
  }
  func.func @transform_5(%arg0: i32, %arg1: i32) -> (i32, i32, i32, i32) {
    %c0_i32 = arith.constant 0 : i32
    %c0_i32_0 = arith.constant 0 : i32
    %c0_i32_1 = arith.constant 0 : i32
    %c0_i32_2 = arith.constant 0 : i32
    return %arg0, %c0_i32, %c0_i32_0, %c0_i32_1 : i32, i32, i32, i32
  }
  func.func @transform_6(%arg0: i32, %arg1: i32) -> (i32, i32, i32, i32) {
    %c0_i32 = arith.constant 0 : i32
    %c0_i32_0 = arith.constant 0 : i32
    %c0_i32_1 = arith.constant 0 : i32
    return %arg1, %arg0, %c0_i32, %c0_i32_0 : i32, i32, i32, i32
  }
}

module attributes {stable_mosaic.version = 11 : i64} {
  func.func @_out_kernel(%arg0: i32, %arg1: memref<128x64xbf16, #tpu.memory_space<vmem>>, %arg2: memref<128x64xbf16, #tpu.memory_space<vmem>>, %arg3: memref<128x64xbf16, #tpu.memory_space<vmem>>, %arg4: memref<128x32xf32, #tpu.memory_space<vmem>>, %arg5: memref<1x64xf32, #tpu.memory_space<vmem>>, %arg6: memref<1x64xf32, #tpu.memory_space<vmem>>, %arg7: memref<64x32xbf16, #tpu.memory_space<vmem>>, %arg8: memref<128x32xf32, #tpu.memory_space<vmem>>) attributes {dimension_semantics = [#tpu.dimension_semantics<parallel>], iteration_bounds = array<i64: 1>, scalar_prefetch = 0 : i64, scratch_operands = 0 : i64, tpu.core_type = #tpu.core_type<tc>, window_params = [{transform_indices = @transform_0, window_bounds = array<i64: 128, 64>}, {transform_indices = @transform_1, window_bounds = array<i64: 128, 64>}, {transform_indices = @transform_2, window_bounds = array<i64: 128, 64>}, {transform_indices = @transform_3, window_bounds = array<i64: 128, 32>}, {pipeline_mode = #tpu.pipeline_mode<synchronous>, transform_indices = @transform_4, window_bounds = array<i64: 1, 64>}, {pipeline_mode = #tpu.pipeline_mode<synchronous>, transform_indices = @transform_5, window_bounds = array<i64: 1, 64>}, {pipeline_mode = #tpu.pipeline_mode<synchronous>, transform_indices = @transform_6, window_bounds = array<i64: 64, 32>}, {transform_indices = @transform_7, window_bounds = array<i64: 128, 32>}]} {
    %c0 = arith.constant 0 : index
    %c0_0 = arith.constant 0 : index
    %0 = vector.load %arg1[%c0, %c0_0] : memref<128x64xbf16, #tpu.memory_space<vmem>>, vector<128x64xbf16>
    %1 = arith.extf %0 : vector<128x64xbf16> to vector<128x64xf32>
    %c0_1 = arith.constant 0 : index
    %c0_2 = arith.constant 0 : index
    %2 = vector.load %arg2[%c0_1, %c0_2] : memref<128x64xbf16, #tpu.memory_space<vmem>>, vector<128x64xbf16>
    %3 = arith.extf %2 : vector<128x64xbf16> to vector<128x64xf32>
    %4 = arith.addf %1, %3 : vector<128x64xf32>
    %cst = arith.constant dense<0.000000e+00> : vector<128xf32>
    %5 = vector.multi_reduction <add>, %4, %cst [1] : vector<128x64xf32> to vector<128xf32>
    %6 = vector.shape_cast %5 : vector<128xf32> to vector<128x1xf32>
    %cst_3 = arith.constant 6.400000e+01 : f32
    %7 = vector.broadcast %cst_3 : f32 to vector<128x1xf32>
    %8 = arith.divf %6, %7 : vector<128x1xf32>
    %9 = vector.broadcast %8 : vector<128x1xf32> to vector<128x64xf32>
    %10 = arith.subf %4, %9 : vector<128x64xf32>
    %11 = arith.mulf %10, %10 : vector<128x64xf32>
    %cst_4 = arith.constant dense<0.000000e+00> : vector<128xf32>
    %12 = vector.multi_reduction <add>, %11, %cst_4 [1] : vector<128x64xf32> to vector<128xf32>
    %13 = vector.shape_cast %12 : vector<128xf32> to vector<128x1xf32>
    %cst_5 = arith.constant 6.400000e+01 : f32
    %14 = vector.broadcast %cst_5 : f32 to vector<128x1xf32>
    %15 = arith.divf %13, %14 : vector<128x1xf32>
    %16 = vector.broadcast %8 : vector<128x1xf32> to vector<128x64xf32>
    %17 = arith.subf %4, %16 : vector<128x64xf32>
    %cst_6 = arith.constant 9.99999974E-6 : f32
    %18 = vector.broadcast %cst_6 : f32 to vector<128x1xf32>
    %19 = arith.addf %15, %18 : vector<128x1xf32>
    %20 = math.rsqrt %19 : vector<128x1xf32>
    %21 = vector.broadcast %20 : vector<128x1xf32> to vector<128x64xf32>
    %22 = arith.mulf %17, %21 : vector<128x64xf32>
    %c0_7 = arith.constant 0 : index
    %c0_8 = arith.constant 0 : index
    %23 = vector.load %arg5[%c0_7, %c0_8] : memref<1x64xf32, #tpu.memory_space<vmem>>, vector<1x64xf32>
    %24 = vector.broadcast %23 : vector<1x64xf32> to vector<128x64xf32>
    %25 = arith.mulf %22, %24 : vector<128x64xf32>
    %c0_9 = arith.constant 0 : index
    %c0_10 = arith.constant 0 : index
    %26 = vector.load %arg6[%c0_9, %c0_10] : memref<1x64xf32, #tpu.memory_space<vmem>>, vector<1x64xf32>
    %27 = vector.broadcast %26 : vector<1x64xf32> to vector<128x64xf32>
    %28 = arith.addf %25, %27 : vector<128x64xf32>
    %c0_11 = arith.constant 0 : index
    %c0_12 = arith.constant 0 : index
    %29 = vector.load %arg3[%c0_11, %c0_12] : memref<128x64xbf16, #tpu.memory_space<vmem>>, vector<128x64xbf16>
    %30 = arith.extf %29 : vector<128x64xbf16> to vector<128x64xf32>
    %31 = math.absf %30 : vector<128x64xf32>
    %cst_13 = arith.constant 0.000000e+00 : f32
    %32 = vector.broadcast %cst_13 : f32 to vector<128x64xf32>
    %33 = arith.subf %32, %31 : vector<128x64xf32>
    %34 = math.exp %33 : vector<128x64xf32>
    %cst_14 = arith.constant 0.000000e+00 : f32
    %35 = vector.broadcast %cst_14 : f32 to vector<128x64xf32>
    %36 = arith.cmpf oge, %30, %35 : vector<128x64xf32>
    %cst_15 = arith.constant 1.000000e+00 : f32
    %37 = vector.broadcast %cst_15 : f32 to vector<128x64xf32>
    %38 = arith.addf %37, %34 : vector<128x64xf32>
    %cst_16 = arith.constant 1.000000e+00 : f32
    %39 = vector.broadcast %cst_16 : f32 to vector<128x64xf32>
    %40 = arith.divf %39, %38 : vector<128x64xf32>
    %cst_17 = arith.constant 1.000000e+00 : f32
    %41 = vector.broadcast %cst_17 : f32 to vector<128x64xf32>
    %42 = arith.addf %41, %34 : vector<128x64xf32>
    %43 = arith.divf %34, %42 : vector<128x64xf32>
    %44 = arith.select %36, %40, %43 : vector<128x64xi1>, vector<128x64xf32>
    %45 = arith.mulf %30, %44 : vector<128x64xf32>
    %46 = arith.mulf %28, %45 : vector<128x64xf32>
    %47 = arith.truncf %46 : vector<128x64xf32> to vector<128x64xbf16>
    %48 = arith.extf %47 : vector<128x64xbf16> to vector<128x64xf32>
    %c0_18 = arith.constant 0 : index
    %c0_19 = arith.constant 0 : index
    %49 = vector.load %arg7[%c0_18, %c0_19] : memref<64x32xbf16, #tpu.memory_space<vmem>>, vector<64x32xbf16>
    %50 = arith.extf %49 : vector<64x32xbf16> to vector<64x32xf32>
    %cst_20 = arith.constant dense<0.000000e+00> : vector<128x32xf32>
    %51 = tpu.matmul %48, %50, %cst_20 {dimension_numbers = #tpu.dot_dimension_numbers<[1], [0], [0], [1], [0, 0, 1, 1], [], []>} : vector<128x64xf32>, vector<64x32xf32>, vector<128x32xf32> -> vector<128x32xf32>
    %c0_21 = arith.constant 0 : index
    %c0_22 = arith.constant 0 : index
    %52 = vector.load %arg4[%c0_21, %c0_22] : memref<128x32xf32, #tpu.memory_space<vmem>>, vector<128x32xf32>
    %53 = arith.addf %52, %51 : vector<128x32xf32>
    %c0_23 = arith.constant 0 : index
    %c0_24 = arith.constant 0 : index
    %54 = vector.load %arg8[%c0_23, %c0_24] : memref<128x32xf32, #tpu.memory_space<vmem>>, vector<128x32xf32>
    tpu.vector_store %arg8[%c0_23, %c0_24], %53 {strides = array<i32>} : memref<128x32xf32, #tpu.memory_space<vmem>>, vector<128x32xf32>,
    return
  }
  func.func @transform_0(%arg0: i32) -> (i32, i32) {
    %c0_i32 = arith.constant 0 : i32
    %c0_i32_0 = arith.constant 0 : i32
    return %arg0, %c0_i32 : i32, i32
  }
  func.func @transform_1(%arg0: i32) -> (i32, i32) {
    %c0_i32 = arith.constant 0 : i32
    %c0_i32_0 = arith.constant 0 : i32
    return %arg0, %c0_i32 : i32, i32
  }
  func.func @transform_2(%arg0: i32) -> (i32, i32) {
    %c0_i32 = arith.constant 0 : i32
    %c0_i32_0 = arith.constant 0 : i32
    return %arg0, %c0_i32 : i32, i32
  }
  func.func @transform_3(%arg0: i32) -> (i32, i32) {
    %c0_i32 = arith.constant 0 : i32
    %c0_i32_0 = arith.constant 0 : i32
    return %arg0, %c0_i32 : i32, i32
  }
  func.func @transform_4(%arg0: i32) -> (i32, i32) {
    %c0_i32 = arith.constant 0 : i32
    %c0_i32_0 = arith.constant 0 : i32
    %c0_i32_1 = arith.constant 0 : i32
    return %c0_i32, %c0_i32_0 : i32, i32
  }
  func.func @transform_5(%arg0: i32) -> (i32, i32) {
    %c0_i32 = arith.constant 0 : i32
    %c0_i32_0 = arith.constant 0 : i32
    %c0_i32_1 = arith.constant 0 : i32
    return %c0_i32, %c0_i32_0 : i32, i32
  }
  func.func @transform_6(%arg0: i32) -> (i32, i32) {
    %c0_i32 = arith.constant 0 : i32
    %c0_i32_0 = arith.constant 0 : i32
    %c0_i32_1 = arith.constant 0 : i32
    return %c0_i32, %c0_i32_0 : i32, i32
  }
  func.func @transform_7(%arg0: i32) -> (i32, i32) {
    %c0_i32 = arith.constant 0 : i32
    %c0_i32_0 = arith.constant 0 : i32
    return %arg0, %c0_i32 : i32, i32
  }
}

</mosaic_0001>

<bundles_post_ra>
// kernel: vss_block_forward.5
= control target key start
LH: loop header
LB: loop body
LE: loop exit
PB: predicated region body
PF: predicated region fallthrough
CT: control target
= control target key end

     0   :  { %s730_s12 = smov 0   ;;  %s982_s0 = inlined_call_operand.vmem [shape: bf16[2,8,8,64], index: 0, kind: input, shape index: {}]   ;;  %s983_s1 = inlined_call_operand.vmem [shape: f32[9,64], index: 1, kind: input, shape index: {}]   ;;  %s984_s2 = inlined_call_operand.vmem [shape: f32[1,64], index: 2, kind: input, shape index: {}]   ;;  %s985_s3 = inlined_call_operand.vmem [shape: bf16[2,8,8,64], index: 3, kind: output, shape index: {}]  }
   0x1 LB: > { %s618_s13 = sadd.s32 4294967295, %s707_s12   ;;  %p622_p0 = scmp.ge.s32.totalorder %s707_s12, 1  ;;  %s707_s12 = sphi %s730_s12, %s13_s12  }
   0x2   : > { %p137_p1 = scmp.lt.s32.totalorder %s707_s12, 3 }
   0x4   : > { %p138_p2 = pnand %p622_p0, %p137_p1 }
   0x5   : > { %p740_p3 = scmp.lt.s32.totalorder (!%p138_p2), %s618_s13, 1 }
   0x6   : > { %141 = sbr.rel (%p138_p2) target bundleno = 123 (0x7b), region = 32 }
   0xb   : > { %vm171_vm0 = vcmask 523264   ;;  %vm173_vm1 = vcmask 517120   ;;  %vm178_vm2 = vcmask 516096   ;;  %v709_v0 = vmov 0.0   ;;  %s988_s13 = smov (!%p740_p3, %s618_s13), 1 }
   0xc   : > { %172 = vst.msk [vmem:[#allocation2] sm:$0xff] %vm171_vm0, %v709_v0  ;;  %176 = vst.msk [vmem:[#allocation2 + $0x90] sm:$0xff] %vm171_vm0, %v709_v0  ;;  %s639_s15 = sshll.u32 %s988_s13, 5  ;;  %v781_v1 = vld [vmem:[%s983_s1 + $0x1] ss:$0 sm:$0xff]  ;;  %vm554_vm4 = vcmask 519168  }
   0xd   : > { %174 = vst.msk [vmem:[#allocation2 + $0x8] sm:$0x3] %vm173_vm1, %v709_v0  ;;  %177 = vst.msk [vmem:[#allocation2 + $0x98] sm:$0x3] %vm173_vm1, %v709_v0  ;;  %s165_s18 = scalar_lea.vmem %s982_s0, %s639_s15  ;;  %v786_v10 = vld [vmem:[%s983_s1] ss:$0 sm:$0xff]  ;;  %s947_s17 = scalar_lea.vmem %s985_s3, %s639_s15 }
   0xe   : > { %180 = vst.msk [vmem:[#allocation2 + $0x10] sm:$0x1] %vm178_vm2, %v709_v0  ;;  %181 = vst.msk [vmem:[#allocation2 + $0x20] sm:$0x1] %vm178_vm2, %v709_v0  ;;  %v642_v2 = vld [vmem:[%s165_s18] sm:$0xff]   ;;  %v657_v3 = vld [vmem:[%s165_s18 + $0x8] sm:$0xff]  }
   0xf   : > { %182 = vst.msk [vmem:[#allocation2 + $0x30] sm:$0x1] %vm178_vm2, %v709_v0  ;;  %183 = vst.msk [vmem:[#allocation2 + $0x40] sm:$0x1] %vm178_vm2, %v709_v0  ;;  %v658_v4 = vld [vmem:[%s165_s18 + $0x10] sm:$0xff]   ;;  %v643_v5 = vunpack.c.l.bf16 %v642_v2  ;;  %v644_v6 = vunpack.c.h.bf16 %v642_v2  ;;  %v647_v7 = vunpack.c.l.bf16 %v657_v3  ;;  %v648_v8 = vunpack.c.h.bf16 %v657_v3  ;;  %v659_v9 = vld [vmem:[%s165_s18 + $0x18] sm:$0xff]  }
  0x10   : > { %184 = vst.msk [vmem:[#allocation2 + $0x50] sm:$0x1] %vm178_vm2, %v709_v0  ;;  %185 = vst.msk [vmem:[#allocation2 + $0x60] sm:$0x1] %vm178_vm2, %v709_v0  ;;  %v651_v11 = vunpack.c.l.bf16 %v658_v4  ;;  %v652_v12 = vunpack.c.h.bf16 %v658_v4  ;;  %v655_v13 = vunpack.c.l.bf16 %v659_v9  ;;  %v656_v14 = vunpack.c.h.bf16 %v659_v9  ;;  %v791_v16 = vld [vmem:[%s983_s1 + $0x2] ss:$0 sm:$0xff] }
  0x11   : > { %186 = vst.msk [vmem:[#allocation2 + $0x70] sm:$0x1] %vm178_vm2, %v709_v0  ;;  %187 = vst.msk [vmem:[#allocation2 + $0x80] sm:$0x1] %vm178_vm2, %v709_v0  ;;  %v807_v23 = vld [vmem:[%s983_s1 + $0x3] ss:$0 sm:$0xff] }
  0x12   : > { %190 = vst.msk [vmem:[#allocation2 + $0x19] sm:$0x1] %vm178_vm2, %v709_v0  ;;  %191 = vst.msk [vmem:[#allocation2 + $0x29] sm:$0x1] %vm178_vm2, %v709_v0  ;;  %v812_v25 = vld [vmem:[%s983_s1 + $0x4] ss:$0 sm:$0xff] }
  0x13   : > { %192 = vst.msk [vmem:[#allocation2 + $0x39] sm:$0x1] %vm178_vm2, %v709_v0  ;;  %193 = vst.msk [vmem:[#allocation2 + $0x49] sm:$0x1] %vm178_vm2, %v709_v0  ;;  %v819_v33 = vld [vmem:[%s983_s1 + $0x5] ss:$0 sm:$0xff] }
  0x14   : > { %194 = vst.msk [vmem:[#allocation2 + $0x59] sm:$0x1] %vm178_vm2, %v709_v0  ;;  %195 = vst.msk [vmem:[#allocation2 + $0x69] sm:$0x1] %vm178_vm2, %v709_v0  ;;  %v234_v15 = vld [vmem:[#allocation2 + $0x1] sm:$0xff] }
  0x15   : > { %196 = vst.msk [vmem:[#allocation2 + $0x79] sm:$0x1] %vm178_vm2, %v709_v0  ;;  %197 = vst.msk [vmem:[#allocation2 + $0x89] sm:$0x1] %vm178_vm2, %v709_v0  ;;  %v280_v19 = vmul.f32 %v781_v1, %v234_v15  ;;  %v829_v44 = vld [vmem:[%s983_s1 + $0x6] ss:$0 sm:$0xff] }
  0x16   : > { %179 = vst.msk [vmem:[#allocation2] sm:$0x1] %vm178_vm2, %v709_v0  ;;  %188 = vst.msk [vmem:[#allocation2 + $0x90] sm:$0x1] %vm178_vm2, %v709_v0  ;;  %v835_v47 = vld [vmem:[%s983_s1 + $0x7] ss:$0 sm:$0xff] }
  0x17   : > { %189 = vst.msk [vmem:[#allocation2 + $0x9] sm:$0x1] %vm178_vm2, %v709_v0  ;;  %198 = vst.msk [vmem:[#allocation2 + $0x99] sm:$0x1] %vm178_vm2, %v709_v0  ;;  %v846_v60 = vld [vmem:[%s983_s1 + $0x8] ss:$0 sm:$0xff] }
  0x18   : > { %216 = vst.msk [vmem:[#allocation2 + $0x11] sm:$0xff] %vm171_vm0, %v643_v5  ;;  %217 = vst.msk [vmem:[#allocation2 + $0x21] sm:$0xff] %vm171_vm0, %v644_v6 }
  0x19   : > { %218 = vst.msk [vmem:[#allocation2 + $0x31] sm:$0xff] %vm171_vm0, %v647_v7  ;;  %219 = vst.msk [vmem:[#allocation2 + $0x41] sm:$0xff] %vm171_vm0, %v648_v8 }
  0x1a   : > { %220 = vst.msk [vmem:[#allocation2 + $0x51] sm:$0xff] %vm171_vm0, %v651_v11  ;;  %221 = vst.msk [vmem:[#allocation2 + $0x61] sm:$0xff] %vm171_vm0, %v652_v12 }
  0x1b   : > { %222 = vst.msk [vmem:[#allocation2 + $0x71] sm:$0xff] %vm171_vm0, %v655_v13  ;;  %223 = vst.msk [vmem:[#allocation2 + $0x81] sm:$0xff] %vm171_vm0, %v656_v14 }
  0x1d   : > { %v224_v17 = vld [vmem:[#allocation2] sm:$0xff] }
  0x1e   : > { %v244_v18 = vld [vmem:[#allocation2 + $0x2] sm:$0xff]  ;;  %v259_v20 = vmul.f32 %v786_v10, %v224_v17 }
  0x1f   : > { %v301_v21 = vmul.f32 %v791_v16, %v244_v18  ;;  %v225_v26 = vld [vmem:[#allocation2 + $0x10] sm:$0xff]  ;;  %v226_v27 = vld [vmem:[#allocation2 + $0x20] sm:$0xff] }
  0x20   : > { %v288_v22 = vadd.f32 %v280_v19, %v259_v20  ;;  %v235_v28 = vld [vmem:[#allocation2 + $0x11] sm:$0xff]  ;;  %v236_v29 = vld [vmem:[#allocation2 + $0x21] sm:$0xff]  ;;  %v261_v31 = vmul.f32 %v786_v10, %v226_v27  ;;  %v322_v32 = vmul.f32 %v807_v23, %v225_v26  ;;  %v260_v35 = vmul.f32 %v786_v10, %v225_v26  ;;  %v861_v18 = vld [vmem:[%s984_s2] ss:$0 sm:$0xff] }
  0x21   : > { %v246_v30 = vld [vmem:[#allocation2 + $0x22] sm:$0xff]  ;;  %v245_v34 = vld [vmem:[#allocation2 + $0x12] sm:$0xff]  ;;  %v281_v36 = vmul.f32 %v781_v1, %v235_v28  ;;  %v282_v37 = vmul.f32 %v781_v1, %v236_v29  ;;  %v343_v41 = vmul.f32 %v812_v25, %v235_v28  ;;  %v323_v52 = vmul.f32 %v807_v23, %v226_v27 }
  0x22   : > { %v309_v24 = vadd.f32 %v301_v21, %v288_v22  ;;  %v227_v38 = vld [vmem:[#allocation2 + $0x30] sm:$0xff]  ;;  %v303_v43 = vmul.f32 %v791_v16, %v246_v30  ;;  %v364_v46 = vmul.f32 %v819_v33, %v245_v34  ;;  %v302_v50 = vmul.f32 %v791_v16, %v245_v34  ;;  %v228_v55 = vld [vmem:[#allocation2 + $0x40] sm:$0xff] }
  0x23   : > { %v237_v39 = vld [vmem:[#allocation2 + $0x31] sm:$0xff]  ;;  %v290_v42 = vadd.f32 %v282_v37, %v261_v31  ;;  %v262_v48 = vmul.f32 %v786_v10, %v227_v38  ;;  %v289_v54 = vadd.f32 %v281_v36, %v260_v35  ;;  %v238_v56 = vld [vmem:[#allocation2 + $0x41] sm:$0xff]  ;;  %v344_v57 = vmul.f32 %v812_v25, %v236_v29 }
  0x24   : > { %v330_v40 = vadd.f32 %v322_v32, %v309_v24  ;;  %v283_v49 = vmul.f32 %v781_v1, %v237_v39  ;;  %v247_v53 = vld [vmem:[#allocation2 + $0x32] sm:$0xff]  ;;  %v385_v59 = vmul.f32 %v829_v44, %v226_v27  ;;  %v365_v62 = vmul.f32 %v819_v33, %v246_v30  ;;  %v248_v11 = vld [vmem:[#allocation2 + $0x42] sm:$0xff] }
  0x25   : > { %v311_v51 = vadd.f32 %v303_v43, %v290_v42  ;;  %v406_v63 = vmul.f32 %v835_v47, %v236_v29  ;;  %v310_v0 = vadd.f32 %v302_v50, %v289_v54  ;;  %v324_v2 = vmul.f32 %v807_v23, %v227_v38  ;;  %v229_v24 = vld [vmem:[#allocation2 + $0x50] sm:$0xff]  ;;  %v230_v50 = vld [vmem:[#allocation2 + $0x60] sm:$0xff] }
  0x26   : > { %v351_v45 = vadd.f32 %v343_v41, %v330_v40  ;;  %v291_v61 = vadd.f32 %v283_v49, %v262_v48  ;;  %v304_v4 = vmul.f32 %v791_v16, %v247_v53  ;;  %v263_v5 = vmul.f32 %v786_v10, %v228_v55  ;;  %v239_v26 = vld [vmem:[#allocation2 + $0x51] sm:$0xff] }
  0x27   : > { %v284_v6 = vmul.f32 %v781_v1, %v238_v56  ;;  %v427_v7 = vmul.f32 %v846_v60, %v246_v30  ;;  %v331_v8 = vadd.f32 %v323_v52, %v310_v0  ;;  %v345_v9 = vmul.f32 %v812_v25, %v237_v39 }
  0x28   : > { %v372_v58 = vadd.f32 %v364_v46, %v351_v45  ;;  %v332_v12 = vadd.f32 %v324_v2, %v311_v51  ;;  %v312_v14 = vadd.f32 %v304_v4, %v291_v61  ;;  %v366_v15 = vmul.f32 %v819_v33, %v247_v53  ;;  %v240_v51 = vld [vmem:[#allocation2 + $0x61] sm:$0xff] }
  0x29   : > { %v386_v17 = vmul.f32 %v829_v44, %v227_v38  ;;  %v352_v19 = vadd.f32 %v344_v57, %v331_v8  ;;  %v407_v20 = vmul.f32 %v835_v47, %v237_v39  ;;  %v428_v21 = vmul.f32 %v846_v60, %v247_v53 }
  0x2a   : > { %v393_v3 = vadd.f32 %v385_v59, %v372_v58  ;;  %v353_v22 = vadd.f32 %v345_v9, %v332_v12  ;;  %v292_v28 = vadd.f32 %v284_v6, %v263_v5  ;;  %v305_v29 = vmul.f32 %v791_v16, %v248_v11  ;;  %v249_v58 = vld [vmem:[#allocation2 + $0x52] sm:$0xff] }
  0x2b   : > { %v325_v30 = vmul.f32 %v807_v23, %v228_v55  ;;  %v373_v31 = vadd.f32 %v365_v62, %v352_v19  ;;  %v346_v32 = vmul.f32 %v812_v25, %v238_v56  ;;  %v387_v35 = vmul.f32 %v829_v44, %v228_v55 }
  0x2c   : > { %v414_v13 = vadd.f32 %v406_v63, %v393_v3  ;;  %v374_v34 = vadd.f32 %v366_v15, %v353_v22  ;;  %v264_v37 = vmul.f32 %v786_v10, %v229_v24  ;;  %v285_v38 = vmul.f32 %v781_v1, %v239_v26  ;;  %v241_v22 = vld [vmem:[#allocation2 + $0x71] sm:$0xff] }
  0x2d   : > { %v333_v39 = vadd.f32 %v325_v30, %v312_v14  ;;  %v394_v40 = vadd.f32 %v386_v17, %v373_v31  ;;  %v367_v41 = vmul.f32 %v819_v33, %v248_v11  ;;  %v408_v43 = vmul.f32 %v835_v47, %v238_v56  ;;  %v250_v14 = vld [vmem:[#allocation2 + $0x62] sm:$0xff] }
  0x2e   : > { %v435_v27 = vadd.f32 %v427_v7, %v414_v13  ;;  %v395_v42 = vadd.f32 %v387_v35, %v374_v34  ;;  %v313_v46 = vadd.f32 %v305_v29, %v292_v28  ;;  %v429_v48 = vmul.f32 %v846_v60, %v248_v11 }
  0x2f   : > { %v354_v49 = vadd.f32 %v346_v32, %v333_v39  ;;  %v415_v52 = vadd.f32 %v407_v20, %v394_v40  ;;  %v326_v54 = vmul.f32 %v807_v23, %v229_v24  ;;  %v347_v55 = vmul.f32 %v812_v25, %v239_v26 }
  0x30   : > { %v870_v36 = vadd.f32 %v861_v18, %v435_v27  ;;  %v416_v53 = vadd.f32 %v408_v43, %v395_v42  ;;  %v293_v59 = vadd.f32 %v285_v38, %v264_v37  ;;  %v388_v56 = vmul.f32 %v829_v44, %v229_v24  ;;  %v251_v37 = vld [vmem:[#allocation2 + $0x72] sm:$0xff] }
  0x31   : > { %v375_v61 = vadd.f32 %v367_v41, %v354_v49  ;;  %v436_v62 = vadd.f32 %v428_v21, %v415_v52  ;;  %v265_v0 = vmul.f32 %v786_v10, %v230_v50  ;;  %v286_v2 = vmul.f32 %v781_v1, %v240_v51  ;;  %v231_v21 = vld [vmem:[#allocation2 + $0x70] sm:$0xff] }
  0x32   : > { %v458_v45 = vand.u32 2147483647, %v870_v36  ;;  %v437_v63 = vadd.f32 %v429_v48, %v416_v53  ;;  %v409_v5 = vmul.f32 %v835_v47, %v239_v26  ;;  %v334_v6 = vadd.f32 %v326_v54, %v313_v46 }
  0x33   : > { %v396_v4 = vadd.f32 %v388_v56, %v375_v61  ;;  %v885_v7 = vadd.f32 %v861_v18, %v436_v62  ;;  %v306_v9 = vmul.f32 %v791_v16, %v249_v58  ;;  %v368_v11 = vmul.f32 %v819_v33, %v249_v58 }
  0x34   : > { %v466_v57 = vsub.f32 0.0, %v458_v45  ;;  %v888_v8 = vadd.f32 %v861_v18, %v437_v63  ;;  %v430_v13 = vmul.f32 %v846_v60, %v249_v58  ;;  %v355_v15 = vadd.f32 %v347_v55, %v334_v6  ;;  %v233_v58 = vld [vmem:[#allocation2 + $0x90] sm:$0xff] }
  0x35   : > { %v417_v12 = vadd.f32 %v409_v5, %v396_v4  ;;  %v459_v17 = vand.u32 2147483647, %v885_v7  ;;  %v294_v20 = vadd.f32 %v286_v2, %v265_v0  ;;  %v314_v24 = vadd.f32 %v306_v9, %v293_v59  ;;  %v252_v9 = vld [vmem:[#allocation2 + $0x82] sm:$0xff] }
  0x36   : > { %v474_v3 = vmul.f32 1.442695, %v466_v57  ;;  %v460_v19 = vand.u32 2147483647, %v888_v8  ;;  %v376_v27 = vadd.f32 %v368_v11, %v355_v15  ;;  %v389_v28 = vmul.f32 %v829_v44, %v230_v50 }
  0x37   : > { %v438_v26 = vadd.f32 %v430_v13, %v417_v12  ;;  %v467_v29 = vsub.f32 0.0, %v459_v17  ;;  %v307_v31 = vmul.f32 %v791_v16, %v250_v14  ;;  %v410_v32 = vmul.f32 %v835_v47, %v240_v51 }
  0x38   : > { %669 = vpow2.f32 %v474_v3  ;;  %v468_v30 = vsub.f32 0.0, %v460_v19  ;;  %v397_v35 = vadd.f32 %v389_v28, %v376_v27  ;;  %v266_v38 = vmul.f32 %v786_v10, %v231_v21  ;;  %v232_v10 = vld [vmem:[#allocation2 + $0x80] sm:$0xff] }
  0x39   : > { %v899_v34 = vadd.f32 %v861_v18, %v438_v26  ;;  %v287_v39 = vmul.f32 %v781_v1, %v241_v22  ;;  %v476_v40 = vmul.f32 1.442695, %v467_v29  ;;  %v315_v42 = vadd.f32 %v307_v31, %v294_v20 }
  0x3a   : > { %v478_v41 = vmul.f32 1.442695, %v468_v30  ;;  %v327_v43 = vmul.f32 %v807_v23, %v230_v50  ;;  %v418_v46 = vadd.f32 %v410_v32, %v397_v35  ;;  %v431_v48 = vmul.f32 %v846_v60, %v250_v14 }
  0x3b   : > { %v461_v45 = vand.u32 2147483647, %v899_v34  ;;  %v295_v49 = vadd.f32 %v287_v39, %v266_v38  ;;  %671 = vpow2.f32 %v476_v40  ;;  %v348_v52 = vmul.f32 %v812_v25, %v240_v51  ;;  %v242_v51 = vld [vmem:[#allocation2 + $0x81] sm:$0xff]  ;;  %v253_v39 = vld [vmem:[#allocation2 + $0x92] sm:$0xff] }
  0x3c   : > { %v308_v53 = vmul.f32 %v791_v16, %v251_v37  ;;  %v335_v54 = vadd.f32 %v327_v43, %v314_v24  ;;  %673 = vpow2.f32 %v478_v41  ;;  %v439_v55 = vadd.f32 %v431_v48, %v418_v46 }
  0x3d   : > { %v469_v1 = vsub.f32 0.0, %v461_v45  ;;  %v328_v57 = vmul.f32 %v807_v23, %v231_v21  ;;  %v369_v50 = vmul.f32 %v819_v33, %v250_v14  ;;  %v349_v61 = vmul.f32 %v812_v25, %v241_v22 }
  0x3e   : > { %v316_v59 = vadd.f32 %v308_v53, %v295_v49  ;;  %v356_v56 = vadd.f32 %v348_v52, %v335_v54  ;;  %v912_v63 = vadd.f32 %v861_v18, %v439_v55  ;;  %v329_v16 = vmul.f32 %v807_v23, %v232_v10 }
  0x3f   : > { %v480_v62 = vmul.f32 1.442695, %v469_v1  ;;  %v336_v0 = vadd.f32 %v328_v57, %v315_v42  ;;  %v390_v3 = vmul.f32 %v829_v44, %v231_v21  ;;  %v392_v4 = vmul.f32 %v829_v44, %v233_v58 }
  0x40   : > { %v377_v2 = vadd.f32 %v369_v50, %v356_v56  ;;  %v462_v5 = vand.u32 2147483647, %v912_v63  ;;  %v370_v6 = vmul.f32 %v819_v33, %v251_v37  ;;  %v411_v14 = vmul.f32 %v835_v47, %v241_v22  ;;  %v243_v22 = vld [vmem:[#allocation2 + $0x91] sm:$0xff] }
  0x41   : > { %675 = vpow2.f32 %v480_v62  ;;  %v357_v11 = vadd.f32 %v349_v61, %v336_v0  ;;  %v350_v15 = vmul.f32 %v812_v25, %v242_v51  ;;  %v337_v23 = vadd.f32 %v329_v16, %v316_v59 }
  0x42   : > { %v398_v13 = vadd.f32 %v390_v3, %v377_v2  ;;  %v470_v19 = vsub.f32 0.0, %v462_v5  ;;  %v391_v21 = vmul.f32 %v829_v44, %v232_v10  ;;  %v432_v26 = vmul.f32 %v846_v60, %v251_v37 }
  0x43   : > { %v378_v20 = vadd.f32 %v370_v6, %v357_v11  ;;  %v371_v27 = vmul.f32 %v819_v33, %v252_v9  ;;  %v358_v28 = vadd.f32 %v350_v15, %v337_v23  ;;  %v412_v31 = vmul.f32 %v835_v47, %v242_v51 }
  0x44   : > { %v419_v24 = vadd.f32 %v411_v14, %v398_v13  ;;  %v482_v29 = vmul.f32 1.442695, %v470_v19  ;;  %v433_v38 = vmul.f32 %v846_v60, %v252_v9  ;;  %v413_v33 = vmul.f32 %v835_v47, %v243_v22 }
  0x45   : > { %v670_v12 = vpop.eup %669  ;;  %v399_v30 = vadd.f32 %v391_v21, %v378_v20  ;;  %v379_v25 = vadd.f32 %v371_v27, %v358_v28  ;;  %v434_v48 = vmul.f32 %v846_v60, %v253_v39  ;;  %vm490_vm3 = vcmp.ge.f32.partialorder %v870_v36, 0.0 }
  0x46   : > { %v498_v17 = vadd.f32 1.0, %v670_v12  ;;  %v440_v32 = vadd.f32 %v432_v26, %v419_v24  ;;  %vm491_vm5 = vcmp.ge.f32.partialorder %v885_v7, 0.0  ;;  %vm492_vm6 = vcmp.ge.f32.partialorder %v888_v8, 0.0 }
  0x47   : > { %v420_v35 = vadd.f32 %v412_v31, %v399_v30  ;;  %v400_v37 = vadd.f32 %v392_v4, %v379_v25  ;;  %vm493_vm7 = vcmp.ge.f32.partialorder %v899_v34, 0.0  ;;  %vm494_vm8 = vcmp.ge.f32.partialorder %v912_v63, 0.0 }
  0x48   : > { %677 = vrcp.f32 %v498_v17  ;;  %v927_v44 = vadd.f32 %v861_v18, %v440_v32  ;;  %v672_v40 = vpop.eup %671 }
  0x49   : > { %679 = vpow2.f32 %v482_v29  ;;  %v441_v41 = vadd.f32 %v433_v38, %v420_v35  ;;  %v674_v42 = vpop.eup %673  ;;  %v499_v43 = vadd.f32 1.0, %v672_v40  ;;  %v421_v46 = vadd.f32 %v413_v33, %v400_v37 }
  0x4a   : > { %v463_v45 = vand.u32 2147483647, %v927_v44  ;;  %v500_v49 = vadd.f32 1.0, %v674_v42  ;;  %vm495_vm9 = vcmp.ge.f32.partialorder %v927_v44, 0.0 }
  0x4b   : > { %v933_v52 = vadd.f32 %v861_v18, %v441_v41  ;;  %681 = vrcp.f32 %v499_v43  ;;  %v442_v54 = vadd.f32 %v434_v48, %v421_v46 }
  0x4c   : > { %v471_v53 = vsub.f32 0.0, %v463_v45  ;;  %683 = vrcp.f32 %v500_v49 }
  0x4d   : > { %v464_v10 = vand.u32 2147483647, %v933_v52  ;;  %v937_v55 = vadd.f32 %v861_v18, %v442_v54  ;;  %vm496_vm10 = vcmp.ge.f32.partialorder %v933_v52, 0.0 }
  0x4e   : > { %v676_v47 = vpop.eup %675  ;;  %v484_v1 = vmul.f32 1.442695, %v471_v53 }
  0x4f   : > { %v501_v57 = vadd.f32 1.0, %v676_v47  ;;  %v472_v58 = vsub.f32 0.0, %v464_v10  ;;  %v465_v60 = vand.u32 2147483647, %v937_v55  ;;  %vm497_vm11 = vcmp.ge.f32.partialorder %v937_v55, 0.0 }
  0x50   : > { %685 = vpow2.f32 %v484_v1 }
  0x51   : > { %687 = vrcp.f32 %v501_v57  ;;  %v486_v50 = vmul.f32 1.442695, %v472_v58  ;;  %v473_v61 = vsub.f32 0.0, %v465_v60 }
  0x53   : > { %689 = vpow2.f32 %v486_v50  ;;  %v488_v51 = vmul.f32 1.442695, %v473_v61 }
  0x55   : > { %v678_v59 = vpop.eup %677  ;;  %691 = vpow2.f32 %v488_v51 }
  0x56   : > { %v522_v56 = vmul.f32 %v678_v59, %v670_v12  ;;  %v680_v62 = vpop.eup %679 }
  0x57   : > { %v502_v0 = vadd.f32 1.0, %v680_v62 }
  0x58   : > { %v530_v16 = vsel %vm490_vm3, %v678_v59, %v522_v56  ;;  %v682_v3 = vpop.eup %681 }
  0x59   : > { %v538_v18 = vmul.f32 %v530_v16, %v870_v36  ;;  %693 = vrcp.f32 %v502_v0  ;;  %v684_v4 = vpop.eup %683  ;;  %v523_v5 = vmul.f32 %v682_v3, %v672_v40 }
  0x5a   : > { %v524_v36 = vmul.f32 %v684_v4, %v674_v42 }
  0x5b   : > { %v546_v2 = vpack.c.bf16 %v538_v18, %v538_v18  ;;  %v531_v6 = vsel %vm491_vm5, %v682_v3, %v523_v5 }
  0x5c   : > { %v539_v11 = vmul.f32 %v531_v6, %v885_v7  ;;  %v532_v12 = vsel %vm492_vm6, %v684_v4, %v524_v36 }
  0x5d   : > { %555 = vst.msk [vmem:[%s947_s17] sm:$0xf] %vm554_vm4, %v546_v2  ;;  %v686_v9 = vpop.eup %685  ;;  %v540_v14 = vmul.f32 %v532_v12, %v888_v8 }
  0x5e   : > { %v688_v13 = vpop.eup %687  ;;  %v503_v15 = vadd.f32 1.0, %v686_v9  ;;  %v547_v23 = vpack.c.bf16 %v539_v11, %v539_v11 }
  0x5f   : > { %v525_v17 = vmul.f32 %v688_v13, %v676_v47  ;;  %v548_v20 = vpack.c.bf16 %v540_v14, %v540_v14 }
  0x60   : > { %v690_v19 = vpop.eup %689  ;;  %695 = vrcp.f32 %v503_v15  ;;  %556 = vst.msk [vmem:[%s947_s17 + $0x4] sm:$0xf] %vm554_vm4, %v547_v23 }
  0x61   : > { %v533_v21 = vsel %vm493_vm7, %v688_v13, %v525_v17  ;;  %v504_v24 = vadd.f32 1.0, %v690_v19  ;;  %557 = vst.msk [vmem:[%s947_s17 + $0x8] sm:$0xf] %vm554_vm4, %v548_v20 }
  0x62   : > { %v541_v7 = vmul.f32 %v533_v21, %v899_v34  ;;  %v692_v26 = vpop.eup %691 }
  0x63   : > { %697 = vrcp.f32 %v504_v24  ;;  %v505_v28 = vadd.f32 1.0, %v692_v26 }
  0x64   : > { %v549_v27 = vpack.c.bf16 %v541_v7, %v541_v7 }
  0x65   : > { %699 = vrcp.f32 %v505_v28 }
  0x66   : > { %v694_v8 = vpop.eup %693  ;;  %558 = vst.msk [vmem:[%s947_s17 + $0xc] sm:$0xf] %vm554_vm4, %v549_v27 }
  0x67   : > { %v526_v29 = vmul.f32 %v694_v8, %v680_v62 }
  0x69   : > { %v534_v30 = vsel %vm494_vm8, %v694_v8, %v526_v29 }
  0x6a   : > { %v542_v31 = vmul.f32 %v534_v30, %v912_v63 }
  0x6c   : > { %v550_v22 = vpack.c.bf16 %v542_v31, %v542_v31 }
  0x6d   : > { %v696_v32 = vpop.eup %695 }
  0x6e   : > { %559 = vst.msk [vmem:[%s947_s17 + $0x10] sm:$0xf] %vm554_vm4, %v550_v22  ;;  %v527_v34 = vmul.f32 %v696_v32, %v686_v9 }
  0x70   : > { %v698_v25 = vpop.eup %697  ;;  %v535_v35 = vsel %vm495_vm9, %v696_v32, %v527_v34 }
  0x71   : > { %v543_v38 = vmul.f32 %v535_v35, %v927_v44  ;;  %v528_v39 = vmul.f32 %v698_v25, %v690_v19 }
  0x72   : > { %v700_v37 = vpop.eup %699 }
  0x73   : > { %v551_v33 = vpack.c.bf16 %v543_v38, %v543_v38  ;;  %v536_v63 = vsel %vm496_vm10, %v698_v25, %v528_v39  ;;  %v529_v41 = vmul.f32 %v700_v37, %v692_v26 }
  0x74   : > { %v544_v40 = vmul.f32 %v536_v63, %v933_v52 }
  0x75   : > { %560 = vst.msk [vmem:[%s947_s17 + $0x14] sm:$0xf] %vm554_vm4, %v551_v33  ;;  %v537_v43 = vsel %vm497_vm11, %v700_v37, %v529_v41 }
  0x76   : > { %v552_v42 = vpack.c.bf16 %v544_v40, %v544_v40  ;;  %v545_v45 = vmul.f32 %v537_v43, %v937_v55 }
  0x78   : > { %561 = vst.msk [vmem:[%s947_s17 + $0x18] sm:$0xf] %vm554_vm4, %v552_v42  ;;  %v553_v44 = vpack.c.bf16 %v545_v45, %v545_v45 }
  0x7a   : > { %562 = vst.msk [vmem:[%s947_s17 + $0x1c] sm:$0xf] %vm554_vm4, %v553_v44 }
  0x7b PF: > { %s13_s12 = sadd.s32 1, %s707_s12  }
  0x7c   : > { %p10_p4 = scmp.ge.s32.totalorder %s13_s12, 4  }
  0x7e   :  { %12 = sbr.rel (!%p10_p4) target bundleno = 1 (0x1), region = 64 }

// kernel: vss_block_forward.4
= control target key start
LH: loop header
LB: loop body
LE: loop exit
PB: predicated region body
PF: predicated region fallthrough
CT: control target
= control target key end

     0   :  { %11 = vsyncpa [#allocation3], 0  ;;  %s861_s18 = smov [#allocation2]   ;;  %s1258_s0 = inlined_call_operand.hbm [shape: f32[128,32], index: 0, kind: input, shape index: {}]   ;;  %s1259_s1 = inlined_call_operand.vmem [shape: f32[1,32], index: 1, kind: input, shape index: {}]   ;;  %s1260_s2 = inlined_call_operand.vmem [shape: f32[1,32], index: 2, kind: input, shape index: {}]   ;;  %s1261_s3 = inlined_call_operand.vmem [shape: bf16[32,128], index: 3, kind: input, shape index: {}]   ;;  %s1262_s4 = inlined_call_operand.vmem [shape: bf16[128,64], index: 4, kind: output, shape index: {0}]   ;;  %s1263_s5 = inlined_call_operand.vmem [shape: bf16[128,64], index: 5, kind: output, shape index: {1}]  }
   0x1   :  { %s17_s19 = sshll.u32 %s861_s18, 4  ;;  %s18_s19 = int_to_ptr.vmem [resolvable:$true] %s17_s19 }
   0x2   :  { %s847_s20 = scalar_lea.vmem %s18_s19, 2048  ;;  %p852_p1 = scmp.lt.s32.totalorder %s18_s19, %s18_s19 }
   0x3   :  { %p848_p0 = scmp.ne.s32.totalorder %s18_s19, %s847_s20  ;;  %p853_p2 = scmp.lt.s32.totalorder %s847_s20, %s847_s20 }
   0x5   :  { %p854_p3 = por %p853_p2, %p852_p1 }
   0x7   :  { %p855_p4 = pnand %p854_p3, %p848_p0 }
   0x9   :  { %858 = shalt.err (!%p855_p4)
}
   0xa   :  { %s862_s21 = smov 128   ;;  %s863_s22 = smov 8  }
   0xb   :  { %23 = dma.hbm_to_vmem [thread:$0]  %s1258_s0, 2048, %s18_s19, [#allocation3], %s862_s21, %s862_s21, %s863_s22  }
   0xc   :  { %859 = dma.done.wait [#allocation3], 2048  }
   0xd   :  { %860 = vsyncadd [#allocation3], 4294965248  ;;  %vm49_vm0 = vcmask 261120   ;;  %v33_v0 = vld [vmem:[#allocation2] sm:$0xff]  ;;  %v34_v1 = vld [vmem:[#allocation2 + $0x8] sm:$0xff]  ;;  %vm594_vm1 = vcmask 519168  }
   0xe   :  { %v41_v2 = vld [vmem:[#allocation2 + $0x40] sm:$0xff]  ;;  %v50_v3 = vsel %vm49_vm0, %v33_v0, 0.0  ;;  %v53_v4 = vsel %vm49_vm0, %v34_v1, 0.0  ;;  %v42_v5 = vld [vmem:[#allocation2 + $0x48] sm:$0xff]  ;;  %v35_v8 = vld [vmem:[#allocation2 + $0x10] sm:$0xff]  ;;  %s864_s6 = smov 64  }
   0xf   :  { %51 = vadd.xlane.f32.xlu0 %v50_v3  ;;  %54 = vadd.xlane.f32.xlu1 %v53_v4  ;;  %v74_v6 = vsel %vm49_vm0, %v41_v2, 0.0  ;;  %v77_v7 = vsel %vm49_vm0, %v42_v5, 0.0  ;;  %v43_v9 = vld [vmem:[#allocation2 + $0x50] sm:$0xff]  ;;  %v56_v10 = vsel %vm49_vm0, %v35_v8, 0.0  ;;  %v904_v12 = vld [vmem:[#allocation2 + $0x18] sm:$0xff]  ;;  %v912_v16 = vld [vmem:[#allocation2 + $0x20] sm:$0xff] }
  0x10   :  { %v80_v11 = vsel %vm49_vm0, %v43_v9, 0.0  ;;  %v906_v13 = vld [vmem:[#allocation2 + $0x58] sm:$0xff]  ;;  %v59_v14 = vsel %vm49_vm0, %v904_v12, 0.0  ;;  %v914_v17 = vld [vmem:[#allocation2 + $0x60] sm:$0xff]  ;;  %v62_v18 = vsel %vm49_vm0, %v912_v16, 0.0  ;;  %v920_v20 = vld [vmem:[#allocation2 + $0x28] sm:$0xff] }
  0x11   :  { %v83_v15 = vsel %vm49_vm0, %v906_v13, 0.0  ;;  %v86_v19 = vsel %vm49_vm0, %v914_v17, 0.0  ;;  %v922_v21 = vld [vmem:[#allocation2 + $0x68] sm:$0xff]  ;;  %v65_v22 = vsel %vm49_vm0, %v920_v20, 0.0  ;;  %v928_v24 = vld [vmem:[#allocation2 + $0x30] sm:$0xff]  ;;  %v936_v28 = vld [vmem:[#allocation2 + $0x38] sm:$0xff] }
  0x12   :  { %v89_v23 = vsel %vm49_vm0, %v922_v21, 0.0  ;;  %v930_v25 = vld [vmem:[#allocation2 + $0x70] sm:$0xff]  ;;  %v68_v26 = vsel %vm49_vm0, %v928_v24, 0.0  ;;  %v938_v29 = vld [vmem:[#allocation2 + $0x78] sm:$0xff]  ;;  %v71_v30 = vsel %vm49_vm0, %v936_v28, 0.0 }
  0x13   :  { %75 = vadd.xlane.f32.xlu0 %v74_v6  ;;  %78 = vadd.xlane.f32.xlu1 %v77_v7  ;;  %v92_v27 = vsel %vm49_vm0, %v930_v25, 0.0  ;;  %v95_v31 = vsel %vm49_vm0, %v938_v29, 0.0 }
  0x17   :  { %57 = vadd.xlane.f32.xlu0 %v56_v10  ;;  %81 = vadd.xlane.f32.xlu1 %v80_v11 }
  0x1b   :  { %60 = vadd.xlane.f32.xlu0 %v59_v14  ;;  %84 = vadd.xlane.f32.xlu1 %v83_v15 }
  0x1f   :  { %63 = vadd.xlane.f32.xlu0 %v62_v18  ;;  %87 = vadd.xlane.f32.xlu1 %v86_v19 }
  0x23   :  { %66 = vadd.xlane.f32.xlu0 %v65_v22  ;;  %90 = vadd.xlane.f32.xlu1 %v89_v23 }
  0x27   :  { %69 = vadd.xlane.f32.xlu0 %v68_v26  ;;  %93 = vadd.xlane.f32.xlu1 %v92_v27 }
  0x2b   :  { %72 = vadd.xlane.f32.xlu0 %v71_v30  ;;  %96 = vadd.xlane.f32.xlu1 %v95_v31 }
  0x98   :  { %v52_v32 = vpop.xlane.xlu0 %51  ;;  %v55_v33 = vpop.xlane.xlu1 %54 }
  0x99   :  { %v99_v34 = vmul.f32 0.03125, %v52_v32  ;;  %v100_v35 = vmul.f32 0.03125, %v55_v33 }
  0x9b   :  { %v944_v36 = vsub.f32 %v33_v0, %v99_v34  ;;  %v946_v37 = vsub.f32 %v34_v1, %v100_v35 }
  0x9c   :  { %v76_v38 = vpop.xlane.xlu0 %75  ;;  %v79_v39 = vpop.xlane.xlu1 %78 }
  0x9d   :  { %v107_v40 = vmul.f32 0.03125, %v76_v38  ;;  %v108_v41 = vmul.f32 0.03125, %v79_v39  ;;  %v131_v42 = vmul.f32 %v944_v36, %v944_v36  ;;  %v132_v43 = vmul.f32 %v946_v37, %v946_v37 }
  0x9f   :  { %v952_v44 = vsub.f32 %v41_v2, %v107_v40  ;;  %v954_v45 = vsub.f32 %v42_v5, %v108_v41  ;;  %v147_v46 = vsel %vm49_vm0, %v131_v42, 0.0  ;;  %v150_v49 = vsel %vm49_vm0, %v132_v43, 0.0 }
  0xa0   :  { %148 = vadd.xlane.f32.xlu0 %v147_v46  ;;  %v58_v47 = vpop.xlane.xlu0 %57  ;;  %v82_v48 = vpop.xlane.xlu1 %81 }
  0xa1   :  { %v101_v50 = vmul.f32 0.03125, %v58_v47  ;;  %v109_v51 = vmul.f32 0.03125, %v82_v48  ;;  %v139_v52 = vmul.f32 %v952_v44, %v952_v44  ;;  %v140_v53 = vmul.f32 %v954_v45, %v954_v45 }
  0xa3   :  { %v962_v54 = vsub.f32 %v35_v8, %v101_v50  ;;  %v964_v55 = vsub.f32 %v43_v9, %v109_v51  ;;  %v171_v56 = vsel %vm49_vm0, %v139_v52, 0.0  ;;  %v174_v59 = vsel %vm49_vm0, %v140_v53, 0.0 }
  0xa4   :  { %151 = vadd.xlane.f32.xlu0 %v150_v49  ;;  %172 = vadd.xlane.f32.xlu1 %v171_v56  ;;  %v61_v57 = vpop.xlane.xlu0 %60  ;;  %v85_v58 = vpop.xlane.xlu1 %84 }
  0xa5   :  { %v102_v60 = vmul.f32 0.03125, %v61_v57  ;;  %v110_v61 = vmul.f32 0.03125, %v85_v58  ;;  %v133_v62 = vmul.f32 %v962_v54, %v962_v54  ;;  %v141_v63 = vmul.f32 %v964_v55, %v964_v55  ;;  %v735_v57 = vld [vmem:[%s1261_s3] sm:$0xff]  }
  0xa6   :  { %v737_v58 = vunpack.c.h.bf16 %v735_v57 }
  0xa7   :  { %v973_v0 = vsub.f32 %v904_v12, %v102_v60  ;;  %v976_v1 = vsub.f32 %v906_v13, %v110_v61  ;;  %v153_v2 = vsel %vm49_vm0, %v133_v62, 0.0  ;;  %v177_v5 = vsel %vm49_vm0, %v141_v63, 0.0 }
  0xa8   :  { %175 = vadd.xlane.f32.xlu1 %v174_v59  ;;  %154 = vadd.xlane.f32.xlu0 %v153_v2  ;;  %v64_v3 = vpop.xlane.xlu0 %63  ;;  %v88_v4 = vpop.xlane.xlu1 %87  ;;  %v736_v59 = vunpack.c.l.bf16 %v735_v57 }
  0xa9   :  { %v103_v6 = vmul.f32 0.03125, %v64_v3  ;;  %v111_v7 = vmul.f32 0.03125, %v88_v4  ;;  %v134_v8 = vmul.f32 %v973_v0, %v973_v0  ;;  %v142_v9 = vmul.f32 %v976_v1, %v976_v1 }
  0xab   :  { %v985_v10 = vsub.f32 %v912_v16, %v103_v6  ;;  %v988_v11 = vsub.f32 %v914_v17, %v111_v7  ;;  %v156_v12 = vsel %vm49_vm0, %v134_v8, 0.0  ;;  %v180_v15 = vsel %vm49_vm0, %v142_v9, 0.0 }
  0xac   :  { %178 = vadd.xlane.f32.xlu1 %v177_v5  ;;  %157 = vadd.xlane.f32.xlu0 %v156_v12  ;;  %v67_v13 = vpop.xlane.xlu0 %66  ;;  %v91_v14 = vpop.xlane.xlu1 %90 }
  0xad   :  { %v104_v18 = vmul.f32 0.03125, %v67_v13  ;;  %v112_v19 = vmul.f32 0.03125, %v91_v14  ;;  %v135_v22 = vmul.f32 %v985_v10, %v985_v10  ;;  %v143_v16 = vmul.f32 %v988_v11, %v988_v11 }
  0xaf   :  { %v997_v23 = vsub.f32 %v920_v20, %v104_v18  ;;  %v1000_v17 = vsub.f32 %v922_v21, %v112_v19  ;;  %v159_v26 = vsel %vm49_vm0, %v135_v22, 0.0  ;;  %v183_v31 = vsel %vm49_vm0, %v143_v16, 0.0 }
  0xb0   :  { %181 = vadd.xlane.f32.xlu1 %v180_v15  ;;  %160 = vadd.xlane.f32.xlu0 %v159_v26  ;;  %v70_v27 = vpop.xlane.xlu0 %69  ;;  %v94_v30 = vpop.xlane.xlu1 %93 }
  0xb1   :  { %v105_v32 = vmul.f32 0.03125, %v70_v27  ;;  %v113_v33 = vmul.f32 0.03125, %v94_v30  ;;  %v136_v34 = vmul.f32 %v997_v23, %v997_v23  ;;  %v144_v20 = vmul.f32 %v1000_v17, %v1000_v17 }
  0xb3   :  { %v1009_v35 = vsub.f32 %v928_v24, %v105_v32  ;;  %v1012_v21 = vsub.f32 %v930_v25, %v113_v33  ;;  %v162_v38 = vsel %vm49_vm0, %v136_v34, 0.0  ;;  %v186_v41 = vsel %vm49_vm0, %v144_v20, 0.0  ;;  %v1043_v34 = vld [vmem:[%s1259_s1] ss:$0 sm:$0xff] }
  0xb4   :  { %184 = vadd.xlane.f32.xlu1 %v183_v31  ;;  %163 = vadd.xlane.f32.xlu0 %v162_v38  ;;  %v73_v39 = vpop.xlane.xlu0 %72  ;;  %v97_v40 = vpop.xlane.xlu1 %96 }
  0xb5   :  { %v106_v42 = vmul.f32 0.03125, %v73_v39  ;;  %v114_v43 = vmul.f32 0.03125, %v97_v40  ;;  %v137_v46 = vmul.f32 %v1009_v35, %v1009_v35  ;;  %v145_v24 = vmul.f32 %v1012_v21, %v1012_v21 }
  0xb7   :  { %v1021_v47 = vsub.f32 %v936_v28, %v106_v42  ;;  %v1024_v25 = vsub.f32 %v938_v29, %v114_v43  ;;  %v165_v48 = vsel %vm49_vm0, %v137_v46, 0.0  ;;  %v189_v49 = vsel %vm49_vm0, %v145_v24, 0.0  ;;  %v742_v28 = vld [vmem:[%s1261_s3 + $0x8] sm:$0xff]   ;;  %v1049_v42 = vld [vmem:[%s1260_s2] ss:$0 sm:$0xff] }
  0xb8   :  { %187 = vadd.xlane.f32.xlu1 %v186_v41  ;;  %166 = vadd.xlane.f32.xlu0 %v165_v48  ;;  %v741_v53 = vunpack.c.h.bf16 %v742_v28  ;;  %v740_v56 = vunpack.c.l.bf16 %v742_v28 }
  0xb9   :  { %v138_v50 = vmul.f32 %v1021_v47, %v1021_v47  ;;  %v146_v51 = vmul.f32 %v1024_v25, %v1024_v25 }
  0xba   :  { %763 = vmatprep.subr.mxu0 %v741_v53  ;;  %795 = vmatprep.subr.mxu1 %v741_v53 }
  0xbb   :  { %v168_v52 = vsel %vm49_vm0, %v138_v50, 0.0  ;;  %v192_v29 = vsel %vm49_vm0, %v146_v51, 0.0  ;;  %764 = vmatpush3.msra.mxu0 %v741_v53  ;;  %799 = vmatpush3.msra.mxu1 %v741_v53 }
  0xbc   :  { %190 = vadd.xlane.f32.xlu1 %v189_v49  ;;  %169 = vadd.xlane.f32.xlu0 %v168_v52 }
  0xbd   :  { %765 = vmatprep.subr.mxu0 %v740_v56  ;;  %796 = vmatprep.subr.mxu1 %v740_v56 }
  0xbe   :  { %766 = vmatpush3.msra.mxu0 %v740_v56  ;;  %800 = vmatpush3.msra.mxu1 %v740_v56 }
  0xbf   :  { %767 = vmatprep.subr.mxu0 %v737_v58  ;;  %797 = vmatprep.subr.mxu1 %v737_v58 }
  0xc0   :  { %193 = vadd.xlane.f32.xlu1 %v192_v29  ;;  %768 = vmatpush3.msra.mxu0 %v737_v58 }
  0xc1   :  { %769 = vmatprep.subr.mxu0 %v736_v59  ;;  %801 = vmatpush3.msra.mxu1 %v737_v58 }
  0xc2   :  { %770 = vmatpush3.msra.mxu0 %v736_v59  ;;  %798 = vmatprep.subr.mxu1 %v736_v59 }
  0xc3   :  { %802 = vmatpush3.msra.mxu1 %v736_v59 }
 0x129   :  { %v149_v60 = vpop.xlane.xlu0 %148 }
 0x12a   :  { %v195_v61 = vmul.f32 0.03125, %v149_v60 }
 0x12c   :  { %v211_v62 = vadd.f32 1e-06, %v195_v61 }
 0x12d   :  { %v173_v63 = vpop.xlane.xlu1 %172  ;;  %v152_v2 = vpop.xlane.xlu0 %151 }
 0x12e   :  { %807 = vrsqrt.f32 %v211_v62  ;;  %v203_v3 = vmul.f32 0.03125, %v173_v63  ;;  %v196_v4 = vmul.f32 0.03125, %v152_v2 }
 0x130   :  { %v219_v5 = vadd.f32 1e-06, %v203_v3  ;;  %v212_v6 = vadd.f32 1e-06, %v196_v4 }
 0x131   :  { %v176_v7 = vpop.xlane.xlu1 %175  ;;  %v155_v8 = vpop.xlane.xlu0 %154 }
 0x132   :  { %809 = vrsqrt.f32 %v219_v5  ;;  %v204_v9 = vmul.f32 0.03125, %v176_v7  ;;  %v197_v12 = vmul.f32 0.03125, %v155_v8 }
 0x133   :  { %811 = vrsqrt.f32 %v212_v6 }
 0x134   :  { %v220_v13 = vadd.f32 1e-06, %v204_v9  ;;  %v213_v14 = vadd.f32 1e-06, %v197_v12 }
 0x135   :  { %v179_v15 = vpop.xlane.xlu1 %178  ;;  %v158_v18 = vpop.xlane.xlu0 %157 }
 0x136   :  { %813 = vrsqrt.f32 %v220_v13  ;;  %v205_v19 = vmul.f32 0.03125, %v179_v15  ;;  %v198_v22 = vmul.f32 0.03125, %v158_v18 }
 0x137   :  { %815 = vrsqrt.f32 %v213_v14 }
 0x138   :  { %v221_v16 = vadd.f32 1e-06, %v205_v19  ;;  %v214_v26 = vadd.f32 1e-06, %v198_v22 }
 0x139   :  { %v182_v27 = vpop.xlane.xlu1 %181  ;;  %v161_v30 = vpop.xlane.xlu0 %160 }
 0x13a   :  { %817 = vrsqrt.f32 %v221_v16  ;;  %v206_v31 = vmul.f32 0.03125, %v182_v27  ;;  %v199_v32 = vmul.f32 0.03125, %v161_v30 }
 0x13b   :  { %v808_v33 = vpop.eup %807  ;;  %819 = vrsqrt.f32 %v214_v26 }
 0x13c   :  { %v222_v20 = vadd.f32 1e-06, %v206_v31  ;;  %v215_v38 = vadd.f32 1e-06, %v199_v32  ;;  %v243_v39 = vmul.f32 %v808_v33, %v944_v36 }
 0x13d   :  { %v185_v40 = vpop.xlane.xlu1 %184  ;;  %v164_v41 = vpop.xlane.xlu0 %163 }
 0x13e   :  { %821 = vrsqrt.f32 %v222_v20  ;;  %v207_v43 = vmul.f32 0.03125, %v185_v40  ;;  %v200_v46 = vmul.f32 0.03125, %v164_v41  ;;  %v266_v24 = vmul.f32 %v1043_v34, %v243_v39 }
 0x13f   :  { %v810_v48 = vpop.eup %809  ;;  %823 = vrsqrt.f32 %v215_v38 }
 0x140   :  { %v812_v49 = vpop.eup %811  ;;  %v223_v50 = vadd.f32 1e-06, %v207_v43  ;;  %v216_v51 = vadd.f32 1e-06, %v200_v46  ;;  %v289_v52 = vadd.f32 %v1049_v42, %v266_v24  ;;  %v251_v36 = vmul.f32 %v810_v48, %v952_v44 }
 0x141   :  { %v188_v28 = vpop.xlane.xlu1 %187  ;;  %v167_v29 = vpop.xlane.xlu0 %166  ;;  %v244_v53 = vmul.f32 %v812_v49, %v946_v37 }
 0x142   :  { %825 = vrsqrt.f32 %v223_v50  ;;  %v208_v56 = vmul.f32 0.03125, %v188_v28  ;;  %v201_v57 = vmul.f32 0.03125, %v167_v29  ;;  %771 = vmatprep.mubr.msk.f32.mxu0 %vm49_vm0, %v289_v52  ;;  %v274_v58 = vmul.f32 %v1043_v34, %v251_v36 }
 0x143   :  { %v814_v59 = vpop.eup %813  ;;  %827 = vrsqrt.f32 %v216_v51  ;;  %v267_v60 = vmul.f32 %v1043_v34, %v244_v53 }
 0x144   :  { %v816_v61 = vpop.eup %815  ;;  %v224_v62 = vadd.f32 1e-06, %v208_v56  ;;  %v217_v63 = vadd.f32 1e-06, %v201_v57  ;;  %v297_v44 = vadd.f32 %v1049_v42, %v274_v58  ;;  %v252_v2 = vmul.f32 %v814_v59, %v954_v45 }
 0x145   :  { %v191_v3 = vpop.xlane.xlu1 %190  ;;  %v170_v37 = vpop.xlane.xlu0 %169  ;;  %v290_v4 = vadd.f32 %v1049_v42, %v267_v60  ;;  %v245_v5 = vmul.f32 %v816_v61, %v962_v54 }
 0x146   :  { %829 = vrsqrt.f32 %v224_v62  ;;  %v209_v6 = vmul.f32 0.03125, %v191_v3  ;;  %v202_v7 = vmul.f32 0.03125, %v170_v37  ;;  %783 = vmatprep.mubr.msk.f32.mxu1 %vm49_vm0, %v297_v44  ;;  %v275_v8 = vmul.f32 %v1043_v34, %v252_v2 }
 0x147   :  { %v818_v9 = vpop.eup %817  ;;  %831 = vrsqrt.f32 %v217_v63  ;;  %772 = vmatmul.mubr.msk.f32.vlgmr.msra.gmra.mxu0 %vm49_vm0, %v290_v4  ;;  %v268_v12 = vmul.f32 %v1043_v34, %v245_v5 }
 0x148   :  { %v820_v45 = vpop.eup %819  ;;  %v225_v13 = vadd.f32 1e-06, %v209_v6  ;;  %v218_v14 = vadd.f32 1e-06, %v202_v7  ;;  %v298_v15 = vadd.f32 %v1049_v42, %v275_v8  ;;  %v253_v54 = vmul.f32 %v818_v9, %v964_v55 }
 0x149   :  { %v194_v18 = vpop.xlane.xlu1 %193  ;;  %v291_v19 = vadd.f32 %v1049_v42, %v268_v12  ;;  %v246_v22 = vmul.f32 %v820_v45, %v973_v0 }
 0x14a   :  { %833 = vrsqrt.f32 %v225_v13  ;;  %v210_v16 = vmul.f32 0.03125, %v194_v18  ;;  %784 = vmatmul.mubr.msk.f32.vlgmr.msra.gmra.mxu1 %vm49_vm0, %v298_v15  ;;  %v276_v26 = vmul.f32 %v1043_v34, %v253_v54 }
 0x14b   :  { %v822_v27 = vpop.eup %821  ;;  %835 = vrsqrt.f32 %v218_v14  ;;  %774 = vmatprep.mubr.msk.f32.mxu0 %vm49_vm0, %v291_v19  ;;  %v269_v30 = vmul.f32 %v1043_v34, %v246_v22 }
 0x14c   :  { %v824_v31 = vpop.eup %823  ;;  %v226_v32 = vadd.f32 1e-06, %v210_v16  ;;  %v299_v55 = vadd.f32 %v1049_v42, %v276_v26  ;;  %v254_v33 = vmul.f32 %v822_v27, %v976_v1 }
 0x14d   :  { %v292_v0 = vadd.f32 %v1049_v42, %v269_v30  ;;  %v247_v20 = vmul.f32 %v824_v31, %v985_v10 }
 0x14e   :  { %837 = vrsqrt.f32 %v226_v32  ;;  %786 = vmatprep.mubr.msk.f32.mxu1 %vm49_vm0, %v299_v55  ;;  %v277_v38 = vmul.f32 %v1043_v34, %v254_v33 }
 0x14f   :  { %v826_v39 = vpop.eup %825  ;;  %775 = vmatmul.mubr.msk.f32.gmra.mxu0 %vm49_vm0, %v292_v0  ;;  %v270_v40 = vmul.f32 %v1043_v34, %v247_v20 }
 0x150   :  { %v828_v41 = vpop.eup %827  ;;  %v300_v43 = vadd.f32 %v1049_v42, %v277_v38  ;;  %v255_v46 = vmul.f32 %v826_v39, %v988_v11 }
 0x151   :  { %v293_v1 = vadd.f32 %v1049_v42, %v270_v40  ;;  %v248_v24 = vmul.f32 %v828_v41, %v997_v23 }
 0x152   :  { %787 = vmatmul.mubr.msk.f32.gmra.mxu1 %vm49_vm0, %v300_v43  ;;  %v278_v10 = vmul.f32 %v1043_v34, %v255_v46 }
 0x153   :  { %v830_v48 = vpop.eup %829  ;;  %777 = vmatprep.mubr.msk.f32.mxu0 %vm49_vm0, %v293_v1  ;;  %v271_v49 = vmul.f32 %v1043_v34, %v248_v24 }
 0x154   :  { %v832_v50 = vpop.eup %831  ;;  %v301_v51 = vadd.f32 %v1049_v42, %v278_v10  ;;  %v256_v52 = vmul.f32 %v830_v48, %v1000_v17 }
 0x155   :  { %v294_v11 = vadd.f32 %v1049_v42, %v271_v49  ;;  %v249_v36 = vmul.f32 %v832_v50, %v1009_v35 }
 0x156   :  { %789 = vmatprep.mubr.msk.f32.mxu1 %vm49_vm0, %v301_v51  ;;  %v279_v23 = vmul.f32 %v1043_v34, %v256_v52 }
 0x157   :  { %v834_v28 = vpop.eup %833  ;;  %778 = vmatmul.mubr.msk.f32.gmra.mxu0 %vm49_vm0, %v294_v11  ;;  %v272_v29 = vmul.f32 %v1043_v34, %v249_v36 }
 0x158   :  { %v836_v53 = vpop.eup %835  ;;  %v302_v56 = vadd.f32 %v1049_v42, %v279_v23  ;;  %v257_v57 = vmul.f32 %v834_v28, %v1012_v21 }
 0x159   :  { %v295_v17 = vadd.f32 %v1049_v42, %v272_v29  ;;  %v250_v58 = vmul.f32 %v836_v53, %v1021_v47 }
 0x15a   :  { %790 = vmatmul.mubr.msk.f32.gmra.mxu1 %vm49_vm0, %v302_v56  ;;  %v280_v35 = vmul.f32 %v1043_v34, %v257_v57 }
 0x15b   :  { %v838_v59 = vpop.eup %837  ;;  %780 = vmatprep.mubr.msk.f32.mxu0 %vm49_vm0, %v295_v17  ;;  %v273_v60 = vmul.f32 %v1043_v34, %v250_v58 }
 0x15c   :  { %v303_v61 = vadd.f32 %v1049_v42, %v280_v35  ;;  %v258_v62 = vmul.f32 %v838_v59, %v1024_v25 }
 0x15d   :  { %v296_v63 = vadd.f32 %v1049_v42, %v273_v60 }
 0x15e   :  { %792 = vmatprep.mubr.msk.f32.mxu1 %vm49_vm0, %v303_v61  ;;  %v281_v21 = vmul.f32 %v1043_v34, %v258_v62 }
 0x15f   :  { %781 = vmatmul.mubr.msk.f32.gmra.mxu0 %vm49_vm0, %v296_v63 }
 0x160   :  { %v304_v47 = vadd.f32 %v1049_v42, %v281_v21 }
 0x162   :  { %793 = vmatmul.mubr.msk.f32.gmra.mxu1 %vm49_vm0, %v304_v47 }
 0x207   :  { %v773_v44 = vpop.f32.mrf.mxu0 }
 0x208   :  { %v719_v2 = vpack.c.bf16 %v773_v44, %v773_v44 }
 0x209   :  { %v451_v3 = vpop.f32.mrf.mxu0 }
 0x20a   :  { %596 = vst.msk [vmem:[%s1262_s4 + $0x4] sm:$0xf] %vm594_vm1, %v719_v2  ;;  %v718_v25 = vpack.c.bf16 %v451_v3, %v451_v3  ;;  %613 = vrot.lane.b32.xlu1 %v719_v2, %s864_s6  ;;  %v785_v34 = vpop.f32.mrf.mxu1 }
 0x20b   :  { %v727_v37 = vpack.c.bf16 %v785_v34, %v785_v34 }
 0x20c   :  { %595 = vst.msk [vmem:[%s1262_s4] sm:$0xf] %vm594_vm1, %v718_v25  ;;  %611 = vrot.lane.b32.xlu0 %v718_v25, %s864_s6  ;;  %v491_v42 = vpop.f32.mrf.mxu1 }
 0x20d   :  { %604 = vst.msk [vmem:[%s1262_s4 + $0x24] sm:$0xf] %vm594_vm1, %v727_v37  ;;  %v726_v4 = vpack.c.bf16 %v491_v42, %v491_v42 }
 0x20e   :  { %629 = vrot.lane.b32.xlu1 %v727_v37, %s864_s6 }
 0x20f   :  { %603 = vst.msk [vmem:[%s1262_s4 + $0x20] sm:$0xf] %vm594_vm1, %v726_v4  ;;  %v776_v5 = vpop.f32.mrf.mxu0 }
 0x210   :  { %v721_v6 = vpack.c.bf16 %v776_v5, %v776_v5  ;;  %627 = vrot.lane.b32.xlu0 %v726_v4, %s864_s6 }
 0x211   :  { %v461_v7 = vpop.f32.mrf.mxu0 }
 0x212   :  { %598 = vst.msk [vmem:[%s1262_s4 + $0xc] sm:$0xf] %vm594_vm1, %v721_v6  ;;  %v720_v8 = vpack.c.bf16 %v461_v7, %v461_v7  ;;  %617 = vrot.lane.b32.xlu1 %v721_v6, %s864_s6  ;;  %v788_v9 = vpop.f32.mrf.mxu1 }
 0x213   :  { %v729_v12 = vpack.c.bf16 %v788_v9, %v788_v9 }
 0x214   :  { %597 = vst.msk [vmem:[%s1262_s4 + $0x8] sm:$0xf] %vm594_vm1, %v720_v8  ;;  %v501_v45 = vpop.f32.mrf.mxu1 }
 0x215   :  { %606 = vst.msk [vmem:[%s1262_s4 + $0x2c] sm:$0xf] %vm594_vm1, %v729_v12  ;;  %v728_v13 = vpack.c.bf16 %v501_v45, %v501_v45 }
 0x216   :  { %633 = vrot.lane.b32.xlu1 %v729_v12, %s864_s6 }
 0x217   :  { %605 = vst.msk [vmem:[%s1262_s4 + $0x28] sm:$0xf] %vm594_vm1, %v728_v13  ;;  %v779_v14 = vpop.f32.mrf.mxu0  ;;  %631 = vrot.lane.b32.xlu0 %v728_v13, %s864_s6 }
 0x218   :  { %v723_v15 = vpack.c.bf16 %v779_v14, %v779_v14 }
 0x219   :  { %v471_v54 = vpop.f32.mrf.mxu0 }
 0x21a   :  { %600 = vst.msk [vmem:[%s1262_s4 + $0x14] sm:$0xf] %vm594_vm1, %v723_v15  ;;  %v722_v18 = vpack.c.bf16 %v471_v54, %v471_v54  ;;  %615 = vrot.lane.b32.xlu1 %v720_v8, %s864_s6  ;;  %v791_v19 = vpop.f32.mrf.mxu1 }
 0x21b   :  { %v731_v22 = vpack.c.bf16 %v791_v19, %v791_v19 }
 0x21c   :  { %599 = vst.msk [vmem:[%s1262_s4 + $0x10] sm:$0xf] %vm594_vm1, %v722_v18  ;;  %619 = vrot.lane.b32.xlu0 %v722_v18, %s864_s6  ;;  %v511_v16 = vpop.f32.mrf.mxu1 }
 0x21d   :  { %608 = vst.msk [vmem:[%s1262_s4 + $0x34] sm:$0xf] %vm594_vm1, %v731_v22  ;;  %v730_v26 = vpack.c.bf16 %v511_v16, %v511_v16 }
 0x21e   :  { %621 = vrot.lane.b32.xlu1 %v723_v15, %s864_s6 }
 0x21f   :  { %607 = vst.msk [vmem:[%s1262_s4 + $0x30] sm:$0xf] %vm594_vm1, %v730_v26  ;;  %v782_v27 = vpop.f32.mrf.mxu0 }
 0x220   :  { %v725_v30 = vpack.c.bf16 %v782_v27, %v782_v27  ;;  %635 = vrot.lane.b32.xlu0 %v730_v26, %s864_s6 }
 0x221   :  { %v481_v31 = vpop.f32.mrf.mxu0 }
 0x222   :  { %602 = vst.msk [vmem:[%s1262_s4 + $0x1c] sm:$0xf] %vm594_vm1, %v725_v30  ;;  %v724_v32 = vpack.c.bf16 %v481_v31, %v481_v31  ;;  %637 = vrot.lane.b32.xlu1 %v731_v22, %s864_s6  ;;  %v794_v55 = vpop.f32.mrf.mxu1 }
 0x223   :  { %v733_v33 = vpack.c.bf16 %v794_v55, %v794_v55 }
 0x224   :  { %601 = vst.msk [vmem:[%s1262_s4 + $0x18] sm:$0xf] %vm594_vm1, %v724_v32  ;;  %623 = vrot.lane.b32.xlu0 %v724_v32, %s864_s6  ;;  %v521_v0 = vpop.f32.mrf.mxu1 }
 0x225   :  { %610 = vst.msk [vmem:[%s1262_s4 + $0x3c] sm:$0xf] %vm594_vm1, %v733_v33  ;;  %v732_v20 = vpack.c.bf16 %v521_v0, %v521_v0 }
 0x226   :  { %625 = vrot.lane.b32.xlu1 %v725_v30, %s864_s6 }
 0x227   :  { %609 = vst.msk [vmem:[%s1262_s4 + $0x38] sm:$0xf] %vm594_vm1, %v732_v20 }
 0x228   :  { %639 = vrot.lane.b32.xlu0 %v732_v20, %s864_s6 }
 0x22a   :  { %641 = vrot.lane.b32.xlu1 %v733_v33, %s864_s6 }
 0x27c   :  { %v614_v38 = vpop.permute.xlu1 %613 }
 0x27d   :  { %660 = vst.msk [vmem:[%s1263_s5 + $0x4] sm:$0xf] %vm594_vm1, %v614_v38 }
 0x27e   :  { %v612_v39 = vpop.permute.xlu0 %611 }
 0x27f   :  { %659 = vst.msk [vmem:[%s1263_s5] sm:$0xf] %vm594_vm1, %v612_v39 }
 0x280   :  { %v630_v40 = vpop.permute.xlu1 %629 }
 0x281   :  { %668 = vst.msk [vmem:[%s1263_s5 + $0x24] sm:$0xf] %vm594_vm1, %v630_v40 }
 0x282   :  { %v628_v41 = vpop.permute.xlu0 %627 }
 0x283   :  { %667 = vst.msk [vmem:[%s1263_s5 + $0x20] sm:$0xf] %vm594_vm1, %v628_v41 }
 0x284   :  { %v618_v43 = vpop.permute.xlu1 %617 }
 0x285   :  { %662 = vst.msk [vmem:[%s1263_s5 + $0xc] sm:$0xf] %vm594_vm1, %v618_v43 }
 0x288   :  { %v634_v46 = vpop.permute.xlu1 %633 }
 0x289   :  { %670 = vst.msk [vmem:[%s1263_s5 + $0x2c] sm:$0xf] %vm594_vm1, %v634_v46  ;;  %v632_v1 = vpop.permute.xlu0 %631 }
 0x28a   :  { %669 = vst.msk [vmem:[%s1263_s5 + $0x28] sm:$0xf] %vm594_vm1, %v632_v1 }
 0x28c   :  { %v616_v24 = vpop.permute.xlu1 %615 }
 0x28d   :  { %661 = vst.msk [vmem:[%s1263_s5 + $0x8] sm:$0xf] %vm594_vm1, %v616_v24 }
 0x28e   :  { %v620_v10 = vpop.permute.xlu0 %619 }
 0x28f   :  { %663 = vst.msk [vmem:[%s1263_s5 + $0x10] sm:$0xf] %vm594_vm1, %v620_v10 }
 0x290   :  { %v622_v48 = vpop.permute.xlu1 %621 }
 0x291   :  { %664 = vst.msk [vmem:[%s1263_s5 + $0x14] sm:$0xf] %vm594_vm1, %v622_v48 }
 0x292   :  { %v636_v49 = vpop.permute.xlu0 %635 }
 0x293   :  { %671 = vst.msk [vmem:[%s1263_s5 + $0x30] sm:$0xf] %vm594_vm1, %v636_v49 }
 0x294   :  { %v638_v50 = vpop.permute.xlu1 %637 }
 0x295   :  { %672 = vst.msk [vmem:[%s1263_s5 + $0x34] sm:$0xf] %vm594_vm1, %v638_v50 }
 0x296   :  { %v624_v51 = vpop.permute.xlu0 %623 }
 0x297   :  { %665 = vst.msk [vmem:[%s1263_s5 + $0x18] sm:$0xf] %vm594_vm1, %v624_v51 }
 0x298   :  { %v626_v52 = vpop.permute.xlu1 %625 }
 0x299   :  { %666 = vst.msk [vmem:[%s1263_s5 + $0x1c] sm:$0xf] %vm594_vm1, %v626_v52 }
 0x29a   :  { %v640_v11 = vpop.permute.xlu0 %639 }
 0x29b   :  { %673 = vst.msk [vmem:[%s1263_s5 + $0x38] sm:$0xf] %vm594_vm1, %v640_v11 }
 0x29c   :  { %v642_v36 = vpop.permute.xlu1 %641 }
 0x29d   :  { %674 = vst.msk [vmem:[%s1263_s5 + $0x3c] sm:$0xf] %vm594_vm1, %v642_v36 }
 0x29e   :  { %683 = vsyncpa [#allocation3], 1 }

// kernel: vss_block_forward.7
= control target key start
LH: loop header
LB: loop body
LE: loop exit
PB: predicated region body
PF: predicated region fallthrough
CT: control target
= control target key end

     0   :  { %vm107_vm0 = vcmask 523264   ;;  %s1863_s0 = inlined_call_operand.vmem [shape: bf16[128,64], index: 0, kind: input, shape index: {}]   ;;  %s1864_s1 = inlined_call_operand.vmem [shape: bf16[128,64], index: 1, kind: input, shape index: {}]   ;;  %s1865_s2 = inlined_call_operand.vmem [shape: bf16[128,64], index: 2, kind: input, shape index: {}]   ;;  %s1866_s3 = inlined_call_operand.vmem [shape: f32[128,32], index: 3, kind: input, shape index: {}]   ;;  %s1867_s4 = inlined_call_operand.vmem [shape: f32[1,64], index: 4, kind: input, shape index: {}]   ;;  %s1868_s5 = inlined_call_operand.vmem [shape: f32[1,64], index: 5, kind: input, shape index: {}]   ;;  %s1869_s6 = inlined_call_operand.vmem [shape: bf16[64,32], index: 6, kind: input, shape index: {}]   ;;  %s1870_s7 = inlined_call_operand.hbm [shape: f32[128,32], index: 7, kind: output, shape index: {}]  }
   0x1   :  { %v904_v0 = vld [vmem:[%s1863_s0] sm:$0xff]   ;;  %v1015_v8 = vld [vmem:[%s1863_s0 + $0x8] sm:$0xff]  }
   0x2   :  { %v936_v1 = vld [vmem:[%s1864_s1] sm:$0xff]   ;;  %v905_v3 = vunpack.c.l.bf16 %v904_v0  ;;  %v906_v5 = vunpack.c.h.bf16 %v904_v0  ;;  %v1022_v9 = vld [vmem:[%s1864_s1 + $0x8] sm:$0xff]   ;;  %v909_v18 = vunpack.c.l.bf16 %v1015_v8 }
   0x3   :  { %v1018_v2 = vld [vmem:[%s1863_s0 + $0x20] sm:$0xff]   ;;  %v937_v4 = vunpack.c.l.bf16 %v936_v1  ;;  %v938_v6 = vunpack.c.h.bf16 %v936_v1  ;;  %v1019_v14 = vld [vmem:[%s1863_s0 + $0x28] sm:$0xff]   ;;  %v941_v19 = vunpack.c.l.bf16 %v1022_v9 }
   0x4   :  { %v1025_v7 = vld [vmem:[%s1864_s1 + $0x20] sm:$0xff]   ;;  %v921_v10 = vunpack.c.l.bf16 %v1018_v2  ;;  %v922_v12 = vunpack.c.h.bf16 %v1018_v2  ;;  %v1026_v15 = vld [vmem:[%s1864_s1 + $0x28] sm:$0xff]   ;;  %v925_v22 = vunpack.c.l.bf16 %v1019_v14 }
   0x5   :  { %v953_v11 = vunpack.c.l.bf16 %v1025_v7  ;;  %v954_v13 = vunpack.c.h.bf16 %v1025_v7  ;;  %v1307_v16 = vadd.f32 %v937_v4, %v905_v3  ;;  %v1309_v17 = vadd.f32 %v938_v6, %v906_v5 }
   0x6   :  { %v957_v23 = vunpack.c.l.bf16 %v1026_v15 }
   0x7   :  { %v1311_v20 = vadd.f32 %v953_v11, %v921_v10  ;;  %v1313_v21 = vadd.f32 %v954_v13, %v922_v12  ;;  %v108_v24 = vsel %vm107_vm0, %v1307_v16, 0.0  ;;  %v111_v25 = vsel %vm107_vm0, %v1309_v17, 0.0 }
   0x8   :  { %12 = vsyncpa [#allocation3], 0  ;;  %109 = vadd.xlane.f32.xlu0 %v108_v24  ;;  %112 = vadd.xlane.f32.xlu1 %v111_v25  ;;  %v1319_v26 = vadd.f32 %v941_v19, %v909_v18  ;;  %v1321_v27 = vadd.f32 %v957_v23, %v925_v22  ;;  %v910_v28 = vunpack.c.h.bf16 %v1015_v8  ;;  %v942_v29 = vunpack.c.h.bf16 %v1022_v9  ;;  %v1016_v34 = vld [vmem:[%s1863_s0 + $0x10] sm:$0xff]   ;;  %v1017_v54 = vld [vmem:[%s1863_s0 + $0x18] sm:$0xff]   ;;  %s1240_s10 = smov [#allocation2]  }
   0x9   :  { %v132_v30 = vsel %vm107_vm0, %v1311_v20, 0.0  ;;  %v135_v31 = vsel %vm107_vm0, %v1313_v21, 0.0  ;;  %v926_v32 = vunpack.c.h.bf16 %v1019_v14  ;;  %v958_v33 = vunpack.c.h.bf16 %v1026_v15  ;;  %v1023_v35 = vld [vmem:[%s1864_s1 + $0x10] sm:$0xff]   ;;  %v1024_v55 = vld [vmem:[%s1864_s1 + $0x18] sm:$0xff]   ;;  %s874_s11 = sshll.u32 %s1240_s10, 4  ;;  %s875_s11 = int_to_ptr.vmem [resolvable:$true] %s874_s11 }
   0xa   :  { %v1020_v36 = vld [vmem:[%s1863_s0 + $0x30] sm:$0xff]   ;;  %v114_v38 = vsel %vm107_vm0, %v1319_v26, 0.0  ;;  %v138_v39 = vsel %vm107_vm0, %v1321_v27, 0.0  ;;  %v1343_v40 = vadd.f32 %v942_v29, %v910_v28  ;;  %v913_v41 = vunpack.c.l.bf16 %v1016_v34  ;;  %v1021_v56 = vld [vmem:[%s1863_s0 + $0x38] sm:$0xff]   ;;  %s1218_s12 = scalar_lea.vmem %s875_s11, 2048  ;;  %p1223_p1 = scmp.lt.s32.totalorder %s875_s11, %s875_s11 }
   0xb   :  { %v1027_v37 = vld [vmem:[%s1864_s1 + $0x30] sm:$0xff]   ;;  %v1345_v42 = vadd.f32 %v958_v33, %v926_v32  ;;  %v945_v43 = vunpack.c.l.bf16 %v1023_v35  ;;  %v929_v44 = vunpack.c.l.bf16 %v1020_v36  ;;  %v914_v46 = vunpack.c.h.bf16 %v1016_v34  ;;  %v1028_v57 = vld [vmem:[%s1864_s1 + $0x38] sm:$0xff]   ;;  %p1219_p0 = scmp.ne.s32.totalorder %s875_s11, %s1218_s12  ;;  %p1224_p2 = scmp.lt.s32.totalorder %s1218_s12, %s1218_s12 }
   0xc   :  { %133 = vadd.xlane.f32.xlu0 %v132_v30  ;;  %136 = vadd.xlane.f32.xlu1 %v135_v31  ;;  %v961_v45 = vunpack.c.l.bf16 %v1027_v37  ;;  %v946_v47 = vunpack.c.h.bf16 %v1023_v35  ;;  %v930_v48 = vunpack.c.h.bf16 %v1020_v36  ;;  %v962_v49 = vunpack.c.h.bf16 %v1027_v37 }
   0xd   :  { %v117_v50 = vsel %vm107_vm0, %v1343_v40, 0.0  ;;  %v141_v51 = vsel %vm107_vm0, %v1345_v42, 0.0  ;;  %v1351_v52 = vadd.f32 %v945_v43, %v913_v41  ;;  %v917_v60 = vunpack.c.l.bf16 %v1017_v54  ;;  %p1225_p3 = por %p1224_p2, %p1223_p1 }
   0xe   :  { %v1353_v53 = vadd.f32 %v961_v45, %v929_v44  ;;  %v1367_v58 = vadd.f32 %v946_v47, %v914_v46  ;;  %v1369_v59 = vadd.f32 %v962_v49, %v930_v48  ;;  %v949_v61 = vunpack.c.l.bf16 %v1024_v55 }
   0xf   :  { %v120_v62 = vsel %vm107_vm0, %v1351_v52, 0.0  ;;  %v933_v0 = vunpack.c.l.bf16 %v1021_v56  ;;  %v965_v1 = vunpack.c.l.bf16 %v1028_v57  ;;  %v918_v5 = vunpack.c.h.bf16 %v1017_v54  ;;  %p1226_p4 = pnand %p1225_p3, %p1219_p0 }
  0x10   :  { %115 = vadd.xlane.f32.xlu0 %v114_v38  ;;  %139 = vadd.xlane.f32.xlu1 %v138_v39  ;;  %v144_v63 = vsel %vm107_vm0, %v1353_v53, 0.0  ;;  %v123_v2 = vsel %vm107_vm0, %v1367_v58, 0.0  ;;  %v147_v3 = vsel %vm107_vm0, %v1369_v59, 0.0  ;;  %v1379_v4 = vadd.f32 %v949_v61, %v917_v60 }
  0x11   :  { %v1381_v6 = vadd.f32 %v965_v1, %v933_v0  ;;  %v950_v7 = vunpack.c.h.bf16 %v1024_v55  ;;  %v934_v8 = vunpack.c.h.bf16 %v1021_v56  ;;  %v966_v9 = vunpack.c.h.bf16 %v1028_v57 }
  0x12   :  { %v126_v10 = vsel %vm107_vm0, %v1379_v4, 0.0 }
  0x13   :  { %v150_v11 = vsel %vm107_vm0, %v1381_v6, 0.0  ;;  %v1387_v12 = vadd.f32 %v950_v7, %v918_v5  ;;  %v1389_v13 = vadd.f32 %v966_v9, %v934_v8 }
  0x14   :  { %118 = vadd.xlane.f32.xlu0 %v117_v50  ;;  %142 = vadd.xlane.f32.xlu1 %v141_v51 }
  0x15   :  { %v129_v14 = vsel %vm107_vm0, %v1387_v12, 0.0  ;;  %v153_v15 = vsel %vm107_vm0, %v1389_v13, 0.0 }
  0x18   :  { %121 = vadd.xlane.f32.xlu0 %v120_v62  ;;  %145 = vadd.xlane.f32.xlu1 %v144_v63 }
  0x1c   :  { %124 = vadd.xlane.f32.xlu0 %v123_v2  ;;  %148 = vadd.xlane.f32.xlu1 %v147_v3 }
  0x20   :  { %127 = vadd.xlane.f32.xlu0 %v126_v10  ;;  %151 = vadd.xlane.f32.xlu1 %v150_v11 }
  0x24   :  { %130 = vadd.xlane.f32.xlu0 %v129_v14  ;;  %154 = vadd.xlane.f32.xlu1 %v153_v15 }
  0x91   :  { %v110_v18 = vpop.xlane.xlu0 %109  ;;  %v113_v19 = vpop.xlane.xlu1 %112 }
  0x92   :  { %v157_v22 = vmul.f32 0.015625, %v110_v18  ;;  %v158_v23 = vmul.f32 0.015625, %v113_v19 }
  0x94   :  { %v1396_v24 = vsub.f32 %v1307_v16, %v157_v22  ;;  %v1399_v25 = vsub.f32 %v1309_v17, %v158_v23 }
  0x95   :  { %v134_v28 = vpop.xlane.xlu0 %133  ;;  %v137_v29 = vpop.xlane.xlu1 %136 }
  0x96   :  { %v165_v30 = vmul.f32 0.015625, %v134_v28  ;;  %v166_v31 = vmul.f32 0.015625, %v137_v29  ;;  %v189_v32 = vmul.f32 %v1396_v24, %v1396_v24  ;;  %v190_v33 = vmul.f32 %v1399_v25, %v1399_v25 }
  0x98   :  { %v1406_v34 = vsub.f32 %v1311_v20, %v165_v30  ;;  %v1409_v35 = vsub.f32 %v1313_v21, %v166_v31  ;;  %v205_v16 = vsel %vm107_vm0, %v189_v32, 0.0  ;;  %v208_v37 = vsel %vm107_vm0, %v190_v33, 0.0 }
  0x99   :  { %206 = vadd.xlane.f32.xlu0 %v205_v16  ;;  %v116_v17 = vpop.xlane.xlu0 %115  ;;  %v140_v36 = vpop.xlane.xlu1 %139 }
  0x9a   :  { %v159_v38 = vmul.f32 0.015625, %v116_v17  ;;  %v167_v39 = vmul.f32 0.015625, %v140_v36  ;;  %v197_v41 = vmul.f32 %v1406_v34, %v1406_v34  ;;  %v198_v43 = vmul.f32 %v1409_v35, %v1409_v35 }
  0x9c   :  { %v1418_v20 = vsub.f32 %v1319_v26, %v159_v38  ;;  %v1421_v21 = vsub.f32 %v1321_v27, %v167_v39  ;;  %v229_v44 = vsel %vm107_vm0, %v197_v41, 0.0  ;;  %v232_v47 = vsel %vm107_vm0, %v198_v43, 0.0 }
  0x9d   :  { %209 = vadd.xlane.f32.xlu0 %v208_v37  ;;  %230 = vadd.xlane.f32.xlu1 %v229_v44  ;;  %v119_v45 = vpop.xlane.xlu0 %118  ;;  %v143_v46 = vpop.xlane.xlu1 %142 }
  0x9e   :  { %v160_v48 = vmul.f32 0.015625, %v119_v45  ;;  %v168_v49 = vmul.f32 0.015625, %v143_v46  ;;  %v191_v50 = vmul.f32 %v1418_v20, %v1418_v20  ;;  %v199_v26 = vmul.f32 %v1421_v21, %v1421_v21 }
  0xa0   :  { %v1430_v51 = vsub.f32 %v1343_v40, %v160_v48  ;;  %v1433_v27 = vsub.f32 %v1345_v42, %v168_v49  ;;  %v211_v54 = vsel %vm107_vm0, %v191_v50, 0.0  ;;  %v235_v57 = vsel %vm107_vm0, %v199_v26, 0.0  ;;  %v1036_v48 = vld [vmem:[%s1869_s6 + $0x8] sm:$0xff]   ;;  %v1000_v26 = vld [vmem:[%s1869_s6] sm:$0xff]  }
  0xa1   :  { %233 = vadd.xlane.f32.xlu1 %v232_v47  ;;  %212 = vadd.xlane.f32.xlu0 %v211_v54  ;;  %v122_v55 = vpop.xlane.xlu0 %121  ;;  %v146_v56 = vpop.xlane.xlu1 %145  ;;  %v1006_v49 = vunpack.c.h.bf16 %v1036_v48  ;;  %v1005_v50 = vunpack.c.l.bf16 %v1036_v48  ;;  %v1002_v54 = vunpack.c.h.bf16 %v1000_v26 }
  0xa2   :  { %v161_v60 = vmul.f32 0.015625, %v122_v55  ;;  %v169_v61 = vmul.f32 0.015625, %v146_v56  ;;  %v192_v62 = vmul.f32 %v1430_v51, %v1430_v51  ;;  %v200_v40 = vmul.f32 %v1433_v27, %v1433_v27  ;;  %v968_v56 = vld [vmem:[%s1865_s2] sm:$0xff]  }
  0xa3   :  { %v1001_v55 = vunpack.c.l.bf16 %v1000_v26 }
  0xa4   :  { %v1442_v63 = vsub.f32 %v1351_v52, %v161_v60  ;;  %v1445_v42 = vsub.f32 %v1353_v53, %v169_v61  ;;  %v214_v0 = vsel %vm107_vm0, %v192_v62, 0.0  ;;  %v238_v3 = vsel %vm107_vm0, %v200_v40, 0.0  ;;  %v1032_v61 = vld [vmem:[%s1865_s2 + $0x20] sm:$0xff]  }
  0xa5   :  { %236 = vadd.xlane.f32.xlu1 %v235_v57  ;;  %215 = vadd.xlane.f32.xlu0 %v214_v0  ;;  %v125_v1 = vpop.xlane.xlu0 %124  ;;  %v149_v2 = vpop.xlane.xlu1 %148  ;;  %v1506_v57 = vunpack.c.l.bf16 %v968_v56  ;;  %v1508_v60 = vunpack.c.h.bf16 %v968_v56  ;;  %v1515_v0 = vunpack.c.l.bf16 %v1032_v61 }
  0xa6   :  { %v162_v5 = vmul.f32 0.015625, %v125_v1  ;;  %v170_v7 = vmul.f32 0.015625, %v149_v2  ;;  %v193_v8 = vmul.f32 %v1442_v63, %v1442_v63  ;;  %v201_v52 = vmul.f32 %v1445_v42, %v1445_v42  ;;  %v1029_v1 = vld [vmem:[%s1865_s2 + $0x8] sm:$0xff]  }
  0xa7   :  { %v395_v62 = vand.u32 2147483647, %v1506_v57  ;;  %v396_v40 = vand.u32 2147483647, %v1508_v60  ;;  %v1520_v2 = vunpack.c.h.bf16 %v1032_v61  ;;  %vm459_vm1 = vcmp.ge.f32.partialorder %v1506_v57, 0.0 }
  0xa8   :  { %v1454_v9 = vsub.f32 %v1367_v58, %v162_v5  ;;  %v1457_v53 = vsub.f32 %v1369_v59, %v170_v7  ;;  %v217_v10 = vsel %vm107_vm0, %v193_v8, 0.0  ;;  %v241_v15 = vsel %vm107_vm0, %v201_v52, 0.0 }
  0xa9   :  { %239 = vadd.xlane.f32.xlu1 %v238_v3  ;;  %218 = vadd.xlane.f32.xlu0 %v217_v10  ;;  %v128_v11 = vpop.xlane.xlu0 %127  ;;  %v152_v14 = vpop.xlane.xlu1 %151  ;;  %v411_v3 = vsub.f32 0.0, %v395_v62  ;;  %v1522_v5 = vunpack.c.l.bf16 %v1029_v1  ;;  %v412_v7 = vsub.f32 0.0, %v396_v40  ;;  %v403_v8 = vand.u32 2147483647, %v1515_v0 }
  0xaa   :  { %v163_v18 = vmul.f32 0.015625, %v128_v11  ;;  %v171_v19 = vmul.f32 0.015625, %v152_v14  ;;  %v194_v22 = vmul.f32 %v1454_v9, %v1454_v9  ;;  %v202_v58 = vmul.f32 %v1457_v53, %v1457_v53  ;;  %v1033_v11 = vld [vmem:[%s1865_s2 + $0x28] sm:$0xff]  }
  0xab   :  { %v1525_v52 = vunpack.c.h.bf16 %v1029_v1  ;;  %v404_v10 = vand.u32 2147483647, %v1520_v2  ;;  %v427_v14 = vmul.f32 1.442695, %v411_v3  ;;  %vm460_vm2 = vcmp.ge.f32.partialorder %v1508_v60, 0.0 }
  0xac   :  { %v1466_v23 = vsub.f32 %v1379_v4, %v163_v18  ;;  %v1469_v59 = vsub.f32 %v1381_v6, %v171_v19  ;;  %v220_v28 = vsel %vm107_vm0, %v194_v22, 0.0  ;;  %v244_v31 = vsel %vm107_vm0, %v202_v58, 0.0  ;;  %v1038_v6 = vld [vmem:[%s1869_s6 + $0x18] sm:$0xff]  }
  0xad   :  { %242 = vadd.xlane.f32.xlu1 %v241_v15  ;;  %221 = vadd.xlane.f32.xlu0 %v220_v28  ;;  %v131_v29 = vpop.xlane.xlu0 %130  ;;  %v155_v30 = vpop.xlane.xlu1 %154  ;;  %v1014_v38 = vunpack.c.h.bf16 %v1038_v6  ;;  %v1013_v44 = vunpack.c.l.bf16 %v1038_v6  ;;  %v397_v15 = vand.u32 2147483647, %v1522_v5  ;;  %v429_v18 = vmul.f32 1.442695, %v412_v7 }
  0xae   :  { %v164_v32 = vmul.f32 0.015625, %v131_v29  ;;  %v172_v33 = vmul.f32 0.015625, %v155_v30  ;;  %v195_v16 = vmul.f32 %v1466_v23, %v1466_v23  ;;  %v203_v4 = vmul.f32 %v1469_v59, %v1469_v59  ;;  %v1030_v30 = vld [vmem:[%s1865_s2 + $0x10] sm:$0xff]  }
  0xaf   :  { %1063 = vmatprep.subr.mxu0 %v1014_v38  ;;  %1103 = vmatprep.subr.mxu1 %v1014_v38  ;;  %v419_v19 = vsub.f32 0.0, %v403_v8  ;;  %v398_v22 = vand.u32 2147483647, %v1525_v52  ;;  %v1533_v58 = vunpack.c.l.bf16 %v1033_v11  ;;  %v420_v28 = vsub.f32 0.0, %v404_v10 }
  0xb0   :  { %v1481_v17 = vsub.f32 %v1387_v12, %v164_v32  ;;  %v1484_v36 = vsub.f32 %v1389_v13, %v172_v33  ;;  %v223_v37 = vsel %vm107_vm0, %v195_v16, 0.0  ;;  %v247_v39 = vsel %vm107_vm0, %v203_v4, 0.0  ;;  %v1037_v12 = vld [vmem:[%s1869_s6 + $0x10] sm:$0xff]   ;;  %1064 = vmatpush3.msra.mxu0 %v1014_v38  ;;  %1111 = vmatpush3.msra.mxu1 %v1014_v38 }
  0xb1   :  { %245 = vadd.xlane.f32.xlu1 %v244_v31  ;;  %224 = vadd.xlane.f32.xlu0 %v223_v37  ;;  %v1010_v45 = vunpack.c.h.bf16 %v1037_v12  ;;  %v1009_v47 = vunpack.c.l.bf16 %v1037_v12  ;;  %1122 = vpow2.f32 %v427_v14  ;;  %v413_v29 = vsub.f32 0.0, %v397_v15  ;;  %v1035_v14 = vld [vmem:[%s1865_s2 + $0x38] sm:$0xff]  }
  0xb2   :  { %v196_v41 = vmul.f32 %v1481_v17, %v1481_v17  ;;  %v204_v43 = vmul.f32 %v1484_v36, %v1484_v36  ;;  %1065 = vmatprep.subr.mxu0 %v1013_v44  ;;  %1104 = vmatprep.subr.mxu1 %v1013_v44  ;;  %1124 = vpow2.f32 %v429_v18  ;;  %v443_v31 = vmul.f32 1.442695, %v419_v19 }
  0xb3   :  { %1066 = vmatpush3.msra.mxu0 %v1013_v44  ;;  %1112 = vmatpush3.msra.mxu1 %v1013_v44  ;;  %v414_v32 = vsub.f32 0.0, %v398_v22  ;;  %v405_v33 = vand.u32 2147483647, %v1533_v58  ;;  %v445_v16 = vmul.f32 1.442695, %v420_v28  ;;  %v1539_v4 = vunpack.c.l.bf16 %v1030_v30 }
  0xb4   :  { %v226_v13 = vsel %vm107_vm0, %v196_v41, 0.0  ;;  %v250_v46 = vsel %vm107_vm0, %v204_v43, 0.0  ;;  %1067 = vmatprep.subr.mxu0 %v1010_v45  ;;  %1105 = vmatprep.subr.mxu1 %v1010_v45  ;;  %v431_v6 = vmul.f32 1.442695, %v413_v29  ;;  %1126 = vpow2.f32 %v443_v31 }
  0xb5   :  { %248 = vadd.xlane.f32.xlu1 %v247_v39  ;;  %227 = vadd.xlane.f32.xlu0 %v226_v13  ;;  %v433_v37 = vmul.f32 1.442695, %v414_v32  ;;  %v421_v38 = vsub.f32 0.0, %v405_v33  ;;  %1128 = vpow2.f32 %v445_v16  ;;  %v1541_v39 = vunpack.c.h.bf16 %v1033_v11 }
  0xb6   :  { %1068 = vmatpush3.msra.mxu0 %v1010_v45  ;;  %1113 = vmatpush3.msra.mxu1 %v1010_v45  ;;  %v399_v41 = vand.u32 2147483647, %v1539_v4  ;;  %1130 = vpow2.f32 %v431_v6  ;;  %v1545_v13 = vunpack.c.h.bf16 %v1030_v30  ;;  %v1034_v45 = vld [vmem:[%s1865_s2 + $0x30] sm:$0xff]   ;;  %v1584_v30 = vunpack.c.l.bf16 %v1035_v14 }
  0xb7   :  { %1069 = vmatprep.subr.mxu0 %v1009_v47  ;;  %1106 = vmatprep.subr.mxu1 %v1009_v47  ;;  %1132 = vpow2.f32 %v433_v37  ;;  %v447_v43 = vmul.f32 1.442695, %v421_v38  ;;  %v406_v44 = vand.u32 2147483647, %v1541_v39  ;;  %v1567_v3 = vunpack.c.h.bf16 %v1034_v45 }
  0xb8   :  { %1070 = vmatpush3.msra.mxu0 %v1009_v47  ;;  %1114 = vmatpush3.msra.mxu1 %v1009_v47  ;;  %v415_v12 = vsub.f32 0.0, %v399_v41  ;;  %v1589_v37 = vunpack.c.h.bf16 %v1035_v14  ;;  %vm467_vm3 = vcmp.ge.f32.partialorder %v1515_v0, 0.0  ;;  %vm461_vm4 = vcmp.ge.f32.partialorder %v1522_v5, 0.0 }
  0xb9   :  { %251 = vadd.xlane.f32.xlu1 %v250_v46  ;;  %1071 = vmatprep.subr.mxu0 %v1006_v49  ;;  %v1031_v46 = vld [vmem:[%s1865_s2 + $0x18] sm:$0xff]   ;;  %1134 = vpow2.f32 %v447_v43  ;;  %v408_v29 = vand.u32 2147483647, %v1567_v3  ;;  %vm468_vm5 = vcmp.ge.f32.partialorder %v1520_v2, 0.0  ;;  %vm462_vm6 = vcmp.ge.f32.partialorder %v1525_v52, 0.0 }
  0xba   :  { %1072 = vmatpush3.msra.mxu0 %v1006_v49  ;;  %1107 = vmatprep.subr.mxu1 %v1006_v49  ;;  %v435_v26 = vmul.f32 1.442695, %v415_v12  ;;  %v1572_v11 = vunpack.c.h.bf16 %v1031_v46  ;;  %vm469_vm7 = vcmp.ge.f32.partialorder %v1533_v58, 0.0  ;;  %vm463_vm8 = vcmp.ge.f32.partialorder %v1539_v4, 0.0 }
  0xbb   :  { %1073 = vmatprep.subr.mxu0 %v1005_v50  ;;  %1115 = vmatpush3.msra.mxu1 %v1006_v49  ;;  %v422_v49 = vsub.f32 0.0, %v406_v44  ;;  %v424_v43 = vsub.f32 0.0, %v408_v29  ;;  %v409_v44 = vand.u32 2147483647, %v1584_v30  ;;  %vm470_vm9 = vcmp.ge.f32.partialorder %v1541_v39, 0.0 }
  0xbc   :  { %1074 = vmatpush3.msra.mxu0 %v1005_v50  ;;  %1108 = vmatprep.subr.mxu1 %v1005_v50  ;;  %1136 = vpow2.f32 %v435_v26  ;;  %v402_v33 = vand.u32 2147483647, %v1572_v11  ;;  %vm464_vm10 = vcmp.ge.f32.partialorder %v1545_v13, 0.0  ;;  %vm472_vm13 = vcmp.ge.f32.partialorder %v1567_v3, 0.0 }
  0xbd   :  { %1075 = vmatprep.subr.mxu0 %v1002_v54  ;;  %1116 = vmatpush3.msra.mxu1 %v1005_v50  ;;  %v1557_v50 = vunpack.c.l.bf16 %v1034_v45  ;;  %v449_v40 = vmul.f32 1.442695, %v422_v49  ;;  %v410_v49 = vand.u32 2147483647, %v1589_v37  ;;  %v453_v26 = vmul.f32 1.442695, %v424_v43 }
  0xbe   :  { %1076 = vmatpush3.msra.mxu0 %v1002_v54  ;;  %1109 = vmatprep.subr.mxu1 %v1002_v54  ;;  %v1553_v47 = vpop.eup %1122  ;;  %v418_v45 = vsub.f32 0.0, %v402_v33  ;;  %vm473_vm14 = vcmp.ge.f32.partialorder %v1584_v30, 0.0  ;;  %vm466_vm15 = vcmp.ge.f32.partialorder %v1572_v11, 0.0 }
  0xbf   :  { %1077 = vmatprep.subr.mxu0 %v1001_v55  ;;  %1117 = vmatpush3.msra.mxu1 %v1002_v54  ;;  %v1555_v48 = vpop.eup %1124  ;;  %v400_v54 = vand.u32 2147483647, %v1545_v13  ;;  %v475_v56 = vadd.f32 1.0, %v1553_v47  ;;  %v407_v1 = vand.u32 2147483647, %v1557_v50  ;;  %vm471_vm11 = vcmp.ge.f32.partialorder %v1557_v50, 0.0 }
  0xc0   :  { %1078 = vmatpush3.msra.mxu0 %v1001_v55  ;;  %1110 = vmatprep.subr.mxu1 %v1001_v55  ;;  %v476_v61 = vadd.f32 1.0, %v1555_v48 }
  0xc1   :  { %1118 = vmatpush3.msra.mxu1 %v1001_v55  ;;  %v1560_v55 = vunpack.c.l.bf16 %v1031_v46  ;;  %v1564_v62 = vpop.eup %1126  ;;  %v416_v8 = vsub.f32 0.0, %v400_v54  ;;  %1138 = vrcp.f32 %v475_v56  ;;  %v423_v28 = vsub.f32 0.0, %v407_v1 }
  0xc2   :  { %v1569_v7 = vpop.eup %1128  ;;  %1140 = vrcp.f32 %v476_v61  ;;  %v483_v18 = vadd.f32 1.0, %v1564_v62  ;;  %v425_v54 = vsub.f32 0.0, %v409_v44  ;;  %v441_v56 = vmul.f32 1.442695, %v418_v45 }
  0xc3   :  { %v401_v10 = vand.u32 2147483647, %v1560_v55  ;;  %v1577_v15 = vpop.eup %1130  ;;  %v484_v22 = vadd.f32 1.0, %v1569_v7  ;;  %1142 = vpow2.f32 %v449_v40  ;;  %v437_v31 = vmul.f32 1.442695, %v416_v8 }
  0xc4   :  { %v1580_v19 = vpop.eup %1132  ;;  %v477_v16 = vadd.f32 1.0, %v1577_v15  ;;  %1144 = vrcp.f32 %v483_v18  ;;  %v451_v41 = vmul.f32 1.442695, %v423_v28  ;;  %v426_v1 = vsub.f32 0.0, %v410_v49 }
  0xc5   :  { %v417_v32 = vsub.f32 0.0, %v401_v10  ;;  %v478_v6 = vadd.f32 1.0, %v1580_v19  ;;  %1146 = vrcp.f32 %v484_v22  ;;  %v455_v10 = vmul.f32 1.442695, %v425_v54 }
  0xc6   :  { %v1591_v38 = vpop.eup %1134  ;;  %1148 = vpow2.f32 %v437_v31  ;;  %v457_v31 = vmul.f32 1.442695, %v426_v1  ;;  %vm465_vm12 = vcmp.ge.f32.partialorder %v1560_v55, 0.0 }
  0xc7   :  { %v439_v12 = vmul.f32 1.442695, %v417_v32  ;;  %1150 = vrcp.f32 %v477_v16  ;;  %v485_v46 = vadd.f32 1.0, %v1591_v38 }
  0xc8   :  { %1152 = vrcp.f32 %v478_v6 }
  0xc9   :  { %1154 = vpow2.f32 %v451_v41  ;;  %v1596_v61 = vpop.eup %1136 }
  0xca   :  { %1156 = vpow2.f32 %v439_v12  ;;  %v479_v18 = vadd.f32 1.0, %v1596_v61 }
  0xcb   :  { %1158 = vrcp.f32 %v485_v46 }
  0xcc   :  { %1160 = vpow2.f32 %v453_v26 }
  0xcd   :  { %1162 = vpow2.f32 %v441_v56 }
  0xce   :  { %v1139_v40 = vpop.eup %1138  ;;  %1164 = vpow2.f32 %v455_v10 }
  0xcf   :  { %v1141_v8 = vpop.eup %1140  ;;  %v523_v29 = vmul.f32 %v1139_v40, %v1553_v47  ;;  %1166 = vrcp.f32 %v479_v18 }
  0xd0   :  { %v1599_v22 = vpop.eup %1142  ;;  %v524_v16 = vmul.f32 %v1141_v8, %v1555_v48 }
  0xd1   :  { %v1145_v32 = vpop.eup %1144  ;;  %v486_v44 = vadd.f32 1.0, %v1599_v22  ;;  %v539_v49 = vsel %vm459_vm1, %v1139_v40, %v523_v29  ;;  %vm474_vm1 = vcmp.ge.f32.partialorder %v1589_v37, 0.0 }
  0xd2   :  { %v1147_v6 = vpop.eup %1146  ;;  %v540_v56 = vsel %vm460_vm2, %v1141_v8, %v524_v16  ;;  %v531_v18 = vmul.f32 %v1145_v32, %v1564_v62  ;;  %vm852_vm2 = vcmask 261120  }
  0xd3   :  { %v1606_v12 = vpop.eup %1148 }
  0xd4   :  { %v1151_v46 = vpop.eup %1150 }
  0xd5   :  { %v1153_v26 = vpop.eup %1152  ;;  %v525_v8 = vmul.f32 %v1151_v46, %v1577_v15  ;;  %v1628_v15 = vmul.f32 %v1508_v60, %v540_v56 }
  0xd6   :  { %v1609_v1 = vpop.eup %1154 }
 0x122   :  { %v207_v14 = vpop.xlane.xlu0 %206 }
 0x123   :  { %v253_v28 = vmul.f32 0.015625, %v207_v14 }
 0x125   :  { %v269_v33 = vadd.f32 1e-05, %v253_v28  ;;  %v532_v28 = vmul.f32 %v1147_v6, %v1569_v7 }
 0x126   :  { %v231_v41 = vpop.xlane.xlu1 %230  ;;  %v210_v43 = vpop.xlane.xlu0 %209 }
 0x127   :  { %1168 = vrsqrt.f32 %v269_v33  ;;  %v261_v47 = vmul.f32 0.015625, %v231_v41  ;;  %v254_v45 = vmul.f32 0.015625, %v210_v43  ;;  %v480_v33 = vadd.f32 1.0, %v1606_v12  ;;  %v1614_v41 = vpop.eup %1156 }
 0x128   :  { %1170 = vpow2.f32 %v457_v31  ;;  %v526_v31 = vmul.f32 %v1153_v26, %v1580_v19  ;;  %v1159_v62 = vpop.eup %1158  ;;  %v487_v43 = vadd.f32 1.0, %v1609_v1  ;;  %v481_v19 = vadd.f32 1.0, %v1614_v41 }
 0x129   :  { %v277_v54 = vadd.f32 1e-05, %v261_v47  ;;  %v270_v48 = vadd.f32 1e-05, %v254_v45  ;;  %1172 = vrcp.f32 %v486_v44  ;;  %v1622_v44 = vpop.eup %1160 }
 0x12a   :  { %v234_v10 = vpop.xlane.xlu1 %233  ;;  %v213_v14 = vpop.xlane.xlu0 %212  ;;  %v542_v60 = vsel %vm462_vm6, %v1153_v26, %v526_v31  ;;  %v1653_v31 = vld [vmem:[%s1867_s4] ss:$0 sm:$0xff] }
 0x12b   :  { %1174 = vrsqrt.f32 %v277_v54  ;;  %v262_v40 = vmul.f32 0.015625, %v234_v10  ;;  %v255_v29 = vmul.f32 0.015625, %v213_v14  ;;  %v1625_v54 = vmul.f32 %v1506_v57, %v539_v49 }
 0x12c   :  { %1176 = vrsqrt.f32 %v270_v48  ;;  %v1631_v48 = vpop.eup %1162  ;;  %v548_v57 = vsel %vm468_vm5, %v1147_v6, %v532_v28 }
 0x12d   :  { %v278_v16 = vadd.f32 1e-05, %v262_v40  ;;  %v271_v7 = vadd.f32 1e-05, %v255_v29  ;;  %1178 = vrcp.f32 %v480_v33  ;;  %v547_v40 = vsel %vm467_vm3, %v1145_v32, %v531_v18 }
 0x12e   :  { %v237_v47 = vpop.xlane.xlu1 %236  ;;  %v216_v45 = vpop.xlane.xlu0 %215  ;;  %v541_v29 = vsel %vm461_vm4, %v1151_v46, %v525_v8  ;;  %v488_v33 = vadd.f32 1.0, %v1622_v44  ;;  %v1645_v32 = vmul.f32 %v1515_v0, %v547_v40  ;;  %v533_v46 = vmul.f32 %v1159_v62, %v1591_v38 }
 0x12f   :  { %1180 = vrsqrt.f32 %v278_v16  ;;  %v263_v10 = vmul.f32 0.015625, %v237_v47  ;;  %v256_v14 = vmul.f32 0.015625, %v216_v45  ;;  %v1642_v16 = vpop.eup %1164  ;;  %v482_v6 = vadd.f32 1.0, %v1631_v48 }
 0x130   :  { %1182 = vrsqrt.f32 %v271_v7  ;;  %v1167_v18 = vpop.eup %1166  ;;  %v1656_v0 = vmul.f32 %v1522_v5, %v541_v29  ;;  %v1659_v38 = vmul.f32 %v1520_v2, %v548_v57  ;;  %v1662_v7 = vmul.f32 %v1525_v52, %v542_v60  ;;  %v1670_v5 = vld [vmem:[%s1868_s5] ss:$0 sm:$0xff] }
 0x131   :  { %v279_v49 = vadd.f32 1e-05, %v263_v10  ;;  %v272_v56 = vadd.f32 1e-05, %v256_v14  ;;  %1184 = vrcp.f32 %v487_v43  ;;  %v549_v29 = vsel %vm469_vm7, %v1159_v62, %v533_v46 }
 0x132   :  { %v240_v47 = vpop.xlane.xlu1 %239  ;;  %v219_v45 = vpop.xlane.xlu0 %218  ;;  %1186 = vrcp.f32 %v481_v19  ;;  %v489_v2 = vadd.f32 1.0, %v1642_v16 }
 0x133   :  { %1188 = vrsqrt.f32 %v279_v49  ;;  %v264_v26 = vmul.f32 0.015625, %v240_v47  ;;  %v257_v28 = vmul.f32 0.015625, %v219_v45 }
 0x134   :  { %v1169_v8 = vpop.eup %1168  ;;  %1190 = vrsqrt.f32 %v272_v56 }
 0x135   :  { %v1664_v43 = vpop.eup %1170  ;;  %v280_v19 = vadd.f32 1e-05, %v264_v26  ;;  %v273_v10 = vadd.f32 1e-05, %v257_v28  ;;  %v301_v14 = vmul.f32 %v1169_v8, %v1396_v24  ;;  %1192 = vrcp.f32 %v488_v33 }
 0x136   :  { %v243_v40 = vpop.xlane.xlu1 %242  ;;  %v222_v49 = vpop.xlane.xlu0 %221  ;;  %1194 = vrcp.f32 %v482_v6  ;;  %v527_v33 = vmul.f32 %v1167_v18, %v1596_v61  ;;  %v490_v47 = vadd.f32 1.0, %v1664_v43 }
 0x137   :  { %v1173_v52 = vpop.eup %1172  ;;  %1196 = vrsqrt.f32 %v280_v19  ;;  %v265_v57 = vmul.f32 0.015625, %v243_v40  ;;  %v258_v60 = vmul.f32 0.015625, %v222_v49  ;;  %v324_v24 = vmul.f32 %v1653_v31, %v301_v14 }
 0x138   :  { %v1175_v56 = vpop.eup %1174  ;;  %1198 = vrsqrt.f32 %v273_v10  ;;  %v1682_v14 = vmul.f32 %v1533_v58, %v549_v29  ;;  %v534_v61 = vmul.f32 %v1173_v52, %v1599_v22  ;;  %v543_v58 = vsel %vm463_vm8, %v1167_v18, %v527_v33 }
 0x139   :  { %v1177_v62 = vpop.eup %1176  ;;  %v281_v45 = vadd.f32 1e-05, %v265_v57  ;;  %v274_v46 = vadd.f32 1e-05, %v258_v60  ;;  %v347_v6 = vadd.f32 %v1670_v5, %v324_v24  ;;  %v309_v26 = vmul.f32 %v1175_v56, %v1406_v34 }
 0x13a   :  { %v246_v28 = vpop.xlane.xlu1 %245  ;;  %v225_v8 = vpop.xlane.xlu0 %224  ;;  %v302_v19 = vmul.f32 %v1177_v62, %v1399_v25  ;;  %1200 = vrcp.f32 %v489_v2  ;;  %v550_v18 = vsel %vm470_vm9, %v1173_v52, %v534_v61 }
 0x13b   :  { %v1685_v10 = vpop.eup %1178  ;;  %1202 = vrsqrt.f32 %v281_v45  ;;  %v266_v40 = vmul.f32 0.015625, %v246_v28  ;;  %v259_v49 = vmul.f32 0.015625, %v225_v8  ;;  %v571_v57 = vmul.f32 %v1625_v54, %v347_v6 }
 0x13c   :  { %v1181_v34 = vpop.eup %1180  ;;  %1204 = vrsqrt.f32 %v274_v46  ;;  %v325_v60 = vmul.f32 %v1653_v31, %v302_v19  ;;  %v332_v25 = vmul.f32 %v1653_v31, %v309_v26 }
 0x13d   :  { %v1183_v22 = vpop.eup %1182  ;;  %v282_v29 = vadd.f32 1e-05, %v266_v40  ;;  %v275_v2 = vadd.f32 1e-05, %v259_v49  ;;  %1079 = vmatprep.mubr.msk.f32.mxu0 %vm107_vm0, %v571_v57  ;;  %v310_v24 = vmul.f32 %v1181_v34, %v1409_v35  ;;  %1206 = vrcp.f32 %v490_v47 }
 0x13e   :  { %v1185_v54 = vpop.eup %1184  ;;  %v249_v56 = vpop.xlane.xlu1 %248  ;;  %v348_v45 = vadd.f32 %v1670_v5, %v325_v60  ;;  %v355_v46 = vadd.f32 %v1670_v5, %v332_v25  ;;  %v303_v6 = vmul.f32 %v1183_v22, %v1418_v20 }
 0x13f   :  { %v228_v62 = vpop.xlane.xlu0 %227  ;;  %v1701_v33 = vpop.eup %1186  ;;  %1208 = vrsqrt.f32 %v282_v29  ;;  %v267_v26 = vmul.f32 0.015625, %v249_v56  ;;  %v333_v28 = vmul.f32 %v1653_v31, %v310_v24 }
 0x140   :  { %v260_v35 = vmul.f32 0.015625, %v228_v62  ;;  %v1189_v47 = vpop.eup %1188  ;;  %1210 = vrsqrt.f32 %v275_v2  ;;  %v572_v8 = vmul.f32 %v1628_v15, %v348_v45  ;;  %v579_v19 = vmul.f32 %v1645_v32, %v355_v46 }
 0x141   :  { %v326_v40 = vmul.f32 %v1653_v31, %v303_v6  ;;  %v1191_v49 = vpop.eup %1190  ;;  %v283_v20 = vadd.f32 1e-05, %v267_v26  ;;  %v356_v52 = vadd.f32 %v1670_v5, %v333_v28  ;;  %v311_v61 = vmul.f32 %v1189_v47, %v1421_v21 }
 0x142   :  { %v276_v57 = vadd.f32 1e-05, %v260_v35  ;;  %v1193_v34 = vpop.eup %1192  ;;  %1080 = vmatmul.mubr.msk.f32.vlgmr.msra.gmra.mxu0 %vm107_vm0, %v572_v8  ;;  %1091 = vmatprep.mubr.msk.f32.mxu1 %vm107_vm0, %v579_v19  ;;  %v252_v60 = vpop.xlane.xlu1 %251  ;;  %v304_v15 = vmul.f32 %v1191_v49, %v1430_v51  ;;  %v528_v32 = vmul.f32 %v1685_v10, %v1606_v12  ;;  %v535_v51 = vmul.f32 %v1185_v54, %v1609_v1 }
 0x143   :  { %v349_v25 = vadd.f32 %v1670_v5, %v326_v40  ;;  %v1716_v22 = vpop.eup %1194  ;;  %1212 = vrsqrt.f32 %v283_v20  ;;  %v268_v29 = vmul.f32 0.015625, %v252_v60  ;;  %v580_v21 = vmul.f32 %v1659_v38, %v356_v52 }
 0x144   :  { %v334_v2 = vmul.f32 %v1653_v31, %v311_v61  ;;  %v1197_v24 = vpop.eup %1196  ;;  %1214 = vrsqrt.f32 %v276_v57  ;;  %v327_v62 = vmul.f32 %v1653_v31, %v304_v15  ;;  %v559_v6 = vmul.f32 %v1539_v4, %v543_v58 }
 0x145   :  { %v573_v56 = vmul.f32 %v1656_v0, %v349_v25  ;;  %v1199_v45 = vpop.eup %1198  ;;  %v284_v12 = vadd.f32 1e-05, %v268_v29  ;;  %1092 = vmatmul.mubr.msk.f32.vlgmr.msra.gmra.mxu1 %vm107_vm0, %v580_v21  ;;  %v312_v38 = vmul.f32 %v1197_v24, %v1433_v27  ;;  %v566_v35 = vmul.f32 %v1541_v39, %v550_v18 }
 0x146   :  { %v357_v46 = vadd.f32 %v1670_v5, %v334_v2  ;;  %v350_v26 = vadd.f32 %v1670_v5, %v327_v62  ;;  %v305_v0 = vmul.f32 %v1199_v45, %v1442_v63  ;;  %v544_v1 = vsel %vm464_vm10, %v1685_v10, %v528_v32 }
 0x147   :  { %1082 = vmatprep.mubr.msk.f32.mxu0 %vm107_vm0, %v573_v56  ;;  %v1201_v28 = vpop.eup %1200  ;;  %1216 = vrsqrt.f32 %v284_v12  ;;  %v335_v4 = vmul.f32 %v1653_v31, %v312_v38  ;;  %v529_v27 = vmul.f32 %v1701_v33, %v1614_v41  ;;  %v551_v39 = vsel %vm471_vm11, %v1185_v54, %v535_v51 }
 0x148   :  { %v581_v47 = vmul.f32 %v1682_v14, %v357_v46  ;;  %v1203_v58 = vpop.eup %1202  ;;  %v574_v8 = vmul.f32 %v1662_v7, %v350_v26  ;;  %v328_v63 = vmul.f32 %v1653_v31, %v305_v0  ;;  %v536_v18 = vmul.f32 %v1193_v34, %v1622_v44 }
 0x149   :  { %v1205_v10 = vpop.eup %1204  ;;  %v358_v14 = vadd.f32 %v1670_v5, %v335_v4  ;;  %v313_v19 = vmul.f32 %v1203_v58, %v1445_v42  ;;  %v560_v54 = vmul.f32 %v1545_v13, %v544_v1  ;;  %v567_v20 = vmul.f32 %v1557_v50, %v551_v39  ;;  %v828_v39 = vld [vmem:[%s1866_s3 + $0x40] sm:$0xff] }
 0x14a   :  { %1094 = vmatprep.mubr.msk.f32.mxu1 %vm107_vm0, %v581_v47  ;;  %v1207_v41 = vpop.eup %1206  ;;  %1083 = vmatmul.mubr.msk.f32.gmra.mxu0 %vm107_vm0, %v574_v8  ;;  %v351_v7 = vadd.f32 %v1670_v5, %v328_v63  ;;  %v306_v40 = vmul.f32 %v1205_v10, %v1454_v9  ;;  %v545_v42 = vsel %vm465_vm12, %v1701_v33, %v529_v27 }
 0x14b   :  { %v582_v49 = vmul.f32 %v566_v35, %v358_v14  ;;  %v336_v44 = vmul.f32 %v1653_v31, %v313_v19  ;;  %v552_v60 = vsel %vm472_vm13, %v1193_v34, %v536_v18  ;;  %v537_v25 = vmul.f32 %v1201_v28, %v1642_v16  ;;  %v823_v19 = vld [vmem:[%s1866_s3 + $0x18] sm:$0xff] }
 0x14c   :  { %v1209_v57 = vpop.eup %1208  ;;  %v575_v52 = vmul.f32 %v559_v6, %v351_v7  ;;  %v329_v61 = vmul.f32 %v1653_v31, %v306_v40  ;;  %v530_v50 = vmul.f32 %v1716_v22, %v1631_v48  ;;  %v561_v32 = vmul.f32 %v1560_v55, %v545_v42  ;;  %v822_v7 = vld [vmem:[%s1866_s3 + $0x10] sm:$0xff] }
 0x14d   :  { %v1211_v15 = vpop.eup %1210  ;;  %1095 = vmatmul.mubr.msk.f32.gmra.mxu1 %vm107_vm0, %v582_v49  ;;  %v359_v9 = vadd.f32 %v1670_v5, %v336_v44  ;;  %v314_v13 = vmul.f32 %v1209_v57, %v1457_v53  ;;  %v568_v53 = vmul.f32 %v1567_v3, %v552_v60  ;;  %v553_v24 = vsel %vm473_vm14, %v1201_v28, %v537_v25  ;;  %v830_v42 = vld [vmem:[%s1866_s3 + $0x50] sm:$0xff]  ;;  %v825_v60 = vld [vmem:[%s1866_s3 + $0x28] sm:$0xff] }
 0x14e   :  { %1085 = vmatprep.mubr.msk.f32.mxu0 %vm107_vm0, %v575_v52  ;;  %v352_v33 = vadd.f32 %v1670_v5, %v329_v61  ;;  %v307_v34 = vmul.f32 %v1211_v15, %v1466_v23  ;;  %v538_v56 = vmul.f32 %v1207_v41, %v1664_v43  ;;  %v546_v51 = vsel %vm466_vm15, %v1716_v22, %v530_v50  ;;  %v824_v15 = vld [vmem:[%s1866_s3 + $0x20] sm:$0xff] }
 0x14f   :  { %v583_v16 = vmul.f32 %v567_v20, %v359_v9  ;;  %v337_v29 = vmul.f32 %v1653_v31, %v314_v13  ;;  %v569_v46 = vmul.f32 %v1584_v30, %v553_v24  ;;  %v562_v22 = vmul.f32 %v1572_v11, %v546_v51  ;;  %v833_v13 = vld [vmem:[%s1866_s3 + $0x68] sm:$0xff] }
 0x150   :  { %v1213_v21 = vpop.eup %1212  ;;  %v576_v2 = vmul.f32 %v560_v54, %v352_v33  ;;  %v330_v48 = vmul.f32 %v1653_v31, %v307_v34  ;;  %v831_v54 = vld [vmem:[%s1866_s3 + $0x58] sm:$0xff] }
 0x151   :  { %v1215_v62 = vpop.eup %1214  ;;  %1097 = vmatprep.mubr.msk.f32.mxu1 %vm107_vm0, %v583_v16  ;;  %v360_v23 = vadd.f32 %v1670_v5, %v337_v29  ;;  %v315_v55 = vmul.f32 %v1213_v21, %v1469_v59  ;;  %v554_v59 = vsel %vm474_vm1, %v1207_v41, %v538_v56  ;;  %v832_v16 = vld [vmem:[%s1866_s3 + $0x60] sm:$0xff]  ;;  %v827_v21 = vld [vmem:[%s1866_s3 + $0x38] sm:$0xff] }
 0x152   :  { %1086 = vmatmul.mubr.msk.f32.gmra.mxu0 %vm107_vm0, %v576_v2  ;;  %v353_v3 = vadd.f32 %v1670_v5, %v330_v48  ;;  %v308_v45 = vmul.f32 %v1215_v62, %v1481_v17  ;;  %v570_v28 = vmul.f32 %v1589_v37, %v554_v59  ;;  %v820_v37 = vld [vmem:[%s1866_s3] sm:$0xff]  ;;  %v826_v48 = vld [vmem:[%s1866_s3 + $0x30] sm:$0xff]  ;;  %v835_v56 = vld [vmem:[%s1866_s3 + $0x78] sm:$0xff] }
 0x153   :  { %v584_v12 = vmul.f32 %v568_v53, %v360_v23  ;;  %v338_v43 = vmul.f32 %v1653_v31, %v315_v55  ;;  %v834_v55 = vld [vmem:[%s1866_s3 + $0x70] sm:$0xff] }
 0x154   :  { %v1217_v6 = vpop.eup %1216  ;;  %v577_v38 = vmul.f32 %v561_v32, %v353_v3  ;;  %v331_v26 = vmul.f32 %v1653_v31, %v308_v45 }
 0x155   :  { %1098 = vmatmul.mubr.msk.f32.gmra.mxu1 %vm107_vm0, %v584_v12  ;;  %v361_v0 = vadd.f32 %v1670_v5, %v338_v43  ;;  %v316_v35 = vmul.f32 %v1217_v6, %v1484_v36  ;;  %v821_v36 = vld [vmem:[%s1866_s3 + $0x8] sm:$0xff] }
 0x156   :  { %1088 = vmatprep.mubr.msk.f32.mxu0 %vm107_vm0, %v577_v38  ;;  %v354_v17 = vadd.f32 %v1670_v5, %v331_v26 }
 0x157   :  { %v585_v1 = vmul.f32 %v569_v46, %v361_v0  ;;  %v339_v30 = vmul.f32 %v1653_v31, %v316_v35 }
 0x158   :  { %v578_v47 = vmul.f32 %v562_v22, %v354_v17 }
 0x159   :  { %1100 = vmatprep.mubr.msk.f32.mxu1 %vm107_vm0, %v585_v1  ;;  %v362_v11 = vadd.f32 %v1670_v5, %v339_v30  ;;  %v829_v5 = vld [vmem:[%s1866_s3 + $0x48] sm:$0xff] }
 0x15a   :  { %1089 = vmatmul.mubr.msk.f32.gmra.mxu0 %vm107_vm0, %v578_v47 }
 0x15b   :  { %v586_v4 = vmul.f32 %v570_v28, %v362_v11 }
 0x15d   :  { %1101 = vmatmul.mubr.msk.f32.gmra.mxu1 %vm107_vm0, %v586_v4 }
 0x202   :  { %v1081_v27 = vpop.f32.mrf.mxu0 }
 0x203   :  { %v837_v31 = vadd.f32 %v1081_v27, %v821_v36 }
 0x204   :  { %v741_v58 = vpop.f32.mrf.mxu0 }
 0x205   :  { %854 = vst.msk [vmem:[#allocation2 + $0x8] sm:$0xff] %vm852_vm2, %v837_v31  ;;  %v836_v8 = vadd.f32 %v820_v37, %v741_v58  ;;  %v1093_v63 = vpop.f32.mrf.mxu1 }
 0x206   :  { %v845_v18 = vadd.f32 %v1093_v63, %v829_v5 }
 0x207   :  { %853 = vst.msk [vmem:[#allocation2] sm:$0xff] %vm852_vm2, %v836_v8  ;;  %v781_v10 = vpop.f32.mrf.mxu1 }
 0x208   :  { %862 = vst.msk [vmem:[#allocation2 + $0x48] sm:$0xff] %vm852_vm2, %v845_v18  ;;  %v844_v14 = vadd.f32 %v828_v39, %v781_v10 }
 0x20a   :  { %861 = vst.msk [vmem:[#allocation2 + $0x40] sm:$0xff] %vm852_vm2, %v844_v14  ;;  %v1084_v41 = vpop.f32.mrf.mxu0 }
 0x20b   :  { %v839_v40 = vadd.f32 %v1084_v41, %v823_v19 }
 0x20c   :  { %v751_v49 = vpop.f32.mrf.mxu0 }
 0x20d   :  { %856 = vst.msk [vmem:[#allocation2 + $0x18] sm:$0xff] %vm852_vm2, %v839_v40  ;;  %v838_v44 = vadd.f32 %v822_v7, %v751_v49  ;;  %v1096_v20 = vpop.f32.mrf.mxu1 }
 0x20e   :  { %v847_v57 = vadd.f32 %v1096_v20, %v831_v54 }
 0x20f   :  { %855 = vst.msk [vmem:[#allocation2 + $0x10] sm:$0xff] %vm852_vm2, %v838_v44  ;;  %v791_v52 = vpop.f32.mrf.mxu1 }
 0x210   :  { %864 = vst.msk [vmem:[#allocation2 + $0x58] sm:$0xff] %vm852_vm2, %v847_v57  ;;  %v846_v61 = vadd.f32 %v830_v42, %v791_v52 }
 0x212   :  { %863 = vst.msk [vmem:[#allocation2 + $0x50] sm:$0xff] %vm852_vm2, %v846_v61  ;;  %v1087_v25 = vpop.f32.mrf.mxu0 }
 0x213   :  { %v841_v9 = vadd.f32 %v1087_v25, %v825_v60 }
 0x214   :  { %v761_v50 = vpop.f32.mrf.mxu0 }
 0x215   :  { %858 = vst.msk [vmem:[#allocation2 + $0x28] sm:$0xff] %vm852_vm2, %v841_v9  ;;  %v840_v33 = vadd.f32 %v824_v15, %v761_v50  ;;  %v1099_v34 = vpop.f32.mrf.mxu1 }
 0x216   :  { %v849_v32 = vadd.f32 %v1099_v34, %v833_v13 }
 0x217   :  { %857 = vst.msk [vmem:[#allocation2 + $0x20] sm:$0xff] %vm852_vm2, %v840_v33  ;;  %v801_v29 = vpop.f32.mrf.mxu1 }
 0x218   :  { %866 = vst.msk [vmem:[#allocation2 + $0x68] sm:$0xff] %vm852_vm2, %v849_v32  ;;  %v848_v53 = vadd.f32 %v832_v16, %v801_v29 }
 0x21a   :  { %865 = vst.msk [vmem:[#allocation2 + $0x60] sm:$0xff] %vm852_vm2, %v848_v53  ;;  %v1090_v2 = vpop.f32.mrf.mxu0 }
 0x21b   :  { %v843_v24 = vadd.f32 %v1090_v2, %v827_v21 }
 0x21c   :  { %v771_v62 = vpop.f32.mrf.mxu0 }
 0x21d   :  { %860 = vst.msk [vmem:[#allocation2 + $0x38] sm:$0xff] %vm852_vm2, %v843_v24  ;;  %v842_v23 = vadd.f32 %v826_v48, %v771_v62  ;;  %v1102_v51 = vpop.f32.mrf.mxu1 }
 0x21e   :  { %v851_v3 = vadd.f32 %v1102_v51, %v835_v56 }
 0x21f   :  { %859 = vst.msk [vmem:[#allocation2 + $0x30] sm:$0xff] %vm852_vm2, %v842_v23  ;;  %v811_v45 = vpop.f32.mrf.mxu1 }
 0x220   :  { %868 = vst.msk [vmem:[#allocation2 + $0x78] sm:$0xff] %vm852_vm2, %v851_v3  ;;  %v850_v12 = vadd.f32 %v834_v55, %v811_v45 }
 0x222   :  { %867 = vst.msk [vmem:[#allocation2 + $0x70] sm:$0xff] %vm852_vm2, %v850_v12 }
 0x223   :  { %1229 = shalt.err (!%p1226_p4)
}
 0x224   :  { %s1241_s3 = smov 128   ;;  %s1242_s13 = smov 8  }
 0x225   :  { %880 = dma.vmem_to_hbm [thread:$0]  %s875_s11, 2048, %s1870_s7, [#allocation3], %s1241_s3, %s1241_s3, %s1242_s13  }
 0x226   :  { %1238 = dma.done.wait [#allocation3], 2048  }
 0x227   :  { %1239 = vsyncadd [#allocation3], 4294965248 }
 0x228   :  { %884 = vsyncpa [#allocation3], 1 }

// kernel: vss_block_forward.6
= control target key start
LH: loop header
LB: loop body
LE: loop exit
PB: predicated region body
PF: predicated region fallthrough
CT: control target
= control target key end

     0   :  { %s3115_s21 = smov 0   ;;  %s3117_s22 = smov 0   ;;  %s3828_s0 = inlined_call_operand.vmem [shape: bf16[2,2,64,64], index: 0, kind: input, shape index: {}]   ;;  %s3829_s1 = inlined_call_operand.vmem [shape: bf16[2,64,68], index: 1, kind: input, shape index: {}]   ;;  %s3830_s2 = inlined_call_operand.vmem [shape: bf16[2,2,2,64], index: 2, kind: input, shape index: {}]   ;;  %s3831_s3 = inlined_call_operand.vmem [shape: f32[2,2,1,64], index: 3, kind: input, shape index: {}]   ;;  %s3832_s4 = inlined_call_operand.vmem [shape: f32[2,2,16,64], index: 4, kind: input, shape index: {}]   ;;  %s3833_s5 = inlined_call_operand.vmem [shape: f32[2,2,1,64], index: 5, kind: input, shape index: {}]   ;;  %s3834_s6 = inlined_call_operand.vmem [shape: bf16[2,2,64,64], index: 6, kind: output, shape index: {}]  }
   0x1   :  { %s3119_s23 = smov 0   ;;  %s3121_s24 = smov 0  }
   0x2   :  { %s3123_s25 = smov 0  }
   0x3 LB: > { %s25_s26 = sadd.s32 1, %s3042_s23  ;;  %s28_s27 = sadd.s32 1, %s3046_s24  ;;  %s3050_s25 = sphi %s3123_s25, %s16_s25   ;;  %s3046_s24 = sphi %s3121_s24, %s3839_s24   ;;  %s3042_s23 = sphi %s3119_s23, %s3838_s23   ;;  %s3038_s22 = sphi %s3117_s22, %s3837_s22   ;;  %s3034_s21 = sphi %s3115_s21, %s3836_s21  }
   0x4   : > { %p26_p0 = scmp.ge.s32.totalorder %s25_s26, 2  ;;  %p2520_p1 = scmp.ge.s32.totalorder %s3050_s25, 1 }
   0x5   : > { %p279_p2 = scmp.lt.s32.totalorder %s3050_s25, 5 }
   0x6   : > { %s3841_s26 = smov (%p26_p0, %s25_s26), 0  ;;  %s3843_s27 = smov (!%p26_p0, %s28_s27), %s3046_s24 }
   0x7   : > { %p280_p3 = pnand %p2520_p1, %p279_p2  ;;  %p30_p4 = scmp.ge.s32.totalorder %s3843_s27, 2 }
   0x8   : > { %p339_p5 = scmp.lt.s32.totalorder (!%p280_p3), %s3034_s21, 1  ;;  %p341_p6 = scmp.lt.s32.totalorder (!%p280_p3), %s3038_s22, 1 }
   0x9   : > { %s3845_s27 = smov (%p30_p4, %s3843_s27), 0  ;;  %283 = sbr.rel (%p280_p3) target bundleno = 1255 (0x4e7), region = 44 }
   0xa   : > { %s3297_s13 = smov (!%p280_p3), 0  }
   0xe   : > { %s3847_s21 = smov (!%p339_p5, %s3034_s21), 1  ;;  %s3849_s22 = smov (!%p341_p6, %s3038_s22), 1  ;;  %vm395_vm0 = vcmask 523264   ;;  %vm628_vm1 = vcmask 1041408   ;;  %vm565_vm2 = vcmask 556032   ;;  %vm603_vm3 = vcmask 15360  }
   0xf   : > { %s2522_s28 = sshll.u32 %s3847_s21, 4  ;;  %s2521_s29 = sshll.u32 %s3849_s22, 3  ;;  %vm841_vm4 = vcmask 261120  }
  0x10   : > { %s2581_s30 = sshll.u32 %s3849_s22, 5  ;;  %s345_s7 = sadd.s32 %s2522_s28, %s2521_s29 }
  0x11   : > { %s3152_s10 = scalar_lea.vmem %s3829_s1, %s2581_s30  ;;  %s2523_s11 = sshll.u32 %s345_s7, 2 }
  0x12   : > { %s3157_s14 = scalar_lea.vmem %s3832_s4, %s2581_s30  ;;  %v2647_v0 = vld [vmem:[%s3152_s10 + $0x18] sm:$0xff]   ;;  %v2646_v1 = vld [vmem:[%s3152_s10 + $0x10] sm:$0xff]   ;;  %s3164_s17 = scalar_lea.vmem %s3834_s6, %s2523_s11  ;;  %v2645_v16 = vld [vmem:[%s3152_s10 + $0x8] sm:$0xff]  }
  0x13   : > { %v2637_v2 = vunpack.c.l.bf16 %v2647_v0  ;;  %v2638_v3 = vunpack.c.h.bf16 %v2647_v0  ;;  %v850_v4 = vld [vmem:[%s3157_s14] sm:$0xff]  ;;  %v851_v5 = vld [vmem:[%s3157_s14 + $0x8] sm:$0xff]  ;;  %s347_s20 = scalar_lea.vmem %s3828_s0, %s2523_s11  ;;  %v2634_v10 = vunpack.c.h.bf16 %v2646_v1  ;;  %v2633_v11 = vunpack.c.l.bf16 %v2646_v1  ;;  %s3194_s21 = sshll.u32 %s3849_s22, 1 }
  0x14   : > { %v852_v6 = vmul.f32 1.442695, %v850_v4  ;;  %v854_v7 = vmul.f32 1.442695, %v851_v5  ;;  %v2592_v8 = vld [vmem:[%s347_s20] sm:$0xff]   ;;  %v2639_v9 = vld [vmem:[%s347_s20 + $0x8] sm:$0xff]   ;;  %v2630_v23 = vunpack.c.h.bf16 %v2645_v16  ;;  %v2629_v25 = vunpack.c.l.bf16 %v2645_v16  ;;  %s3200_s30 = scalar_lea.vmem %s3830_s2, %s3194_s21  ;;  %s3208_s9 = scalar_lea.vmem %s3833_s5, %s3194_s21 }
  0x15   : > { %2682 = vmatprep.subr.mxu0 %v2638_v3  ;;  %v2593_v12 = vunpack.c.l.bf16 %v2592_v8  ;;  %v2594_v13 = vunpack.c.h.bf16 %v2592_v8  ;;  %v2640_v14 = vld [vmem:[%s347_s20 + $0x10] sm:$0xff]   ;;  %v2641_v15 = vld [vmem:[%s347_s20 + $0x18] sm:$0xff]   ;;  %v2597_v17 = vunpack.c.l.bf16 %v2639_v9  ;;  %v2598_v18 = vunpack.c.h.bf16 %v2639_v9  ;;  %v2624_v24 = vld [vmem:[%s3152_s10] sm:$0xff]   ;;  %s3076_s22 = smov 126   ;;  %s3242_s12 = scalar_lea.vmem %s3831_s3, %s3194_s21 }
  0x16   : > { %2830 = vpow2.f32 %v852_v6  ;;  %2683 = vmatpush3.msra.mxu0 %v2638_v3  ;;  %v2601_v19 = vunpack.c.l.bf16 %v2640_v14  ;;  %v2602_v20 = vunpack.c.h.bf16 %v2640_v14  ;;  %v2605_v21 = vunpack.c.l.bf16 %v2641_v15  ;;  %v594_v32 = vld [vmem:[%s3200_s30] sm:$0x1] }
  0x17   : > { %2832 = vpow2.f32 %v854_v7  ;;  %2684 = vmatprep.subr.mxu0 %v2637_v2  ;;  %v2606_v22 = vunpack.c.h.bf16 %v2641_v15  ;;  %396 = vst.msk [vmem:[#allocation2] sm:$0xff] %vm395_vm0, %v2593_v12  ;;  %397 = vst.msk [vmem:[#allocation2 + $0x8] sm:$0xff] %vm395_vm0, %v2594_v13  ;;  %2698 = vmatprep.mubr.msk.f32.mxu0 %vm395_vm0, %v2593_v12  ;;  %v2626_v26 = vunpack.c.h.bf16 %v2624_v24  ;;  %v2625_v27 = vunpack.c.l.bf16 %v2624_v24  ;;  %v3212_v34 = vld [vmem:[%s3208_s9] ss:$0 sm:$0xff] }
  0x18   : > { %2685 = vmatpush3.msra.mxu0 %v2637_v2  ;;  %398 = vst.msk [vmem:[#allocation2 + $0x10] sm:$0xff] %vm395_vm0, %v2597_v17  ;;  %399 = vst.msk [vmem:[#allocation2 + $0x18] sm:$0xff] %vm395_vm0, %v2598_v18  ;;  %v595_v33 = vunpack.c.l.bf16 %v594_v32  ;;  %v2542_v59 = vld [vmem:[%s3242_s12] ss:$0 sm:$0xff] }
  0x19   : > { %400 = vst.msk [vmem:[#allocation2 + $0x20] sm:$0xff] %vm395_vm0, %v2601_v19  ;;  %2686 = vmatprep.subr.mxu0 %v2634_v10  ;;  %401 = vst.msk [vmem:[#allocation2 + $0x28] sm:$0xff] %vm395_vm0, %v2602_v20 }
  0x1a   : > { %402 = vst.msk [vmem:[#allocation2 + $0x30] sm:$0xff] %vm395_vm0, %v2605_v21  ;;  %403 = vst.msk [vmem:[#allocation2 + $0x38] sm:$0xff] %vm395_vm0, %v2606_v22  ;;  %2687 = vmatpush3.msra.mxu0 %v2634_v10  ;;  %2710 = vmatprep.subr.msk.mxu1 %vm628_vm1, %v595_v33 }
  0x1b   : > { %2688 = vmatprep.subr.mxu0 %v2633_v11  ;;  %2711 = vmatpush3.msk.msra.mxu1 %vm628_vm1, %v595_v33 }
  0x1c   : > { %2689 = vmatpush3.msra.mxu0 %v2633_v11 }
  0x1d   : > { %2690 = vmatprep.subr.mxu0 %v2630_v23 }
  0x1e   : > { %2691 = vmatpush3.msra.mxu0 %v2630_v23 }
  0x1f   : > { %2692 = vmatprep.subr.mxu0 %v2629_v25 }
  0x20   : > { %2693 = vmatpush3.msra.mxu0 %v2629_v25 }
  0x21   : > { %2694 = vmatprep.subr.mxu0 %v2626_v26 }
  0x22   : > { %2695 = vmatpush3.msra.mxu0 %v2626_v26 }
  0x23   : > { %v2831_v28 = vpop.eup %2830  ;;  %2696 = vmatprep.subr.mxu0 %v2625_v27 }
  0x24   : > { %v2833_v29 = vpop.eup %2832  ;;  %v3182_v30 = vsub.f32 0.0, %v2831_v28  ;;  %2697 = vmatpush3.msra.mxu0 %v2625_v27 }
  0x25   : > { %v3184_v31 = vsub.f32 0.0, %v2833_v29  ;;  %2699 = vmatmul.mubr.msk.f32.vlgmr.msra.gmra.mxu0 %vm395_vm0, %v2594_v13 }
  0x26   : > { %2701 = vmatprep.mubr.msk.f32.mxu0 %vm395_vm0, %v2597_v17 }
  0x29   : > { %2702 = vmatmul.mubr.msk.f32.gmra.mxu0 %vm395_vm0, %v2598_v18 }
  0x2a   : > { %2704 = vmatprep.mubr.msk.f32.mxu0 %vm395_vm0, %v2601_v19 }
  0x2d   : > { %2705 = vmatmul.mubr.msk.f32.gmra.mxu0 %vm395_vm0, %v2602_v20 }
  0x2e   : > { %2707 = vmatprep.mubr.msk.f32.mxu0 %vm395_vm0, %v2605_v21 }
  0x31   : > { %2708 = vmatmul.mubr.msk.f32.gmra.mxu0 %vm395_vm0, %v2606_v22 }
  0xe5   : > { %v2700_v35 = vpop.f32.mrf.mxu0 }
  0xe6   : > { %567 = vst.msk [vmem:[#allocation3 + $0x8] sm:$0xff] %vm565_vm2, %v2700_v35 }
  0xe7   : > { %v526_v36 = vpop.f32.mrf.mxu0 }
  0xe8   : > { %566 = vst.msk [vmem:[#allocation3] sm:$0xff] %vm565_vm2, %v526_v36 }
  0xe9   : > { %v2703_v37 = vpop.f32.mrf.mxu0 }
  0xea   : > { %569 = vst.msk [vmem:[#allocation3 + $0x18] sm:$0xff] %vm565_vm2, %v2703_v37 }
  0xeb   : > { %v536_v38 = vpop.f32.mrf.mxu0 }
  0xec   : > { %568 = vst.msk [vmem:[#allocation3 + $0x10] sm:$0xff] %vm565_vm2, %v536_v38 }
  0xed   : > { %v2706_v39 = vpop.f32.mrf.mxu0  ;;  %v575_v40 = vld [vmem:[#allocation3 + $0x8] sm:$0xff] }
  0xee   : > { %571 = vst.msk [vmem:[#allocation3 + $0x28] sm:$0xff] %vm565_vm2, %v2706_v39  ;;  %819 = vrot.lane.b32.xlu0 %v575_v40, %s3076_s22 }
  0xef   : > { %v546_v41 = vpop.f32.mrf.mxu0  ;;  %v574_v42 = vld [vmem:[#allocation3] sm:$0xff] }
  0xf0   : > { %570 = vst.msk [vmem:[#allocation3 + $0x20] sm:$0xff] %vm565_vm2, %v546_v41  ;;  %2712 = vmatprep.mubr.msk.f32.mxu1 %vm603_vm3, %v574_v42 }
  0xf1   : > { %v2709_v43 = vpop.f32.mrf.mxu0  ;;  %2713 = vmatmul.mubr.msk.f32.vlgmr.msra.gmra.mxu1 %vm603_vm3, %v575_v40  ;;  %v577_v44 = vld [vmem:[#allocation3 + $0x18] sm:$0xff] }
  0xf2   : > { %573 = vst.msk [vmem:[#allocation3 + $0x38] sm:$0xff] %vm565_vm2, %v2709_v43  ;;  %817 = vrot.lane.b32.xlu0 %v574_v42, %s3076_s22  ;;  %823 = vrot.lane.b32.xlu1 %v577_v44, %s3076_s22 }
  0xf3   : > { %v556_v45 = vpop.f32.mrf.mxu0  ;;  %v576_v46 = vld [vmem:[#allocation3 + $0x10] sm:$0xff] }
  0xf4   : > { %572 = vst.msk [vmem:[#allocation3 + $0x30] sm:$0xff] %vm565_vm2, %v556_v45  ;;  %2715 = vmatprep.mubr.msk.f32.mxu1 %vm603_vm3, %v576_v46 }
  0xf5   : > { %2716 = vmatmul.mubr.msk.f32.gmra.mxu1 %vm603_vm3, %v577_v44  ;;  %v579_v48 = vld [vmem:[#allocation3 + $0x28] sm:$0xff] }
  0xf6   : > { %821 = vrot.lane.b32.xlu1 %v576_v46, %s3076_s22 }
  0xf7   : > { %v578_v47 = vld [vmem:[#allocation3 + $0x20] sm:$0xff] }
  0xf8   : > { %825 = vrot.lane.b32.xlu0 %v578_v47, %s3076_s22  ;;  %2718 = vmatprep.mubr.msk.f32.mxu1 %vm603_vm3, %v578_v47 }
  0xf9   : > { %2719 = vmatmul.mubr.msk.f32.gmra.mxu1 %vm603_vm3, %v579_v48  ;;  %v581_v50 = vld [vmem:[#allocation3 + $0x38] sm:$0xff] }
  0xfa   : > { %827 = vrot.lane.b32.xlu1 %v579_v48, %s3076_s22 }
  0xfb   : > { %v580_v49 = vld [vmem:[#allocation3 + $0x30] sm:$0xff] }
  0xfc   : > { %829 = vrot.lane.b32.xlu0 %v580_v49, %s3076_s22  ;;  %2721 = vmatprep.mubr.msk.f32.mxu1 %vm603_vm3, %v580_v49 }
  0xfd   : > { %2722 = vmatmul.mubr.msk.f32.gmra.mxu1 %vm603_vm3, %v581_v50 }
  0xfe   : > { %831 = vrot.lane.b32.xlu1 %v581_v50, %s3076_s22 }
 0x160   : > { %v820_v51 = vpop.permute.xlu0 %819 }
 0x161   : > { %843 = vst.msk [vmem:[#allocation5 + $0x8] sm:$0xff] %vm841_vm4, %v820_v51 }
 0x164   : > { %v818_v52 = vpop.permute.xlu0 %817  ;;  %v824_v53 = vpop.permute.xlu1 %823 }
 0x165   : > { %842 = vst.msk [vmem:[#allocation5] sm:$0xff] %vm841_vm4, %v818_v52  ;;  %845 = vst.msk [vmem:[#allocation5 + $0x18] sm:$0xff] %vm841_vm4, %v824_v53 }
 0x168   : > { %v822_v54 = vpop.permute.xlu1 %821 }
 0x169   : > { %844 = vst.msk [vmem:[#allocation5 + $0x10] sm:$0xff] %vm841_vm4, %v822_v54 }
 0x16a   : > { %v826_v55 = vpop.permute.xlu0 %825 }
 0x16b   : > { %846 = vst.msk [vmem:[#allocation5 + $0x20] sm:$0xff] %vm841_vm4, %v826_v55 }
 0x16c   : > { %v828_v56 = vpop.permute.xlu1 %827 }
 0x16d   : > { %847 = vst.msk [vmem:[#allocation5 + $0x28] sm:$0xff] %vm841_vm4, %v828_v56 }
 0x16e   : > { %v830_v57 = vpop.permute.xlu0 %829 }
 0x16f   : > { %848 = vst.msk [vmem:[#allocation5 + $0x30] sm:$0xff] %vm841_vm4, %v830_v57 }
 0x170   : > { %v832_v58 = vpop.permute.xlu1 %831 }
 0x171   : > { %849 = vst.msk [vmem:[#allocation5 + $0x38] sm:$0xff] %vm841_vm4, %v832_v58 }
 0x1b1   : > { %v2714_v60 = vpop.f32.mrf.mxu1 }
 0x1b2   : > { %v3245_v61 = vadd.f32 %v2714_v60, %v2542_v59 }
 0x1b3   : > { %v698_v62 = vpop.f32.mrf.mxu1 }
 0x1b4   : > { %v738_v63 = vmin.f32 %v3245_v61, 20.0  ;;  %v3248_v0 = vadd.f32 %v2542_v59, %v698_v62  ;;  %vm746_vm5 = vcmp.gt.f32.partialorder %v3245_v61, 20.0 }
 0x1b5   : > { %v2717_v1 = vpop.f32.mrf.mxu1 }
 0x1b6   : > { %v755_v2 = vmul.f32 1.442695, %v738_v63  ;;  %v737_v3 = vmin.f32 %v3248_v0, 20.0  ;;  %v3251_v4 = vadd.f32 %v2717_v1, %v2542_v59  ;;  %vm745_vm6 = vcmp.gt.f32.partialorder %v3248_v0, 20.0 }
 0x1b7   : > { %v708_v5 = vpop.f32.mrf.mxu1 }
 0x1b8   : > { %2834 = vpow2.f32 %v755_v2  ;;  %v753_v6 = vmul.f32 1.442695, %v737_v3  ;;  %v740_v7 = vmin.f32 %v3251_v4, 20.0  ;;  %v3254_v8 = vadd.f32 %v2542_v59, %v708_v5 }
 0x1b9   : > { %v2720_v9 = vpop.f32.mrf.mxu1  ;;  %vm748_vm7 = vcmp.gt.f32.partialorder %v3251_v4, 20.0 }
 0x1ba   : > { %2836 = vpow2.f32 %v753_v6  ;;  %v759_v10 = vmul.f32 1.442695, %v740_v7  ;;  %v3256_v11 = vadd.f32 %v2720_v9, %v2542_v59  ;;  %v739_v12 = vmin.f32 %v3254_v8, 20.0 }
 0x1bb   : > { %v718_v13 = vpop.f32.mrf.mxu1  ;;  %vm747_vm8 = vcmp.gt.f32.partialorder %v3254_v8, 20.0  ;;  %v3293_v7 = vmov 0.0  }
 0x1bc   : > { %2838 = vpow2.f32 %v759_v10  ;;  %v742_v14 = vmin.f32 %v3256_v11, 20.0  ;;  %v3260_v15 = vadd.f32 %v2542_v59, %v718_v13  ;;  %v757_v16 = vmul.f32 1.442695, %v739_v12 }
 0x1bd   : > { %v2723_v17 = vpop.f32.mrf.mxu1  ;;  %vm750_vm9 = vcmp.gt.f32.partialorder %v3256_v11, 20.0 }
 0x1be   : > { %v763_v18 = vmul.f32 1.442695, %v742_v14  ;;  %v741_v19 = vmin.f32 %v3260_v15, 20.0  ;;  %v3263_v20 = vadd.f32 %v2723_v17, %v2542_v59  ;;  %2840 = vpow2.f32 %v757_v16 }
 0x1bf   : > { %v728_v21 = vpop.f32.mrf.mxu1  ;;  %vm749_vm10 = vcmp.gt.f32.partialorder %v3260_v15, 20.0 }
 0x1c0   : > { %2842 = vpow2.f32 %v763_v18  ;;  %v761_v22 = vmul.f32 1.442695, %v741_v19  ;;  %v744_v23 = vmin.f32 %v3263_v20, 20.0  ;;  %v3266_v24 = vadd.f32 %v2542_v59, %v728_v21 }
 0x1c1   : > { %vm752_vm11 = vcmp.gt.f32.partialorder %v3263_v20, 20.0 }
 0x1c2   : > { %2844 = vpow2.f32 %v761_v22  ;;  %v767_v25 = vmul.f32 1.442695, %v744_v23  ;;  %v743_v26 = vmin.f32 %v3266_v24, 20.0  ;;  %vm751_vm12 = vcmp.gt.f32.partialorder %v3266_v24, 20.0 }
 0x1c4   : > { %2846 = vpow2.f32 %v767_v25  ;;  %v765_v28 = vmul.f32 1.442695, %v743_v26 }
 0x1c5   : > { %v2835_v27 = vpop.eup %2834 }
 0x1c6   : > { %v770_v29 = vadd.f32 1.0, %v2835_v27  ;;  %2848 = vpow2.f32 %v765_v28 }
 0x1c7   : > { %v2837_v32 = vpop.eup %2836 }
 0x1c8   : > { %2850 = vlog2.f32 %v770_v29  ;;  %v769_v33 = vadd.f32 1.0, %v2837_v32 }
 0x1c9   : > { %v2839_v35 = vpop.eup %2838 }
 0x1ca   : > { %2852 = vlog2.f32 %v769_v33  ;;  %v772_v36 = vadd.f32 1.0, %v2839_v35 }
 0x1cb   : > { %v2841_v37 = vpop.eup %2840 }
 0x1cc   : > { %2854 = vlog2.f32 %v772_v36  ;;  %v771_v39 = vadd.f32 1.0, %v2841_v37 }
 0x1cd   : > { %v2843_v38 = vpop.eup %2842 }
 0x1ce   : > { %v774_v40 = vadd.f32 1.0, %v2843_v38  ;;  %2856 = vlog2.f32 %v771_v39 }
 0x1cf   : > { %v2845_v41 = vpop.eup %2844 }
 0x1d0   : > { %2858 = vlog2.f32 %v774_v40  ;;  %v773_v42 = vadd.f32 1.0, %v2845_v41 }
 0x1d1   : > { %v2847_v43 = vpop.eup %2846 }
 0x1d2   : > { %2860 = vlog2.f32 %v773_v42  ;;  %v776_v44 = vadd.f32 1.0, %v2847_v43 }
 0x1d3   : > { %v2849_v45 = vpop.eup %2848 }
 0x1d4   : > { %2862 = vlog2.f32 %v776_v44  ;;  %v775_v47 = vadd.f32 1.0, %v2849_v45 }
 0x1d5   : > { %v2851_v46 = vpop.eup %2850 }
 0x1d6   : > { %v780_v48 = vmul.f32 0.6931472, %v2851_v46  ;;  %2864 = vlog2.f32 %v775_v47 }
 0x1d7   : > { %v2853_v49 = vpop.eup %2852 }
 0x1d8   : > { %v794_v50 = vsel %vm746_vm5, %v3245_v61, %v780_v48  ;;  %v778_v51 = vmul.f32 0.6931472, %v2853_v49 }
 0x1d9   : > { %v2855_v52 = vpop.eup %2854  ;;  %802 = vst.msk [vmem:[#allocation4 + $0x8] sm:$0xff] %vm395_vm0, %v794_v50 }
 0x1da   : > { %v793_v53 = vsel %vm745_vm6, %v3248_v0, %v778_v51  ;;  %v784_v54 = vmul.f32 0.6931472, %v2855_v52 }
 0x1db   : > { %801 = vst.msk [vmem:[#allocation4] sm:$0xff] %vm395_vm0, %v793_v53  ;;  %v2857_v55 = vpop.eup %2856 }
 0x1dc   : > { %v796_v56 = vsel %vm748_vm7, %v3251_v4, %v784_v54  ;;  %v782_v58 = vmul.f32 0.6931472, %v2857_v55 }
 0x1dd   : > { %v2859_v57 = vpop.eup %2858  ;;  %804 = vst.msk [vmem:[#allocation4 + $0x18] sm:$0xff] %vm395_vm0, %v796_v56 }
 0x1de   : > { %v788_v59 = vmul.f32 0.6931472, %v2859_v57  ;;  %v795_v61 = vsel %vm747_vm8, %v3254_v8, %v782_v58  ;;  %v3295_v8 = vmov 0.0  }
 0x1df   : > { %v2861_v60 = vpop.eup %2860  ;;  %803 = vst.msk [vmem:[#allocation4 + $0x10] sm:$0xff] %vm395_vm0, %v795_v61 }
 0x1e0   : > { %v798_v62 = vsel %vm750_vm9, %v3256_v11, %v788_v59  ;;  %v786_v63 = vmul.f32 0.6931472, %v2861_v60 }
 0x1e1   : > { %v2863_v0 = vpop.eup %2862  ;;  %806 = vst.msk [vmem:[#allocation4 + $0x28] sm:$0xff] %vm395_vm0, %v798_v62 }
 0x1e2   : > { %v797_v1 = vsel %vm749_vm10, %v3260_v15, %v786_v63  ;;  %v792_v2 = vmul.f32 0.6931472, %v2863_v0 }
 0x1e3   : > { %805 = vst.msk [vmem:[#allocation4 + $0x20] sm:$0xff] %vm395_vm0, %v797_v1  ;;  %v2865_v3 = vpop.eup %2864 }
 0x1e4   : > { %v800_v4 = vsel %vm752_vm11, %v3263_v20, %v792_v2  ;;  %v790_v5 = vmul.f32 0.6931472, %v2865_v3 }
 0x1e5   : > { %808 = vst.msk [vmem:[#allocation4 + $0x38] sm:$0xff] %vm395_vm0, %v800_v4 }
 0x1e6   : > { %v799_v6 = vsel %vm751_vm12, %v3266_v24, %v790_v5 }
 0x1e7   : > { %807 = vst.msk [vmem:[#allocation4 + $0x30] sm:$0xff] %vm395_vm0, %v799_v6 }
 0x1e8 LB: >> { %v879_v9 = vlaneseq  ;;  %v3077_v10 = vmov 1966171168   ;;  %s3309_s15 = sshll.u32 %s3062_s13, 3  ;;  %vm1391_vm13 = vcmask 1040384   ;;  %vm1394_vm14 = vcmask 1042432   ;;  %s864_s13 = sadd.s32 1, %s3062_s13   ;;  %s3062_s13 = sphi %s3297_s13, %s864_s13   ;;  %v3058_v8 = vphi %v3295_v8, %v3519_v8   ;;  %v3054_v7 = vphi %v3293_v7, %v3835_v7  }
 0x1e9   : >> { %v877_v11 = vunpack.c.l.s4 %v3077_v10  ;;  %s872_s16 = scalar_lea.vmem [#allocation5], %s3309_s15  ;;  %s870_s18 = scalar_lea.vmem [#allocation2], %s3309_s15  ;;  %vm1396_vm15 = vcmask 1043456   ;;  %vm1398_vm2 = vcmask 1044480   ;;  %vm1400_vm5 = vcmask 1045504  }
 0x1ea   : >> { %v3311_v12 = vshrl.u32 %v879_v9, 7  ;;  %v3314_v13 = vld [vmem:[%s872_s16] sm:$0xff]  ;;  %s868_s19 = scalar_lea.vmem [#allocation4], %s3309_s15  ;;  %vm1402_vm6 = vcmask 1046528   ;;  %s1412_s20 = scalar_lea.vmem [#allocation6], %s3309_s15 }
 0x1eb   : >> { %v878_v16 = vunpack.c.0.s8 %v877_v11  ;;  %v3330_v19 = vld [vmem:[%s870_s18] sm:$0xff]  ;;  %p861_p7 = scmp.ge.s32.totalorder %s864_s13, 8  }
 0x1ec   : >> { %v3317_v14 = vsub.s32 0, %v3311_v12  ;;  %v1076_v15 = vsub.s32 1, %v3311_v12  ;;  %v1087_v21 = vsub.s32 2, %v3311_v12  ;;  %v1098_v32 = vsub.s32 3, %v3311_v12  ;;  %s3078_s21 = smov (%p861_p7), 94   ;;  %s3079_s28 = smov (%p861_p7), 92  }
 0x1ed   : >> { %v3337_v22 = vsub.s32 %v878_v16, %v3311_v12  ;;  %v1109_v36 = vsub.s32 4, %v3311_v12  ;;  %v1120_v61 = vsub.s32 5, %v3311_v12  ;;  %v1131_v6 = vsub.s32 6, %v3311_v12 }
 0x1ee   : >> { %v3323_v17 = vrot.slane %v3314_v13, %v1076_v15  ;;  %v3327_v18 = vrot.slane %v3314_v13, %v3317_v14  ;;  %v869_v20 = vld [vmem:[%s868_s19] sm:$0xff]  ;;  %v1088_v29 = vrot.slane %v3314_v13, %v1087_v21  ;;  %v1099_v48 = vrot.slane %v3314_v13, %v1098_v32 }
 0x1ef   : >> { %v875_v23 = vcombine.high %v869_v20, %v869_v20  ;;  %v1012_v24 = vmul.f32 %v3330_v19, %v869_v20  ;;  %v882_v25 = vrot.slane %v869_v20, %v3337_v22  ;;  %v1110_v54 = vrot.slane %v3314_v13, %v1109_v36 }
 0x1f0   : >> { %1079 = vbcast.lane.b32.xlu1 %v3323_v17, 256  ;;  %1068 = vbcast.lane.b32.xlu0 %v3327_v18, 256  ;;  %v1121_v5 = vrot.slane %v3314_v13, %v1120_v61  ;;  %v1132_v16 = vrot.slane %v3314_v13, %v1131_v6 }
 0x1f1   : >> { %v889_v26 = vrot.slane %v875_v23, %v3337_v22  ;;  %v1021_v27 = vrot.slane %v1012_v24, %v3337_v22  ;;  %v1014_v28 = vcombine.high %v1012_v24, %v1012_v24  ;;  %v890_v33 = vcombine.high %v882_v25, %v882_v25 }
 0x1f2   : >> { %v898_v35 = vrot.slane %v882_v25, %v3337_v22  ;;  %v1142_v25 = vsub.s32 7, %v3311_v12 }
 0x1f3   : >> { %v905_v37 = vrot.slane %v889_v26, %v3337_v22  ;;  %v1029_v38 = vcombine.high %v1021_v27, %v1021_v27  ;;  %v1037_v39 = vrot.slane %v1021_v27, %v3337_v22  ;;  %v912_v40 = vrot.slane %v890_v33, %v3337_v22 }
 0x1f4   : >> { %1083 = vbcast.lane.b32.xlu1 %v3323_v17, 264  ;;  %1072 = vbcast.lane.b32.xlu0 %v3327_v18, 264  ;;  %v920_v41 = vcombine.high %v898_v35, %v898_v35  ;;  %v3355_v42 = vrot.slane %v898_v35, %v3317_v14  ;;  %v1028_v43 = vrot.slane %v1014_v28, %v3337_v22 }
 0x1f5   : >> { %v891_v44 = vcombine.high %v889_v26, %v889_v26  ;;  %v3359_v45 = vrot.slane %v905_v37, %v3317_v14  ;;  %v1051_v46 = vrot.slane %v1029_v38, %v3337_v22  ;;  %v3363_v47 = vrot.slane %v1037_v39, %v3317_v14 }
 0x1f6   : >> { %v3369_v49 = vrot.slane %v912_v40, %v3317_v14  ;;  %v3372_v50 = vrot.slane %v920_v41, %v3317_v14  ;;  %v1059_v52 = vcombine.high %v1037_v39, %v1037_v39  ;;  %v1044_v55 = vrot.slane %v1028_v43, %v3337_v22 }
 0x1f7   : >> { %v3375_v51 = vrot.slane %v1051_v46, %v3317_v14  ;;  %v1061_v53 = vcombine.high %v1051_v46, %v1051_v46  ;;  %v1030_v56 = vcombine.high %v1028_v43, %v1028_v43  ;;  %v919_v57 = vrot.slane %v891_v44, %v3337_v22 }
 0x1f8   : >> { %1094 = vbcast.lane.b32.xlu1 %v1088_v29, 264  ;;  %1090 = vbcast.lane.b32.xlu0 %v1088_v29, 256  ;;  %v922_v58 = vcombine.high %v912_v40, %v912_v40  ;;  %v3383_v59 = vrot.slane %v1059_v52, %v3317_v14  ;;  %v3390_v62 = vrot.slane %v1044_v55, %v3317_v14 }
 0x1f9   : >> { %v3386_v60 = vrot.slane %v1061_v53, %v3317_v14  ;;  %v1058_v63 = vrot.slane %v1030_v56, %v3337_v22  ;;  %v1060_v0 = vcombine.high %v1044_v55, %v1044_v55  ;;  %v921_v3 = vcombine.high %v905_v37, %v905_v37 }
 0x1fa   : >> { %v939_v4 = vrot.slane %v922_v58, %v3317_v14  ;;  %v923_v9 = vcombine.high %v919_v57, %v919_v57  ;;  %v947_v10 = vrot.slane %v919_v57, %v3317_v14  ;;  %v1143_v26 = vrot.slane %v3314_v13, %v1142_v25 }
 0x1fb   : >> { %v3394_v1 = vrot.slane %v1058_v63, %v3317_v14  ;;  %v3397_v2 = vrot.slane %v1060_v0, %v3317_v14  ;;  %v3406_v11 = vrot.slane %v921_v3, %v3317_v14  ;;  %v1062_v23 = vcombine.high %v1058_v63, %v1058_v63 }
 0x1fc   : >> { %1105 = vbcast.lane.b32.xlu1 %v1099_v48, 264  ;;  %1101 = vbcast.lane.b32.xlu0 %v1099_v48, 256  ;;  %v3412_v20 = vrot.slane %v923_v9, %v3317_v14  ;;  %v966_v13 = vmul.f32 %v3369_v49, %v3182_v30  ;;  %v968_v35 = vmul.f32 %v3372_v50, %v3182_v30 }
 0x1fd   : >> { %v3415_v24 = vrot.slane %v1062_v23, %v3317_v14  ;;  %v969_v38 = vmul.f32 %v3372_v50, %v3184_v31  ;;  %v970_v40 = vmul.f32 %v939_v4, %v3182_v30  ;;  %v972_v44 = vmul.f32 %v3359_v45, %v3182_v30 }
 0x1fe   : >> { %v984_v33 = vmul.f32 1.442695, %v966_v13  ;;  %v988_v39 = vmul.f32 1.442695, %v968_v35  ;;  %v974_v52 = vmul.f32 %v947_v10, %v3182_v30  ;;  %v976_v63 = vmul.f32 %v3406_v11, %v3182_v30 }
 0x1ff   : >> { %v990_v41 = vmul.f32 1.442695, %v969_v38  ;;  %v992_v43 = vmul.f32 1.442695, %v970_v40  ;;  %v996_v50 = vmul.f32 1.442695, %v972_v44  ;;  %v977_v9 = vmul.f32 %v3406_v11, %v3184_v31 }
 0x200   : >> { %1116 = vbcast.lane.b32.xlu1 %v1110_v54, 264  ;;  %1112 = vbcast.lane.b32.xlu0 %v1110_v54, 256  ;;  %v1004_v23 = vmul.f32 1.442695, %v976_v63 }
 0x201   : >> { %v1006_v11 = vmul.f32 1.442695, %v977_v9 }
 0x204   : >> { %1127 = vbcast.lane.b32.xlu1 %v1121_v5, 264  ;;  %1123 = vbcast.lane.b32.xlu0 %v1121_v5, 256 }
 0x208   : >> { %1138 = vbcast.lane.b32.xlu1 %v1132_v16, 264  ;;  %1134 = vbcast.lane.b32.xlu0 %v1132_v16, 256 }
 0x20c   : >> { %1213 = vbcast.lane.b32.xlu1 %v3327_v18, 280  ;;  %1209 = vbcast.lane.b32.xlu0 %v3327_v18, 272  ;;  %v965_v18 = vmul.f32 %v3355_v42, %v3184_v31 }
 0x20e   : >> { %v982_v28 = vmul.f32 1.442695, %v965_v18 }
 0x210   : >> { %1221 = vbcast.lane.b32.xlu1 %v3323_v17, 280  ;;  %1217 = vbcast.lane.b32.xlu0 %v3323_v17, 272  ;;  %v964_v17 = vmul.f32 %v3355_v42, %v3182_v30  ;;  %v971_v42 = vmul.f32 %v939_v4, %v3184_v31 }
 0x212   : >> { %v980_v27 = vmul.f32 1.442695, %v964_v17 }
 0x214   : >> { %1229 = vbcast.lane.b32.xlu1 %v1088_v29, 280  ;;  %1225 = vbcast.lane.b32.xlu0 %v1088_v29, 272  ;;  %2867 = vpow2.f32 %v980_v27  ;;  %v967_v29 = vmul.f32 %v3369_v49, %v3184_v31  ;;  %v973_v49 = vmul.f32 %v3359_v45, %v3184_v31  ;;  %v1000_v45 = vmul.f32 1.442695, %v974_v52 }
 0x215   : >> { %2869 = vpow2.f32 %v982_v28 }
 0x216   : >> { %v986_v37 = vmul.f32 1.442695, %v967_v29  ;;  %2871 = vpow2.f32 %v984_v33  ;;  %v998_v58 = vmul.f32 1.442695, %v973_v49 }
 0x218   : >> { %1149 = vbcast.lane.b32.xlu1 %v1143_v26, 264  ;;  %1145 = vbcast.lane.b32.xlu0 %v1143_v26, 256  ;;  %2873 = vpow2.f32 %v986_v37  ;;  %v979_v37 = vmul.f32 %v3412_v20, %v3184_v31 }
 0x219   : >> { %2875 = vpow2.f32 %v988_v39 }
 0x21a   : >> { %2877 = vpow2.f32 %v990_v41 }
 0x21b   : >> { %2879 = vpow2.f32 %v992_v43 }
 0x21c   : >> { %1237 = vbcast.lane.b32.xlu1 %v1099_v48, 280  ;;  %1233 = vbcast.lane.b32.xlu0 %v1099_v48, 272  ;;  %v994_v48 = vmul.f32 1.442695, %v971_v42 }
 0x21e   : >> { %2881 = vpow2.f32 %v994_v48 }
 0x21f   : >> { %2883 = vpow2.f32 %v996_v50  ;;  %v1010_v50 = vmul.f32 1.442695, %v979_v37 }
 0x220   : >> { %1245 = vbcast.lane.b32.xlu1 %v1110_v54, 280  ;;  %1241 = vbcast.lane.b32.xlu0 %v1110_v54, 272  ;;  %v975_v54 = vmul.f32 %v947_v10, %v3184_v31  ;;  %2885 = vpow2.f32 %v998_v58 }
 0x221   : >> { %v2868_v46 = vpop.eup %2867  ;;  %2887 = vpow2.f32 %v1000_v45 }
 0x222   : >> { %v1271_v53 = vmul.f32 %v3058_v8, %v2868_v46  ;;  %v2870_v55 = vpop.eup %2869  ;;  %v1002_v8 = vmul.f32 1.442695, %v975_v54 }
 0x223   : >> { %v2872_v3 = vpop.eup %2871  ;;  %v1272_v4 = vmul.f32 %v3054_v7, %v2870_v55 }
 0x224   : >> { %1253 = vbcast.lane.b32.xlu1 %v1121_v5, 280  ;;  %1249 = vbcast.lane.b32.xlu0 %v1121_v5, 272  ;;  %2889 = vpow2.f32 %v1002_v8 }
 0x225   : >> { %v2874_v17 = vpop.eup %2873  ;;  %2891 = vpow2.f32 %v1004_v23 }
 0x226   : >> { %v2876_v13 = vpop.eup %2875  ;;  %2893 = vpow2.f32 %v1006_v11 }
 0x227   : >> { %v2878_v39 = vpop.eup %2877 }
 0x228   : >> { %1261 = vbcast.lane.b32.xlu1 %v1132_v16, 280  ;;  %1257 = vbcast.lane.b32.xlu0 %v1132_v16, 272  ;;  %v2880_v43 = vpop.eup %2879 }
 0x22c   : >> { %1269 = vbcast.lane.b32.xlu1 %v1143_v26, 280  ;;  %1265 = vbcast.lane.b32.xlu0 %v1143_v26, 272  ;;  %v978_v26 = vmul.f32 %v3412_v20, %v3182_v30  ;;  %v2882_v20 = vpop.eup %2881 }
 0x22d   : >> { %v2884_v55 = vpop.eup %2883 }
 0x22e   : >> { %v1008_v38 = vmul.f32 1.442695, %v978_v26 }
 0x230   : >> { %2895 = vpow2.f32 %v1008_v38 }
 0x231   : >> { %2897 = vpow2.f32 %v1010_v50 }
 0x262   : >> { %v1080_v56 = vpop.permute.xlu1 %1079  ;;  %v1069_v57 = vpop.permute.xlu0 %1068 }
 0x263   : >> { %v1191_v0 = vmul.f32 %v3363_v47, %v1069_v57  ;;  %v1193_v18 = vmul.f32 %v3375_v51, %v1080_v56 }
 0x265   : >> { %v3450_v5 = vadd.f32 %v1271_v53, %v1191_v0  ;;  %v2886_v0 = vpop.eup %2885 }
 0x266   : >> { %v1084_v10 = vpop.permute.xlu1 %1083  ;;  %v1073_v16 = vpop.permute.xlu0 %1072 }
 0x267   : >> { %v1192_v27 = vmul.f32 %v3363_v47, %v1073_v16  ;;  %v1286_v7 = vmul.f32 %v2872_v3, %v3450_v5  ;;  %v1194_v47 = vmul.f32 %v3375_v51, %v1084_v10  ;;  %v2888_v8 = vpop.eup %2887 }
 0x268   : >> { %v2890_v16 = vpop.eup %2889 }
 0x269   : >> { %v3459_v28 = vadd.f32 %v1272_v4, %v1192_v27  ;;  %v3461_v29 = vadd.f32 %v1286_v7, %v1193_v18 }
 0x26a   : >> { %v1095_v33 = vpop.permute.xlu1 %1094  ;;  %v1091_v35 = vpop.permute.xlu0 %1090 }
 0x26b   : >> { %v1195_v40 = vmul.f32 %v3383_v59, %v1091_v35  ;;  %v1287_v41 = vmul.f32 %v2874_v17, %v3459_v28  ;;  %v1301_v42 = vmul.f32 %v2876_v13, %v3461_v29  ;;  %v1196_v52 = vmul.f32 %v3383_v59, %v1095_v33  ;;  %v2892_v17 = vpop.eup %2891 }
 0x26c   : >> { %v2894_v33 = vpop.eup %2893 }
 0x26d   : >> { %v1289_v44 = vadd.f32 %v1287_v41, %v1194_v47  ;;  %v3469_v46 = vadd.f32 %v1301_v42, %v1195_v40  ;;  %v2896_v38 = vpop.eup %2895 }
 0x26e   : >> { %v1106_v48 = vpop.permute.xlu1 %1105  ;;  %v1102_v49 = vpop.permute.xlu0 %1101 }
 0x26f   : >> { %v1197_v51 = vmul.f32 %v3386_v60, %v1102_v49  ;;  %v1302_v53 = vmul.f32 %v2878_v39, %v1289_v44  ;;  %v1316_v54 = vmul.f32 %v2880_v43, %v3469_v46  ;;  %v1198_v45 = vmul.f32 %v3386_v60, %v1106_v48  ;;  %v2898_v50 = vpop.eup %2897 }
 0x271   : >> { %v1304_v56 = vadd.f32 %v1302_v53, %v1196_v52  ;;  %v3474_v57 = vadd.f32 %v1316_v54, %v1197_v51 }
 0x272   : >> { %v1117_v58 = vpop.permute.xlu1 %1116  ;;  %v1113_v63 = vpop.permute.xlu0 %1112 }
 0x273   : >> { %v1199_v3 = vmul.f32 %v3390_v62, %v1113_v63  ;;  %v1317_v4 = vmul.f32 %v2882_v20, %v1304_v56  ;;  %v1331_v59 = vmul.f32 %v2884_v55, %v3474_v57  ;;  %v1200_v18 = vmul.f32 %v3390_v62, %v1117_v58 }
 0x275   : >> { %v3479_v9 = vadd.f32 %v1317_v4, %v1198_v45  ;;  %v3481_v10 = vadd.f32 %v1331_v59, %v1199_v3 }
 0x276   : >> { %v1128_v23 = vpop.permute.xlu1 %1127  ;;  %v1124_v26 = vpop.permute.xlu0 %1123 }
 0x277   : >> { %v1201_v27 = vmul.f32 %v3394_v1, %v1124_v26  ;;  %v1332_v60 = vmul.f32 %v2886_v0, %v3479_v9  ;;  %v1346_v7 = vmul.f32 %v2888_v8, %v3481_v10  ;;  %v1202_v39 = vmul.f32 %v3394_v1, %v1128_v23 }
 0x279   : >> { %v3487_v13 = vadd.f32 %v1332_v60, %v1200_v18  ;;  %v3489_v11 = vadd.f32 %v1346_v7, %v1201_v27 }
 0x27a   : >> { %v1139_v35 = vpop.permute.xlu1 %1138  ;;  %v1135_v37 = vpop.permute.xlu0 %1134 }
 0x27b   : >> { %v1203_v47 = vmul.f32 %v3397_v2, %v1135_v37  ;;  %v1347_v62 = vmul.f32 %v2890_v16, %v3487_v13  ;;  %v1361_v40 = vmul.f32 %v2892_v17, %v3489_v11  ;;  %v1204_v43 = vmul.f32 %v3397_v2, %v1139_v35 }
 0x27d   : >> { %v3495_v41 = vadd.f32 %v1347_v62, %v1202_v39  ;;  %v3497_v42 = vadd.f32 %v1361_v40, %v1203_v47 }
 0x27e   : >> { %v1214_v48 = vpop.permute.xlu1 %1213  ;;  %v1210_v49 = vpop.permute.xlu0 %1209 }
 0x27f   : >> { %v1276_v20 = vmul.f32 %v3459_v28, %v1214_v48  ;;  %v1275_v52 = vmul.f32 %v3450_v5, %v1210_v49  ;;  %v1362_v1 = vmul.f32 %v2894_v33, %v3495_v41  ;;  %v1376_v51 = vmul.f32 %v2896_v38, %v3497_v42 }
 0x281   : >> { %v1278_v53 = vsel %vm395_vm0, %v1276_v20, 0.0  ;;  %v1277_v54 = vsel %vm395_vm0, %v1275_v52, 0.0  ;;  %v3506_v55 = vadd.f32 %v1362_v1, %v1204_v43 }
 0x282   : >> { %v1279_v58 = vadd.f32 %v1278_v53, %v1277_v54  ;;  %v1222_v63 = vpop.permute.xlu1 %1221  ;;  %v1218_v2 = vpop.permute.xlu0 %1217 }
 0x283   : >> { %v1291_v0 = vmul.f32 %v1289_v44, %v1222_v63  ;;  %v1290_v45 = vmul.f32 %v3461_v29, %v1218_v2  ;;  %v1377_v28 = vmul.f32 %v2898_v50, %v3506_v55 }
 0x284   : >> { %v1280_v3 = vrot.slane %v1279_v58, 4 }
 0x285   : >> { %v1293_v5 = vsel %vm395_vm0, %v1291_v0, 0.0  ;;  %v1292_v4 = vsel %vm395_vm0, %v1290_v45, 0.0 }
 0x286   : >> { %v1281_v59 = vadd.f32 %v1280_v3, %v1279_v58  ;;  %v1294_v8 = vadd.f32 %v1293_v5, %v1292_v4  ;;  %v1230_v16 = vpop.permute.xlu1 %1229  ;;  %v1226_v23 = vpop.permute.xlu0 %1225 }
 0x287   : >> { %v1306_v26 = vmul.f32 %v1304_v56, %v1230_v16  ;;  %v1305_v17 = vmul.f32 %v3469_v46, %v1226_v23 }
 0x288   : >> { %v1282_v18 = vrot.slane %v1281_v59, 2  ;;  %v1295_v27 = vrot.slane %v1294_v8, 4 }
 0x289   : >> { %v1308_v44 = vsel %vm395_vm0, %v1306_v26, 0.0  ;;  %v1307_v29 = vsel %vm395_vm0, %v1305_v17, 0.0 }
 0x28a   : >> { %v1283_v60 = vadd.f32 %v1282_v18, %v1281_v59  ;;  %v1296_v7 = vadd.f32 %v1295_v27, %v1294_v8  ;;  %v1309_v33 = vadd.f32 %v1308_v44, %v1307_v29  ;;  %v1150_v35 = vpop.permute.xlu1 %1149  ;;  %v1146_v37 = vpop.permute.xlu0 %1145 }
 0x28b   : >> { %v1206_v38 = vmul.f32 %v3415_v24, %v1150_v35  ;;  %v1205_v39 = vmul.f32 %v3415_v24, %v1146_v37 }
 0x28c   : >> { %v1297_v47 = vrot.slane %v1296_v7, 2  ;;  %v1310_v62 = vrot.slane %v1309_v33, 4  ;;  %v1284_v46 = vrot.slane %v1283_v60, 1 }
 0x28d   : >> { %v3517_v56 = vadd.f32 %v1377_v28, %v1206_v38   ;;  %v3519_v8 = vadd.f32 %v1376_v51, %v1205_v39  }
 0x28e   : >> { %v1298_v40 = vadd.f32 %v1297_v47, %v1296_v7  ;;  %v1311_v43 = vadd.f32 %v1310_v62, %v1309_v33  ;;  %v1238_v48 = vpop.permute.xlu1 %1237  ;;  %v1234_v49 = vpop.permute.xlu0 %1233  ;;  %v1285_v54 = vadd.f32 %v1284_v46, %v1283_v60 }
 0x28f   : >> { %v1321_v50 = vmul.f32 %v3479_v9, %v1238_v48  ;;  %v1320_v20 = vmul.f32 %v3474_v57, %v1234_v49 }
 0x290   : >> { %v1299_v52 = vrot.slane %v1298_v40, 1  ;;  %v1312_v1 = vrot.slane %v1311_v43, 2 }
 0x291   : >> { %v1323_v24 = vsel %vm395_vm0, %v1321_v50, 0.0  ;;  %v1322_v53 = vsel %vm395_vm0, %v1320_v20, 0.0 }
 0x292   : >> { %v1300_v58 = vadd.f32 %v1299_v52, %v1298_v40  ;;  %v1313_v51 = vadd.f32 %v1312_v1, %v1311_v43  ;;  %v1324_v63 = vadd.f32 %v1323_v24, %v1322_v53  ;;  %v1246_v2 = vpop.permute.xlu1 %1245  ;;  %v1242_v0 = vpop.permute.xlu0 %1241 }
 0x293   : >> { %v1336_v45 = vmul.f32 %v3487_v13, %v1246_v2  ;;  %v1335_v28 = vmul.f32 %v3481_v10, %v1242_v0 }
 0x294   : >> { %v1314_v9 = vrot.slane %v1313_v51, 1  ;;  %v1392_v57 = vsel %vm1391_vm13, %v1285_v54, %v1300_v58  ;;  %v1325_v3 = vrot.slane %v1324_v63, 4 }
 0x295   : >> { %v1338_v5 = vsel %vm395_vm0, %v1336_v45, 0.0  ;;  %v1337_v4 = vsel %vm395_vm0, %v1335_v28, 0.0 }
 0x296   : >> { %v1315_v59 = vadd.f32 %v1314_v9, %v1313_v51  ;;  %v1326_v16 = vadd.f32 %v1325_v3, %v1324_v63  ;;  %v1339_v23 = vadd.f32 %v1338_v5, %v1337_v4  ;;  %v1254_v26 = vpop.permute.xlu1 %1253  ;;  %v1250_v17 = vpop.permute.xlu0 %1249 }
 0x297   : >> { %v1351_v18 = vmul.f32 %v3495_v41, %v1254_v26  ;;  %v1350_v27 = vmul.f32 %v3489_v11, %v1250_v17 }
 0x298   : >> { %v1393_v13 = vsel %vm628_vm1, %v1392_v57, %v1315_v59  ;;  %v1327_v10 = vrot.slane %v1326_v16, 2  ;;  %v1340_v44 = vrot.slane %v1339_v23, 4 }
 0x299   : >> { %v1353_v29 = vsel %vm395_vm0, %v1351_v18, 0.0  ;;  %v1352_v60 = vsel %vm395_vm0, %v1350_v27, 0.0 }
 0x29a   : >> { %v1328_v7 = vadd.f32 %v1327_v10, %v1326_v16  ;;  %v1341_v33 = vadd.f32 %v1340_v44, %v1339_v23  ;;  %v1354_v35 = vadd.f32 %v1353_v29, %v1352_v60  ;;  %v1262_v37 = vpop.permute.xlu1 %1261  ;;  %v1258_v38 = vpop.permute.xlu0 %1257  ;;  %v1410_v10 = vmul.f32 %v3212_v34, %v3330_v19  ;;  %v1414_v19 = vld [vmem:[#allocation3] sm:$0xff] (%p861_p7) }
 0x29b   : >> { %v1366_v39 = vmul.f32 %v3506_v55, %v1262_v37  ;;  %v1365_v47 = vmul.f32 %v3497_v42, %v1258_v38  ;;  %v1417_v37 = vld [vmem:[#allocation3 + $0x18] sm:$0xff] (%p861_p7)  ;;  %v1418_v38 = vld [vmem:[#allocation3 + $0x20] sm:$0xff] (%p861_p7) }
 0x29c   : >> { %v1329_v41 = vrot.slane %v1328_v7, 1  ;;  %v1342_v62 = vrot.slane %v1341_v33, 2  ;;  %v1355_v11 = vrot.slane %v1354_v35, 4 }
 0x29d   : >> { %v1368_v46 = vsel %vm395_vm0, %v1366_v39, 0.0  ;;  %v1367_v40 = vsel %vm395_vm0, %v1365_v47, 0.0  ;;  %v1419_v39 = vld [vmem:[#allocation3 + $0x28] sm:$0xff] (%p861_p7)  ;;  %v1420_v47 = vld [vmem:[#allocation3 + $0x30] sm:$0xff] (%p861_p7) }
 0x29e   : >> { %v1330_v43 = vadd.f32 %v1329_v41, %v1328_v7  ;;  %v1343_v48 = vadd.f32 %v1342_v62, %v1341_v33  ;;  %v1356_v49 = vadd.f32 %v1355_v11, %v1354_v35  ;;  %v1369_v50 = vadd.f32 %v1368_v46, %v1367_v40  ;;  %v1270_v20 = vpop.permute.xlu1 %1269  ;;  %v1266_v52 = vpop.permute.xlu0 %1265  ;;  %v1415_v33 = vld [vmem:[#allocation3 + $0x8] sm:$0xff] (%p861_p7)  ;;  %v1416_v35 = vld [vmem:[#allocation3 + $0x10] sm:$0xff] (%p861_p7)  ;;  %v1421_v41 = vld [vmem:[#allocation3 + $0x38] sm:$0xff] (%p861_p7) }
 0x29f   : >> { %v1381_v1 = vmul.f32 %v3517_v56, %v1270_v20  ;;  %v1380_v55 = vmul.f32 %v3519_v8, %v1266_v52  ;;  %v3835_v7 = vmov %v3517_v56  ;;  %v2554_v62 = vld [vmem:[%s3200_s30 + $0x1] sm:$0x1] (%p861_p7)  ;;  %v2899_v46 = vpack.i.bf16 (%p861_p7), %v1415_v33, %v1414_v19 }
 0x2a0   : >> { %v1395_v42 = vsel %vm1394_vm14, %v1393_v13, %v1330_v43  ;;  %v1344_v24 = vrot.slane %v1343_v48, 1  ;;  %v1357_v53 = vrot.slane %v1356_v49, 2  ;;  %v1370_v54 = vrot.slane %v1369_v50, 4 }
 0x2a1   : >> { %v1383_v58 = vsel %vm395_vm0, %v1381_v1, 0.0  ;;  %v1382_v51 = vsel %vm395_vm0, %v1380_v55, 0.0  ;;  %v1436_v11 = vunpack.c.l.bf16 (%p861_p7), %v2554_v62  ;;  %v2909_v56 = vpack.i.bf16 (%p861_p7), %v1419_v39, %v1418_v38  ;;  %2900 = vrot.lane.b32.xlu0 (%p861_p7), %v2899_v46, %s3078_s21 }
 0x2a2   : >> { %v1345_v63 = vadd.f32 %v1344_v24, %v1343_v48  ;;  %v1358_v2 = vadd.f32 %v1357_v53, %v1356_v49  ;;  %v1371_v0 = vadd.f32 %v1370_v54, %v1369_v50  ;;  %v1384_v45 = vadd.f32 %v1383_v58, %v1382_v51  ;;  %v2567_v24 = vld [vmem:[%s3157_s14 + $0x18] sm:$0xff] (%p861_p7) }
 0x2a3   : > { %2724 = vmatprep.subr.msk.mxu1 (%p861_p7), %vm628_vm1, %v1436_v11  ;;  %v2904_v8 = vpack.i.bf16 (%p861_p7), %v1417_v37, %v1416_v35  ;;  %2910 = vrot.lane.b32.xlu1 (%p861_p7), %v2909_v56, %s3078_s21  ;;  %v2914_v30 = vpack.i.bf16 (%p861_p7), %v1421_v41, %v1420_v47  ;;  %v1710_v54 = vmul.f32 (%p861_p7), 1.442695, %v2567_v24 }
 0x2a4   : >> { %v1397_v28 = vsel %vm1396_vm15, %v1395_v42, %v1345_v63  ;;  %v1359_v9 = vrot.slane %v1358_v2, 1  ;;  %v1372_v57 = vrot.slane %v1371_v0, 2  ;;  %v1385_v3 = vrot.slane %v1384_v45, 4  ;;  %2725 = vmatpush3.msk.msra.mxu1 (%p861_p7), %vm628_vm1, %v1436_v11  ;;  %v2566_v42 = vld [vmem:[%s3157_s14 + $0x10] sm:$0xff] (%p861_p7)  ;;  %s3642_s14 = smov (%p861_p7), 0  }
 0x2a5   : > { %2905 = vrot.lane.b32.xlu0 (%p861_p7), %v2904_v8, %s3078_s21  ;;  %v1708_v53 = vmul.f32 (%p861_p7), 1.442695, %v2566_v42 }
 0x2a6   : >> { %v1360_v5 = vadd.f32 %v1359_v9, %v1358_v2  ;;  %v1373_v4 = vadd.f32 %v1372_v57, %v1371_v0  ;;  %v1386_v59 = vadd.f32 %v1385_v3, %v1384_v45 }
 0x2a7   : > { %2915 = vrot.lane.b32.xlu1 (%p861_p7), %v2914_v30, %s3078_s21  ;;  %2919 = vpow2.f32 (%p861_p7), %v1708_v53 }
 0x2a8   : >> { %v1399_v16 = vsel %vm1398_vm2, %v1397_v28, %v1360_v5  ;;  %v1374_v23 = vrot.slane %v1373_v4, 1  ;;  %v1387_v26 = vrot.slane %v1386_v59, 2  ;;  %2921 = vpow2.f32 (%p861_p7), %v1710_v54 }
 0x2a9   : > { %1673 = vrot.lane.b32.xlu0 (%p861_p7), %v1414_v19, %s3079_s28 }
 0x2aa   : >> { %v1375_v17 = vadd.f32 %v1374_v23, %v1373_v4  ;;  %v1388_v18 = vadd.f32 %v1387_v26, %v1386_v59  ;;  %v3585_v4 = vld [vmem:[%s3208_s9 + $0x1] ss:$0 sm:$0xff] (%p861_p7) }
 0x2ab   : > { %1675 = vrot.lane.b32.xlu1 (%p861_p7), %v1415_v33, %s3079_s28 }
 0x2ac   : >> { %v1401_v27 = vsel %vm1400_vm5, %v1399_v16, %v1375_v17  ;;  %v1389_v13 = vrot.slane %v1388_v18, 1  ;;  %v2556_v16 = vld [vmem:[%s3242_s12 + $0x1] ss:$0 sm:$0xff] (%p861_p7) }
 0x2ad   : > { %1677 = vrot.lane.b32.xlu0 (%p861_p7), %v1416_v35, %s3079_s28 }
 0x2ae   : >> { %v1390_v44 = vadd.f32 %v1389_v13, %v1388_v18 }
 0x2af   : > { %863 = sbr.rel (!%p861_p7) target bundleno = 488 (0x1e8), region = 115  ;;  %1679 = vrot.lane.b32.xlu1 (%p861_p7), %v1417_v37, %s3079_s28 }
 0x2b0   : >> { %v1403_v29 = vsel %vm1402_vm6, %v1401_v27, %v1390_v44 }
 0x2b1   : >> { %v1411_v60 = vadd.f32 %v1410_v10, %v1403_v29  ;;  %1681 = vrot.lane.b32.xlu0 (%p861_p7), %v1418_v38, %s3079_s28 }
 0x2b3   : >> { %1413 = vst.msk [vmem:[%s1412_s20] sm:$0xff] %vm395_vm0, %v1411_v60  ;;  %1683 = vrot.lane.b32.xlu1 (%p861_p7), %v1419_v39, %s3079_s28 }
 0x2b4   : > { %v2920_v28 = vpop.eup %2919 }
 0x2b5   : > { %1685 = vrot.lane.b32.xlu0 %v1420_v47, %s3079_s28  ;;  %v2922_v3 = vpop.eup %2921  ;;  %v3582_v5 = vsub.f32 0.0, %v2920_v28 }
 0x2b6   : > { %v3587_v59 = vsub.f32 0.0, %v2922_v3 }
 0x2b7   : > { %1687 = vrot.lane.b32.xlu1 %v1421_v41, %s3079_s28 }
 0x313   : > { %v2901_v31 = vpop.permute.xlu0 %2900 }
 0x314   : > { %v2903_v34 = vunpack.i.h.bf16 %v2901_v31  ;;  %v2902_v7 = vunpack.i.l.bf16 %v2901_v31 }
 0x315   : > { %v2911_v40 = vpop.permute.xlu1 %2910 }
 0x316   : > { %2726 = vmatprep.mubr.msk.f32.mxu1 %vm603_vm3, %v2902_v7  ;;  %v2912_v50 = vunpack.i.l.bf16 %v2911_v40  ;;  %v2913_v52 = vunpack.i.h.bf16 %v2911_v40 }
 0x317   : > { %v2906_v43 = vpop.permute.xlu0 %2905  ;;  %2727 = vmatmul.mubr.msk.f32.vlgmr.msra.gmra.mxu1 %vm603_vm3, %v2903_v34 }
 0x318   : > { %v2908_v48 = vunpack.i.h.bf16 %v2906_v43  ;;  %v2907_v49 = vunpack.i.l.bf16 %v2906_v43 }
 0x319   : > { %v2916_v20 = vpop.permute.xlu1 %2915 }
 0x31a   : > { %2729 = vmatprep.mubr.msk.f32.mxu1 %vm603_vm3, %v2907_v49  ;;  %v2917_v1 = vunpack.i.l.bf16 %v2916_v20  ;;  %v2918_v55 = vunpack.i.h.bf16 %v2916_v20 }
 0x31b   : > { %2730 = vmatmul.mubr.msk.f32.gmra.mxu1 %vm603_vm3, %v2908_v48  ;;  %v1674_v51 = vpop.permute.xlu0 %1673 }
 0x31c   : > { %2732 = vmatprep.mubr.msk.f32.mxu1 %vm603_vm3, %v2912_v50  ;;  %1697 = vst.msk [vmem:[#allocation5] sm:$0xff] %vm841_vm4, %v1674_v51 }
 0x31d   : > { %v1676_v58 = vpop.permute.xlu1 %1675 }
 0x31e   : > { %1698 = vst.msk [vmem:[#allocation5 + $0x8] sm:$0xff] %vm841_vm4, %v1676_v58 }
 0x31f   : > { %2733 = vmatmul.mubr.msk.f32.gmra.mxu1 %vm603_vm3, %v2913_v52  ;;  %v1678_v2 = vpop.permute.xlu0 %1677 }
 0x320   : > { %2735 = vmatprep.mubr.msk.f32.mxu1 %vm603_vm3, %v2917_v1  ;;  %1699 = vst.msk [vmem:[#allocation5 + $0x10] sm:$0xff] %vm841_vm4, %v1678_v2 }
 0x321   : > { %v1680_v63 = vpop.permute.xlu1 %1679 }
 0x322   : > { %1700 = vst.msk [vmem:[#allocation5 + $0x18] sm:$0xff] %vm841_vm4, %v1680_v63 }
 0x323   : > { %2736 = vmatmul.mubr.msk.f32.gmra.mxu1 %vm603_vm3, %v2918_v55  ;;  %v1682_v45 = vpop.permute.xlu0 %1681 }
 0x324   : > { %1701 = vst.msk [vmem:[#allocation5 + $0x20] sm:$0xff] %vm841_vm4, %v1682_v45 }
 0x325   : > { %v1684_v0 = vpop.permute.xlu1 %1683 }
 0x326   : > { %1702 = vst.msk [vmem:[#allocation5 + $0x28] sm:$0xff] %vm841_vm4, %v1684_v0 }
 0x327   : > { %v1686_v57 = vpop.permute.xlu0 %1685 }
 0x328   : > { %1703 = vst.msk [vmem:[#allocation5 + $0x30] sm:$0xff] %vm841_vm4, %v1686_v57 }
 0x329   : > { %v1688_v9 = vpop.permute.xlu1 %1687 }
 0x32a   : > { %1704 = vst.msk [vmem:[#allocation5 + $0x38] sm:$0xff] %vm841_vm4, %v1688_v9 }
 0x3d7   : > { %v2728_v23 = vpop.f32.mrf.mxu1 }
 0x3d8   : > { %v3590_v26 = vadd.f32 %v2728_v23, %v2556_v16 }
 0x3d9   : > { %v1554_v17 = vpop.f32.mrf.mxu1 }
 0x3da   : > { %v1594_v18 = vmin.f32 %v3590_v26, 20.0  ;;  %v3593_v27 = vadd.f32 %v2556_v16, %v1554_v17  ;;  %vm1602_vm3 = vcmp.gt.f32.partialorder %v3590_v26, 20.0 }
 0x3db   : > { %v2731_v13 = vpop.f32.mrf.mxu1 }
 0x3dc   : > { %v1611_v10 = vmul.f32 1.442695, %v1594_v18  ;;  %v1593_v44 = vmin.f32 %v3593_v27, 20.0  ;;  %v3596_v29 = vadd.f32 %v2731_v13, %v2556_v16  ;;  %vm1601_vm4 = vcmp.gt.f32.partialorder %v3593_v27, 20.0 }
 0x3dd   : > { %v1564_v60 = vpop.f32.mrf.mxu1 }
 0x3de   : > { %2923 = vpow2.f32 %v1611_v10  ;;  %v1609_v19 = vmul.f32 1.442695, %v1593_v44  ;;  %v1596_v33 = vmin.f32 %v3596_v29, 20.0  ;;  %v3599_v35 = vadd.f32 %v2556_v16, %v1564_v60 }
 0x3df   : > { %v2734_v37 = vpop.f32.mrf.mxu1  ;;  %vm1604_vm7 = vcmp.gt.f32.partialorder %v3596_v29, 20.0 }
 0x3e0   : > { %2925 = vpow2.f32 %v1609_v19  ;;  %v1615_v38 = vmul.f32 1.442695, %v1596_v33  ;;  %v3601_v39 = vadd.f32 %v2734_v37, %v2556_v16  ;;  %v1595_v47 = vmin.f32 %v3599_v35, 20.0 }
 0x3e1   : > { %v1574_v41 = vpop.f32.mrf.mxu1  ;;  %vm1603_vm8 = vcmp.gt.f32.partialorder %v3599_v35, 20.0 }
 0x3e2   : > { %2927 = vpow2.f32 %v1615_v38  ;;  %v1598_v62 = vmin.f32 %v3601_v39, 20.0  ;;  %v3605_v11 = vadd.f32 %v2556_v16, %v1574_v41  ;;  %v1613_v46 = vmul.f32 1.442695, %v1595_v47 }
 0x3e3   : > { %v2737_v56 = vpop.f32.mrf.mxu1  ;;  %vm1606_vm9 = vcmp.gt.f32.partialorder %v3601_v39, 20.0 }
 0x3e4   : > { %v1619_v8 = vmul.f32 1.442695, %v1598_v62  ;;  %v1597_v30 = vmin.f32 %v3605_v11, 20.0  ;;  %v3608_v31 = vadd.f32 %v2737_v56, %v2556_v16  ;;  %2929 = vpow2.f32 %v1613_v46 }
 0x3e5   : > { %v1584_v34 = vpop.f32.mrf.mxu1  ;;  %vm1605_vm10 = vcmp.gt.f32.partialorder %v3605_v11, 20.0 }
 0x3e6   : > { %2931 = vpow2.f32 %v1619_v8  ;;  %v1617_v7 = vmul.f32 1.442695, %v1597_v30  ;;  %v1600_v40 = vmin.f32 %v3608_v31, 20.0  ;;  %v3611_v43 = vadd.f32 %v2556_v16, %v1584_v34 }
 0x3e7   : > { %vm1608_vm11 = vcmp.gt.f32.partialorder %v3608_v31, 20.0  ;;  %v3638_v8 = vmov 0.0  }
 0x3e8   : > { %2933 = vpow2.f32 %v1617_v7  ;;  %v1623_v48 = vmul.f32 1.442695, %v1600_v40  ;;  %v1599_v49 = vmin.f32 %v3611_v43, 20.0  ;;  %vm1607_vm12 = vcmp.gt.f32.partialorder %v3611_v43, 20.0 }
 0x3ea   : > { %2935 = vpow2.f32 %v1623_v48  ;;  %v1621_v20 = vmul.f32 1.442695, %v1599_v49 }
 0x3eb   : > { %v2924_v50 = vpop.eup %2923 }
 0x3ec   : > { %v1626_v52 = vadd.f32 1.0, %v2924_v50  ;;  %2937 = vpow2.f32 %v1621_v20 }
 0x3ed   : > { %v2926_v1 = vpop.eup %2925 }
 0x3ee   : > { %2939 = vlog2.f32 %v1626_v52  ;;  %v1625_v55 = vadd.f32 1.0, %v2926_v1 }
 0x3ef   : > { %v2928_v42 = vpop.eup %2927 }
 0x3f0   : > { %2941 = vlog2.f32 %v1625_v55  ;;  %v1628_v24 = vadd.f32 1.0, %v2928_v42 }
 0x3f1   : > { %v2930_v53 = vpop.eup %2929 }
 0x3f2   : > { %2943 = vlog2.f32 %v1628_v24  ;;  %v1627_v58 = vadd.f32 1.0, %v2930_v53 }
 0x3f3   : > { %v2932_v54 = vpop.eup %2931 }
 0x3f4   : > { %v1630_v51 = vadd.f32 1.0, %v2932_v54  ;;  %2945 = vlog2.f32 %v1627_v58 }
 0x3f5   : > { %v2934_v63 = vpop.eup %2933 }
 0x3f6   : > { %2947 = vlog2.f32 %v1630_v51  ;;  %v1629_v2 = vadd.f32 1.0, %v2934_v63 }
 0x3f7   : > { %v2936_v0 = vpop.eup %2935 }
 0x3f8   : > { %2949 = vlog2.f32 %v1629_v2  ;;  %v1632_v45 = vadd.f32 1.0, %v2936_v0 }
 0x3f9   : > { %v2938_v28 = vpop.eup %2937 }
 0x3fa   : > { %2951 = vlog2.f32 %v1632_v45  ;;  %v1631_v57 = vadd.f32 1.0, %v2938_v28 }
 0x3fb   : > { %v2940_v9 = vpop.eup %2939 }
 0x3fc   : > { %v1636_v3 = vmul.f32 0.6931472, %v2940_v9  ;;  %2953 = vlog2.f32 %v1631_v57 }
 0x3fd   : > { %v2942_v16 = vpop.eup %2941 }
 0x3fe   : > { %v1650_v23 = vsel %vm1602_vm3, %v3590_v26, %v1636_v3  ;;  %v1634_v17 = vmul.f32 0.6931472, %v2942_v16 }
 0x3ff   : > { %v2944_v18 = vpop.eup %2943  ;;  %1658 = vst.msk [vmem:[#allocation4 + $0x8] sm:$0xff] %vm395_vm0, %v1650_v23 }
 0x400   : > { %v1649_v13 = vsel %vm1601_vm4, %v3593_v27, %v1634_v17  ;;  %v1640_v10 = vmul.f32 0.6931472, %v2944_v18 }
 0x401   : > { %1657 = vst.msk [vmem:[#allocation4] sm:$0xff] %vm395_vm0, %v1649_v13  ;;  %v2946_v44 = vpop.eup %2945 }
 0x402   : > { %v1652_v60 = vsel %vm1604_vm7, %v3596_v29, %v1640_v10  ;;  %v1638_v26 = vmul.f32 0.6931472, %v2946_v44 }
 0x403   : > { %v2948_v19 = vpop.eup %2947  ;;  %1660 = vst.msk [vmem:[#allocation4 + $0x18] sm:$0xff] %vm395_vm0, %v1652_v60 }
 0x404   : > { %v1644_v33 = vmul.f32 0.6931472, %v2948_v19  ;;  %v1651_v38 = vsel %vm1603_vm8, %v3599_v35, %v1638_v26 }
 0x405   : > { %v2950_v37 = vpop.eup %2949  ;;  %1659 = vst.msk [vmem:[#allocation4 + $0x10] sm:$0xff] %vm395_vm0, %v1651_v38 }
 0x406   : > { %v1654_v27 = vsel %vm1606_vm9, %v3601_v39, %v1644_v33  ;;  %v1642_v47 = vmul.f32 0.6931472, %v2950_v37 }
 0x407   : > { %v2952_v41 = vpop.eup %2951  ;;  %1662 = vst.msk [vmem:[#allocation4 + $0x28] sm:$0xff] %vm395_vm0, %v1654_v27 }
 0x408   : > { %v1653_v29 = vsel %vm1605_vm10, %v3605_v11, %v1642_v47  ;;  %v1648_v62 = vmul.f32 0.6931472, %v2952_v41  ;;  %v3640_v11 = vmov 0.0  }
 0x409   : > { %1661 = vst.msk [vmem:[#allocation4 + $0x20] sm:$0xff] %vm395_vm0, %v1653_v29  ;;  %v2954_v35 = vpop.eup %2953 }
 0x40a   : > { %v1656_v46 = vsel %vm1608_vm11, %v3608_v31, %v1648_v62  ;;  %v1646_v56 = vmul.f32 0.6931472, %v2954_v35 }
 0x40b   : > { %1664 = vst.msk [vmem:[#allocation4 + $0x38] sm:$0xff] %vm395_vm0, %v1656_v46 }
 0x40c   : > { %v1655_v39 = vsel %vm1607_vm12, %v3611_v43, %v1646_v56 }
 0x40d   : > { %1663 = vst.msk [vmem:[#allocation4 + $0x30] sm:$0xff] %vm395_vm0, %v1655_v39 }
 0x40e LB: >> { %s1724_s29 = ssub.s32 7, %s3074_s14  ;;  %s1721_s14 = sadd.s32 1, %s3074_s14   ;;  %s3074_s14 = sphi %s3642_s14, %s1721_s14   ;;  %v3070_v11 = vphi %v3640_v11, %v3747_v11   ;;  %v3066_v8 = vphi %v3638_v8, %v3749_v8  }
 0x40f   : >> { %s3654_s30 = sshll.u32 %s1724_s29, 3  ;;  %p1718_p8 = scmp.ge.s32.totalorder %s1721_s14, 8  }
 0x410   : >> { %s1730_s7 = scalar_lea.vmem [#allocation5], %s3654_s30  ;;  %s1726_s8 = scalar_lea.vmem [#allocation4], %s3654_s30  ;;  %vm2314_vm3 = vcmask (%p1718_p8), 519168  }
 0x411   : >> { %v1731_v30 = vld [vmem:[%s1730_s7] sm:$0xff]  ;;  %s1728_s9 = scalar_lea.vmem [#allocation2], %s3654_s30  ;;  %s2270_s22 = scalar_lea.vmem [#allocation6], %s3654_s30 }
 0x412   : >> { %v2001_v31 = vrot.slane %v1731_v30, %v1142_v25  ;;  %v1990_v34 = vrot.slane %v1731_v30, %v1131_v6  ;;  %v1979_v7 = vrot.slane %v1731_v30, %v1120_v61  ;;  %v1968_v40 = vrot.slane %v1731_v30, %v1109_v36  ;;  %v3677_v54 = vld [vmem:[%s1728_s9] sm:$0xff] }
 0x413   : >> { %v1957_v43 = vrot.slane %v1731_v30, %v1098_v32  ;;  %v1946_v48 = vrot.slane %v1731_v30, %v1087_v21  ;;  %v1935_v49 = vrot.slane %v1731_v30, %v1076_v15  ;;  %v1924_v50 = vrot.slane %v1731_v30, %v3317_v14 }
 0x414   : >> { %2003 = vbcast.lane.b32.xlu0 %v2001_v31, 256  ;;  %1992 = vbcast.lane.b32.xlu1 %v1990_v34, 256  ;;  %v1727_v20 = vld [vmem:[%s1726_s8] sm:$0xff] }
 0x415   : >> { %v1733_v52 = vcombine.high %v1727_v20, %v1727_v20  ;;  %v1740_v51 = vrot.slane %v1727_v20, %v3337_v22  ;;  %v1870_v2 = vmul.f32 %v3677_v54, %v1727_v20 }
 0x417   : >> { %v1747_v1 = vrot.slane %v1733_v52, %v3337_v22  ;;  %v1748_v45 = vcombine.high %v1740_v51, %v1740_v51  ;;  %v1872_v9 = vcombine.high %v1870_v2, %v1870_v2  ;;  %v1756_v13 = vrot.slane %v1740_v51, %v3337_v22 }
 0x418   : >> { %2007 = vbcast.lane.b32.xlu0 %v2001_v31, 264  ;;  %1996 = vbcast.lane.b32.xlu1 %v1990_v34, 264 }
 0x419   : >> { %v1749_v55 = vcombine.high %v1747_v1, %v1747_v1  ;;  %v1763_v53 = vrot.slane %v1747_v1, %v3337_v22  ;;  %v1770_v16 = vrot.slane %v1748_v45, %v3337_v22  ;;  %v1886_v17 = vrot.slane %v1872_v9, %v3337_v22 }
 0x41a   : >> { %v1778_v38 = vcombine.high %v1756_v13, %v1756_v13 }
 0x41b   : >> { %v1777_v42 = vrot.slane %v1749_v55, %v3337_v22  ;;  %v1779_v63 = vcombine.high %v1763_v53, %v1763_v53  ;;  %v1780_v44 = vcombine.high %v1770_v16, %v1770_v16  ;;  %v1801_v19 = vrot.slane %v1763_v53, %v3317_v14 }
 0x41c   : >> { %1985 = vbcast.lane.b32.xlu1 %v1979_v7, 264  ;;  %1981 = vbcast.lane.b32.xlu0 %v1979_v7, 256  ;;  %v1888_v26 = vcombine.high %v1886_v17, %v1886_v17  ;;  %v1793_v46 = vrot.slane %v1778_v38, %v3317_v14  ;;  %v1902_v56 = vrot.slane %v1886_v17, %v3337_v22 }
 0x41d   : >> { %v1781_v24 = vcombine.high %v1777_v42, %v1777_v42  ;;  %v1809_v28 = vrot.slane %v1779_v63, %v3317_v14  ;;  %v1805_v23 = vrot.slane %v1777_v42, %v3317_v14  ;;  %v1797_v27 = vrot.slane %v1780_v44, %v3317_v14 }
 0x41e   : >> { %v1916_v29 = vrot.slane %v1888_v26, %v3337_v22  ;;  %v1830_v35 = vmul.f32 %v1801_v19, %v3582_v5  ;;  %v1831_v30 = vmul.f32 %v1801_v19, %v3587_v59  ;;  %v1826_v55 = vmul.f32 %v1793_v46, %v3582_v5 }
 0x41f   : >> { %v1813_v58 = vrot.slane %v1781_v24, %v3317_v14  ;;  %v1834_v18 = vmul.f32 %v1809_v28, %v3582_v5  ;;  %v1835_v60 = vmul.f32 %v1809_v28, %v3587_v59  ;;  %v1832_v37 = vmul.f32 %v1805_v23, %v3582_v5 }
 0x420   : >> { %1974 = vbcast.lane.b32.xlu1 %v1968_v40, 264  ;;  %1970 = vbcast.lane.b32.xlu0 %v1968_v40, 256  ;;  %v1833_v41 = vmul.f32 %v1805_v23, %v3587_v59  ;;  %v1829_v20 = vmul.f32 %v1797_v27, %v3587_v59  ;;  %v1827_v24 = vmul.f32 %v1793_v46, %v3587_v59  ;;  %v1846_v9 = vmul.f32 1.442695, %v1826_v55 }
 0x421   : >> { %v1836_v0 = vmul.f32 %v1813_v58, %v3582_v5  ;;  %v1837_v3 = vmul.f32 %v1813_v58, %v3587_v59  ;;  %v1862_v33 = vmul.f32 1.442695, %v1834_v18  ;;  %v1864_v47 = vmul.f32 1.442695, %v1835_v60 }
 0x422   : >> { %v1858_v62 = vmul.f32 1.442695, %v1832_v37  ;;  %v1860_v39 = vmul.f32 1.442695, %v1833_v41  ;;  %v1852_v63 = vmul.f32 1.442695, %v1829_v20  ;;  %v2032_v23 = vrot.slane %v1916_v29, %v3317_v14 }
 0x423   : >> { %v1866_v57 = vmul.f32 1.442695, %v1836_v0  ;;  %v1868_v10 = vmul.f32 1.442695, %v1837_v3  ;;  %v1785_v3 = vrot.slane %v1756_v13, %v3317_v14  ;;  %v1848_v17 = vmul.f32 1.442695, %v1827_v24 }
 0x424   : >> { %1963 = vbcast.lane.b32.xlu1 %v1957_v43, 264  ;;  %1959 = vbcast.lane.b32.xlu0 %v1957_v43, 256 }
 0x425   : >> { %2956 = vpow2.f32 %v1866_v57 }
 0x426   : >> { %2958 = vpow2.f32 %v1868_v10 }
 0x427   : >> { %2960 = vpow2.f32 %v1862_v33 }
 0x428   : >> { %1952 = vbcast.lane.b32.xlu1 %v1946_v48, 264  ;;  %1948 = vbcast.lane.b32.xlu0 %v1946_v48, 256  ;;  %2962 = vpow2.f32 %v1864_v47 }
 0x429   : >> { %2964 = vpow2.f32 %v1858_v62 }
 0x42a   : >> { %2966 = vpow2.f32 %v1860_v39 }
 0x42c   : >> { %1941 = vbcast.lane.b32.xlu1 %v1935_v49, 264  ;;  %1937 = vbcast.lane.b32.xlu0 %v1935_v49, 256 }
 0x430   : >> { %1930 = vbcast.lane.b32.xlu1 %v1924_v50, 264  ;;  %1926 = vbcast.lane.b32.xlu0 %v1924_v50, 256 }
 0x434   : >> { %2071 = vbcast.lane.b32.xlu1 %v1924_v50, 280  ;;  %2067 = vbcast.lane.b32.xlu0 %v1924_v50, 272  ;;  %v1856_v50 = vmul.f32 1.442695, %v1831_v30  ;;  %v1823_v30 = vmul.f32 %v1785_v3, %v3587_v59 }
 0x438   : >> { %2079 = vbcast.lane.b32.xlu1 %v1935_v49, 280  ;;  %2075 = vbcast.lane.b32.xlu0 %v1935_v49, 272  ;;  %v1918_v49 = vcombine.high %v1902_v56, %v1902_v56 }
 0x43a   : >> { %v2036_v28 = vrot.slane %v1918_v49, %v3317_v14 }
 0x43c   : >> { %2087 = vbcast.lane.b32.xlu1 %v1946_v48, 280  ;;  %2083 = vbcast.lane.b32.xlu0 %v1946_v48, 272  ;;  %v2957_v48 = vpop.eup %2956 }
 0x43d   : >> { %v2129_v42 = vmul.f32 %v3070_v11, %v2957_v48  ;;  %v2959_v53 = vpop.eup %2958 }
 0x43e   : >> { %v2961_v57 = vpop.eup %2960  ;;  %v2130_v11 = vmul.f32 %v3066_v8, %v2959_v53  ;;  %v2028_v8 = vrot.slane %v1902_v56, %v3317_v14 }
 0x43f   : >> { %v2963_v26 = vpop.eup %2962 }
 0x440   : >> { %2095 = vbcast.lane.b32.xlu1 %v1957_v43, 280  ;;  %2091 = vbcast.lane.b32.xlu0 %v1957_v43, 272  ;;  %v1879_v43 = vrot.slane %v1870_v2, %v3337_v22  ;;  %v2965_v38 = vpop.eup %2964 }
 0x442   : >> { %v1887_v2 = vcombine.high %v1879_v43, %v1879_v43 }
 0x444   : >> { %2103 = vbcast.lane.b32.xlu1 %v1968_v40, 280  ;;  %2099 = vbcast.lane.b32.xlu0 %v1968_v40, 272  ;;  %v1789_v40 = vrot.slane %v1770_v16, %v3317_v14  ;;  %v1909_v44 = vrot.slane %v1887_v2, %v3337_v22 }
 0x446   : >> { %v1824_v0 = vmul.f32 %v1789_v40, %v3582_v5  ;;  %v1825_v60 = vmul.f32 %v1789_v40, %v3587_v59  ;;  %v1919_v46 = vcombine.high %v1909_v44, %v1909_v44 }
 0x448   : >> { %2111 = vbcast.lane.b32.xlu1 %v1979_v7, 280  ;;  %2107 = vbcast.lane.b32.xlu0 %v1979_v7, 272  ;;  %v1828_v7 = vmul.f32 %v1797_v27, %v3582_v5  ;;  %v1842_v19 = vmul.f32 1.442695, %v1824_v0  ;;  %v1822_v27 = vmul.f32 %v1785_v3, %v3582_v5  ;;  %v1844_v39 = vmul.f32 1.442695, %v1825_v60 }
 0x44a   : >> { %v1850_v1 = vmul.f32 1.442695, %v1828_v7  ;;  %v1838_v49 = vmul.f32 1.442695, %v1822_v27 }
 0x44c   : >> { %2119 = vbcast.lane.b32.xlu1 %v1990_v34, 280  ;;  %2115 = vbcast.lane.b32.xlu0 %v1990_v34, 272  ;;  %v1854_v34 = vmul.f32 1.442695, %v1830_v35 }
 0x44e   : >> { %2968 = vpow2.f32 %v1854_v34 }
 0x44f   : >> { %2970 = vpow2.f32 %v1856_v50 }
 0x450   : >> { %2127 = vbcast.lane.b32.xlu1 %v2001_v31, 280  ;;  %2123 = vbcast.lane.b32.xlu0 %v2001_v31, 272  ;;  %v1920_v31 = vcombine.high %v1916_v29, %v1916_v29  ;;  %2972 = vpow2.f32 %v1850_v1  ;;  %v1895_v29 = vrot.slane %v1879_v43, %v3337_v22  ;;  %v2024_v1 = vrot.slane %v1919_v46, %v3317_v14 }
 0x451   : >> { %2974 = vpow2.f32 %v1852_v63 }
 0x452   : >> { %v2040_v52 = vrot.slane %v1920_v31, %v3317_v14  ;;  %2976 = vpow2.f32 %v1846_v9  ;;  %v2967_v31 = vpop.eup %2966  ;;  %v1917_v55 = vcombine.high %v1895_v29, %v1895_v29 }
 0x453   : >> { %2978 = vpow2.f32 %v1848_v17 }
 0x454   : >> { %2980 = vpow2.f32 %v1842_v19 }
 0x455   : >> { %2982 = vpow2.f32 %v1844_v39 }
 0x456   : >> { %2984 = vpow2.f32 %v1838_v49  ;;  %v2012_v49 = vrot.slane %v1895_v29, %v3317_v14 }
 0x45b   : >> { %v2969_v48 = vpop.eup %2968 }
 0x45c   : >> { %v2971_v24 = vpop.eup %2970 }
 0x45d   : >> { %v2973_v2 = vpop.eup %2972 }
 0x45e   : >> { %v2975_v3 = vpop.eup %2974 }
 0x486   : >> { %v2004_v58 = vpop.permute.xlu0 %2003  ;;  %v1993_v51 = vpop.permute.xlu1 %1992 }
 0x487   : >> { %v2063_v45 = vmul.f32 %v2040_v52, %v2004_v58  ;;  %v2061_v33 = vmul.f32 %v2036_v28, %v1993_v51 }
 0x489   : >> { %v3711_v16 = vadd.f32 %v2129_v42, %v2063_v45  ;;  %v1840_v42 = vmul.f32 1.442695, %v1823_v30 }
 0x48a   : >> { %v2008_v18 = vpop.permute.xlu0 %2007  ;;  %v1997_v10 = vpop.permute.xlu1 %1996 }
 0x48b   : >> { %v2144_v37 = vmul.f32 %v2961_v57, %v3711_v16  ;;  %v2064_v13 = vmul.f32 %v2040_v52, %v2008_v18  ;;  %v2062_v34 = vmul.f32 %v2036_v28, %v1997_v10  ;;  %v2020_v57 = vrot.slane %v1917_v55, %v3317_v14  ;;  %v2977_v10 = vpop.eup %2976 }
 0x48c   : >> { %2986 = vpow2.f32 %v1840_v42 }
 0x48d   : >> { %v3720_v47 = vadd.f32 %v2144_v37, %v2061_v33  ;;  %v3722_v41 = vadd.f32 %v2130_v11, %v2064_v13  ;;  %v2016_v13 = vrot.slane %v1909_v44, %v3317_v14 }
 0x48e   : >> { %v1986_v62 = vpop.permute.xlu1 %1985  ;;  %v1982_v35 = vpop.permute.xlu0 %1981 }
 0x48f   : >> { %v2145_v56 = vmul.f32 %v2963_v26, %v3722_v41  ;;  %v2059_v7 = vmul.f32 %v2032_v23, %v1982_v35  ;;  %v2159_v40 = vmul.f32 %v2965_v38, %v3720_v47  ;;  %v2060_v53 = vmul.f32 %v2032_v23, %v1986_v62  ;;  %v2979_v26 = vpop.eup %2978 }
 0x490   : >> { %v2981_v38 = vpop.eup %2980 }
 0x491   : >> { %v3728_v50 = vadd.f32 %v2145_v56, %v2062_v34  ;;  %v3730_v20 = vadd.f32 %v2159_v40, %v2059_v7  ;;  %v2983_v34 = vpop.eup %2982 }
 0x492   : >> { %v1975_v43 = vpop.permute.xlu1 %1974  ;;  %v1971_v52 = vpop.permute.xlu0 %1970 }
 0x493   : >> { %v2160_v58 = vmul.f32 %v2967_v31, %v3728_v50  ;;  %v2057_v51 = vmul.f32 %v2028_v8, %v1971_v52  ;;  %v2174_v63 = vmul.f32 %v2969_v48, %v3730_v20  ;;  %v2058_v11 = vmul.f32 %v2028_v8, %v1975_v43  ;;  %v2985_v43 = vpop.eup %2984 }
 0x495   : >> { %v3735_v0 = vadd.f32 %v2160_v58, %v2060_v53  ;;  %v3737_v45 = vadd.f32 %v2174_v63, %v2057_v51 }
 0x496   : >> { %v1964_v28 = vpop.permute.xlu1 %1963  ;;  %v1960_v9 = vpop.permute.xlu0 %1959 }
 0x497   : >> { %v2175_v23 = vmul.f32 %v2971_v24, %v3735_v0  ;;  %v2055_v17 = vmul.f32 %v2024_v1, %v1960_v9  ;;  %v2189_v18 = vmul.f32 %v2973_v2, %v3737_v45  ;;  %v2056_v27 = vmul.f32 %v2024_v1, %v1964_v28 }
 0x499   : >> { %v3742_v60 = vadd.f32 %v2175_v23, %v2058_v11  ;;  %v2191_v19 = vadd.f32 %v2189_v18, %v2055_v17  ;;  %v2987_v42 = vpop.eup %2986 }
 0x49a   : >> { %v1953_v33 = vpop.permute.xlu1 %1952  ;;  %v1949_v37 = vpop.permute.xlu0 %1948 }
 0x49b   : >> { %v2190_v62 = vmul.f32 %v2975_v3, %v3742_v60  ;;  %v2053_v35 = vmul.f32 %v2020_v57, %v1949_v37  ;;  %v2204_v8 = vmul.f32 %v2977_v10, %v2191_v19  ;;  %v2054_v56 = vmul.f32 %v2020_v57, %v1953_v33 }
 0x49d   : >> { %v2192_v46 = vadd.f32 %v2190_v62, %v2056_v27  ;;  %v2206_v39 = vadd.f32 %v2204_v8, %v2053_v35 }
 0x49e   : >> { %v1942_v30 = vpop.permute.xlu1 %1941  ;;  %v1938_v31 = vpop.permute.xlu0 %1937 }
 0x49f   : >> { %v2205_v7 = vmul.f32 %v2979_v26, %v2192_v46  ;;  %v2051_v40 = vmul.f32 %v2016_v13, %v1938_v31  ;;  %v2219_v48 = vmul.f32 %v2981_v38, %v2206_v39  ;;  %v2052_v24 = vmul.f32 %v2016_v13, %v1942_v30 }
 0x4a1   : >> { %v2207_v52 = vadd.f32 %v2205_v7, %v2054_v56  ;;  %v2221_v44 = vadd.f32 %v2219_v48, %v2051_v40 }
 0x4a2   : >> { %v1931_v55 = vpop.permute.xlu1 %1930  ;;  %v1927_v1 = vpop.permute.xlu0 %1926 }
 0x4a3   : >> { %v2220_v53 = vmul.f32 %v2983_v34, %v2207_v52  ;;  %v2049_v58 = vmul.f32 %v2012_v49, %v1927_v1  ;;  %v2234_v51 = vmul.f32 %v2985_v43, %v2221_v44  ;;  %v2050_v9 = vmul.f32 %v2012_v49, %v1931_v55 }
 0x4a5   : >> { %v2222_v63 = vadd.f32 %v2220_v53, %v2052_v24  ;;  %v3747_v11 = vadd.f32 %v2234_v51, %v2049_v58  }
 0x4a6   : >> { %v2072_v2 = vpop.permute.xlu1 %2071  ;;  %v2068_v28 = vpop.permute.xlu0 %2067 }
 0x4a7   : >> { %v2235_v57 = vmul.f32 %v2987_v42, %v2222_v63  ;;  %v2238_v10 = vmul.f32 %v3747_v11, %v2068_v28 }
 0x4a9   : >> { %v3749_v8 = vadd.f32 %v2235_v57, %v2050_v9   ;;  %v2240_v35 = vsel %vm395_vm0, %v2238_v10, 0.0 }
 0x4aa   : >> { %v2080_v29 = vpop.permute.xlu1 %2079  ;;  %v2076_v3 = vpop.permute.xlu0 %2075 }
 0x4ab   : >> { %v2239_v23 = vmul.f32 %v3749_v8, %v2072_v2  ;;  %v2224_v17 = vmul.f32 %v2222_v63, %v2080_v29  ;;  %v2223_v18 = vmul.f32 %v2221_v44, %v2076_v3 }
 0x4ad   : >> { %v2241_v26 = vsel %vm395_vm0, %v2239_v23, 0.0  ;;  %v2226_v13 = vsel %vm395_vm0, %v2224_v17, 0.0  ;;  %v2225_v38 = vsel %vm395_vm0, %v2223_v18, 0.0 }
 0x4ae   : >> { %v2088_v33 = vpop.permute.xlu1 %2087  ;;  %v2084_v37 = vpop.permute.xlu0 %2083  ;;  %v2242_v30 = vadd.f32 %v2241_v26, %v2240_v35  ;;  %v2227_v56 = vadd.f32 %v2226_v13, %v2225_v38 }
 0x4af   : >> { %v2209_v27 = vmul.f32 %v2207_v52, %v2088_v33  ;;  %v2208_v62 = vmul.f32 %v2206_v39, %v2084_v37 }
 0x4b0   : >> { %v2243_v44 = vrot.slane %v2242_v30, 4  ;;  %v2228_v52 = vrot.slane %v2227_v56, 4 }
 0x4b1   : >> { %v2211_v31 = vsel %vm395_vm0, %v2209_v27, 0.0  ;;  %v2210_v34 = vsel %vm395_vm0, %v2208_v62, 0.0 }
 0x4b2   : >> { %v2096_v7 = vpop.permute.xlu1 %2095  ;;  %v2092_v40 = vpop.permute.xlu0 %2091  ;;  %v2212_v48 = vadd.f32 %v2211_v31, %v2210_v34  ;;  %v2244_v2 = vadd.f32 %v2243_v44, %v2242_v30 }
 0x4b3   : >> { %v2194_v49 = vmul.f32 %v2192_v46, %v2096_v7  ;;  %v2193_v43 = vmul.f32 %v2191_v19, %v2092_v40  ;;  %v2229_v46 = vadd.f32 %v2228_v52, %v2227_v56 }
 0x4b4   : >> { %v2213_v53 = vrot.slane %v2212_v48, 4  ;;  %v2245_v10 = vrot.slane %v2244_v2, 2 }
 0x4b5   : >> { %v2196_v55 = vsel %vm395_vm0, %v2194_v49, 0.0  ;;  %v2195_v1 = vsel %vm395_vm0, %v2193_v43, 0.0  ;;  %v2230_v33 = vrot.slane %v2229_v46, 2 }
 0x4b6   : >> { %v2197_v39 = vadd.f32 %v2196_v55, %v2195_v1  ;;  %v2104_v42 = vpop.permute.xlu1 %2103  ;;  %v2100_v24 = vpop.permute.xlu0 %2099  ;;  %v2214_v29 = vadd.f32 %v2213_v53, %v2212_v48 }
 0x4b7   : >> { %v2179_v58 = vmul.f32 %v3742_v60, %v2104_v42  ;;  %v2178_v51 = vmul.f32 %v3737_v45, %v2100_v24  ;;  %v2231_v40 = vadd.f32 %v2230_v33, %v2229_v46 }
 0x4b8   : >> { %v2198_v63 = vrot.slane %v2197_v39, 4  ;;  %v2215_v27 = vrot.slane %v2214_v29, 2 }
 0x4b9   : >> { %v2181_v28 = vsel %vm395_vm0, %v2179_v58, 0.0  ;;  %v2180_v19 = vsel %vm395_vm0, %v2178_v51, 0.0  ;;  %v2232_v51 = vrot.slane %v2231_v40, 1 }
 0x4ba   : >> { %v2112_v9 = vpop.permute.xlu1 %2111  ;;  %v2108_v57 = vpop.permute.xlu0 %2107  ;;  %v2182_v3 = vadd.f32 %v2181_v28, %v2180_v19  ;;  %v2199_v18 = vadd.f32 %v2198_v63, %v2197_v39  ;;  %v2216_v55 = vadd.f32 %v2215_v27, %v2214_v29 }
 0x4bb   : >> { %v2164_v23 = vmul.f32 %v3735_v0, %v2112_v9  ;;  %v2163_v17 = vmul.f32 %v3730_v20, %v2108_v57  ;;  %v2246_v20 = vadd.f32 %v2245_v10, %v2244_v2 }
 0x4bc   : >> { %v2183_v60 = vrot.slane %v2182_v3, 4  ;;  %v2200_v0 = vrot.slane %v2199_v18, 2  ;;  %v2217_v19 = vrot.slane %v2216_v55, 1 }
 0x4bd   : >> { %v2166_v45 = vsel %vm395_vm0, %v2164_v23, 0.0  ;;  %v2165_v26 = vsel %vm395_vm0, %v2163_v17, 0.0  ;;  %v2247_v42 = vrot.slane %v2246_v20, 1 }
 0x4be   : >> { %v2167_v37 = vadd.f32 %v2166_v45, %v2165_v26  ;;  %v2120_v13 = vpop.permute.xlu1 %2119  ;;  %v2116_v38 = vpop.permute.xlu0 %2115  ;;  %v2184_v62 = vadd.f32 %v2183_v60, %v2182_v3  ;;  %v2201_v52 = vadd.f32 %v2200_v0, %v2199_v18  ;;  %v2218_v18 = vadd.f32 %v2217_v19, %v2216_v55 }
 0x4bf   : >> { %v2149_v35 = vmul.f32 %v3728_v50, %v2120_v13  ;;  %v2148_v30 = vmul.f32 %v3720_v47, %v2116_v38 }
 0x4c0   : >> { %v2168_v31 = vrot.slane %v2167_v37, 4  ;;  %v2185_v34 = vrot.slane %v2184_v62, 2  ;;  %v2202_v46 = vrot.slane %v2201_v52, 1 }
 0x4c1   : >> { %v2151_v56 = vsel %vm395_vm0, %v2149_v35, 0.0  ;;  %v2150_v7 = vsel %vm395_vm0, %v2148_v30, 0.0  ;;  %v2268_v30 = vmul.f32 %v3585_v4, %v3677_v54 }
 0x4c2   : >> { %v2169_v48 = vadd.f32 %v2168_v31, %v2167_v37  ;;  %v2152_v49 = vadd.f32 %v2151_v56, %v2150_v7  ;;  %v2128_v43 = vpop.permute.xlu1 %2127  ;;  %v2124_v44 = vpop.permute.xlu0 %2123  ;;  %v2186_v24 = vadd.f32 %v2185_v34, %v2184_v62  ;;  %v2203_v10 = vadd.f32 %v2202_v46, %v2201_v52  ;;  %v2271_v56 = vld [vmem:[%s2270_s22] sm:$0xff] }
 0x4c3   : >> { %v2134_v1 = vmul.f32 %v3722_v41, %v2128_v43  ;;  %v2133_v50 = vmul.f32 %v3711_v16, %v2124_v44  ;;  %v2248_v41 = vadd.f32 %v2247_v42, %v2246_v20  ;;  %v2233_v16 = vadd.f32 %v2232_v51, %v2231_v40 }
 0x4c4   : >> { %v2170_v47 = vrot.slane %v2169_v48, 2  ;;  %v2153_v39 = vrot.slane %v2152_v49, 4  ;;  %v2187_v29 = vrot.slane %v2186_v24, 1 }
 0x4c5   : >> { %v2136_v53 = vsel %vm395_vm0, %v2134_v1, 0.0  ;;  %v2135_v58 = vsel %vm395_vm0, %v2133_v50, 0.0  ;;  %v2250_v33 = vsel %vm1391_vm13, %v2248_v41, %v2233_v16 }
 0x4c6   : >> { %v2171_v63 = vadd.f32 %v2170_v47, %v2169_v48  ;;  %v2154_v2 = vadd.f32 %v2153_v39, %v2152_v49  ;;  %v2137_v28 = vadd.f32 %v2136_v53, %v2135_v58  ;;  %v2188_v26 = vadd.f32 %v2187_v29, %v2186_v24 }
 0x4c7   : >> { %v2251_v38 = vsel %vm628_vm1, %v2250_v33, %v2218_v18 }
 0x4c8   : >> { %v2155_v9 = vrot.slane %v2154_v2, 2  ;;  %v2138_v57 = vrot.slane %v2137_v28, 4  ;;  %v2172_v3 = vrot.slane %v2171_v63, 1  ;;  %v2253_v62 = vsel %vm1394_vm14, %v2251_v38, %v2203_v10 }
 0x4c9   : >> { %v2255_v0 = vsel %vm1396_vm15, %v2253_v62, %v2188_v26 }
 0x4ca   : >> { %v2156_v23 = vadd.f32 %v2155_v9, %v2154_v2  ;;  %v2139_v17 = vadd.f32 %v2138_v57, %v2137_v28  ;;  %v2173_v37 = vadd.f32 %v2172_v3, %v2171_v63 }
 0x4cc   : >> { %v2157_v60 = vrot.slane %v2156_v23, 1  ;;  %v2140_v45 = vrot.slane %v2139_v17, 2  ;;  %v2257_v31 = vsel %vm1398_vm2, %v2255_v0, %v2173_v37 }
 0x4ce   : >> { %v2141_v13 = vadd.f32 %v2140_v45, %v2139_v17  ;;  %v2158_v27 = vadd.f32 %v2157_v60, %v2156_v23 }
 0x4d0   : >> { %v2142_v35 = vrot.slane %v2141_v13, 1  ;;  %v2259_v34 = vsel %vm1400_vm5, %v2257_v31, %v2158_v27 }
 0x4d2   : >> { %v2143_v20 = vadd.f32 %v2142_v35, %v2141_v13 }
 0x4d4   : >> { %v2261_v7 = vsel %vm1402_vm6, %v2259_v34, %v2143_v20 }
 0x4d5   : >> { %v2269_v40 = vadd.f32 %v2268_v30, %v2261_v7  ;;  %1720 = sbr.rel (!%p1718_p8) target bundleno = 1038 (0x40e), region = 126 }
 0x4d7   : >> { %v2272_v48 = vadd.f32 %v2271_v56, %v2269_v40 }
 0x4d9   : >> { %2273 = vst.msk [vmem:[%s2270_s22] sm:$0xff] %vm395_vm0, %v2272_v48 }
 0x4e0   : > { %v2274_v54 = vld [vmem:[#allocation6] sm:$0xff]  ;;  %v2275_v49 = vld [vmem:[#allocation6 + $0x8] sm:$0xff]  ;;  %v2276_v43 = vld [vmem:[#allocation6 + $0x10] sm:$0xff] }
 0x4e1   : > { %v2583_v44 = vpack.c.bf16 %v2274_v54, %v2274_v54  ;;  %v2584_v55 = vpack.c.bf16 %v2275_v49, %v2275_v49  ;;  %v2585_v1 = vpack.c.bf16 %v2276_v43, %v2276_v43  ;;  %v2277_v50 = vld [vmem:[#allocation6 + $0x18] sm:$0xff]  ;;  %v2278_v52 = vld [vmem:[#allocation6 + $0x20] sm:$0xff]  ;;  %v2279_v11 = vld [vmem:[#allocation6 + $0x28] sm:$0xff] }
 0x4e2   : > { %v2586_v47 = vpack.c.bf16 %v2277_v50, %v2277_v50  ;;  %v2587_v39 = vpack.c.bf16 %v2278_v52, %v2278_v52  ;;  %v2588_v12 = vpack.c.bf16 %v2279_v11, %v2279_v11  ;;  %v2280_v14 = vld [vmem:[#allocation6 + $0x30] sm:$0xff]  ;;  %v2281_v15 = vld [vmem:[#allocation6 + $0x38] sm:$0xff] }
 0x4e3   : > { %2315 = vst.msk [vmem:[%s3164_s17] sm:$0xf] %vm2314_vm3, %v2583_v44  ;;  %2316 = vst.msk [vmem:[%s3164_s17 + $0x4] sm:$0xf] %vm2314_vm3, %v2584_v55  ;;  %v2589_v21 = vpack.c.bf16 %v2280_v14, %v2280_v14  ;;  %v2590_v22 = vpack.c.bf16 %v2281_v15, %v2281_v15 }
 0x4e4   : > { %2317 = vst.msk [vmem:[%s3164_s17 + $0x8] sm:$0xf] %vm2314_vm3, %v2585_v1  ;;  %2318 = vst.msk [vmem:[%s3164_s17 + $0xc] sm:$0xf] %vm2314_vm3, %v2586_v47 }
 0x4e5   : > { %2319 = vst.msk [vmem:[%s3164_s17 + $0x10] sm:$0xf] %vm2314_vm3, %v2587_v39  ;;  %2320 = vst.msk [vmem:[%s3164_s17 + $0x14] sm:$0xf] %vm2314_vm3, %v2588_v12 }
 0x4e6   : > { %2321 = vst.msk [vmem:[%s3164_s17 + $0x18] sm:$0xf] %vm2314_vm3, %v2589_v21  ;;  %2322 = vst.msk [vmem:[%s3164_s17 + $0x1c] sm:$0xf] %vm2314_vm3, %v2590_v22 }
 0x4e7 PF: > { %s16_s25 = sadd.s32 1, %s3050_s25   ;;  %s3836_s21 = smov %s3042_s23 }
 0x4e8   : > { %p13_p9 = scmp.ge.s32.totalorder %s16_s25, 6   ;;  %s3837_s22 = smov %s3046_s24 }
 0x4e9   : > { %s3838_s23 = smov %s3841_s26  ;;  %s3839_s24 = smov %s3845_s27 }
 0x4ea   :  { %15 = sbr.rel (!%p13_p9) target bundleno = 3 (0x3), region = 137 }

</bundles_post_ra>
